<compile_context>
chip_gen: v7x
topology: tpu7x:2x2x1
jax: 0.10.0
libtpu: 0.0.40
codegen_flags: <defaults>
</compile_context>

<pallas_src>
import jax
import jax.numpy as jnp
from jax import lax
from jax.experimental import pallas as pl
from jax.experimental.pallas import tpu as pltpu

BN_EPS = 1e-5
LANE = 128          # channel padding target (MXU / lane width)


def _round_up(x, m):
    return (x + m - 1) // m * m


def _pick_band(h, w):
    """Largest divisor of h such that the band matmul M-dim (th*w) <= 8192."""
    best = 1
    for d in range(1, h + 1):
        if h % d == 0 and d * w <= 8192:
            best = d
    # TODO(synk): for prime H with very large W this degenerates to th=1; switch
    # to a pl.cdiv grid with a masked tail band for such shapes.
    return best


# ---------------------------------------------------------------------------
# Conv kernel: (optional fused input BN+ReLU) + in-VMEM zero halo + 3x3 conv
# (+bias) as 9 accumulating bf16 MXU dots + centered BN partial statistics.
# ---------------------------------------------------------------------------
def _make_conv_kernel(th, h, w, cin_in, cin_p, cout_p, fuse_bn_relu_input):
    if fuse_bn_relu_input:
        assert cin_in == cin_p

    def kernel(*refs):
        if fuse_bn_relu_input:
            (x_ref, in_scale_ref, in_shift_ref, w_ref, b_ref,
             y_ref, stats_ref, pad_ref) = refs
        else:
            x_ref, w_ref, b_ref, y_ref, stats_ref, pad_ref = refs
        # x_ref    : (1, H, W, Cin_in)        unpadded image (f32 or bf16)
        # w_ref    : (9, Cin_p, Cout_p) bf16  conv taps (grid-invariant)
        # b_ref    : (1, Cout_p) f32
        # y_ref    : (1, TH, W, Cout_p) bf16  conv + bias for this row band
        # stats_ref: (1, 1, 2, Cout_p) f32    [sum, centered sum-sq] partials
        # pad_ref  : (H+2, W+2, Cin_p) f32    per-batch padded image (scratch)

        band = pl.program_id(1)

        # --- once per batch element: build the zero-halo image in VMEM, with
        # --- the previous stage's BN+ReLU fused in (stage 2 only).  The halo
        # --- stays zero, i.e. Conv2d(padding=1) pads the *activation*.
        @pl.when(band == 0)
        def _():
            pad_ref[...] = jnp.zeros(pad_ref.shape, pad_ref.dtype)
            xv = x_ref[0].astype(jnp.float32)               # (H, W, Cin_in)
            if fuse_bn_relu_input:
                xv = jnp.maximum(
                    xv * in_scale_ref[...] + in_shift_ref[...], 0.0)
            pad_ref[1:h + 1, 1:w + 1, 0:cin_in] = xv

        # --- 3x3 conv over this row band: 9 accumulating MXU dots -----------
        row0 = pl.multiple_of(band * th, th)
        acc = jnp.zeros((th * w, cout_p), jnp.float32)
        for t in range(9):                                   # static unroll
            dy, dx = divmod(t, 3)
            xt = pad_ref[pl.ds(row0 + dy, th), pl.ds(dx, w), :]
            xt = xt.reshape(th * w, cin_p).astype(jnp.bfloat16)
            acc = acc + jnp.dot(xt, w_ref[t],
                                preferred_element_type=jnp.float32)
        acc = acc + b_ref[...]                               # (1, Cout_p)

        # Conv output stored bf16 (halves HBM traffic of the intermediate).
        y_ref[0] = acc.reshape(th, w, cout_p).astype(y_ref.dtype)

        # Centered BN partials from the f32 accumulator (before the bf16 cast).
        cnt = float(th * w)
        s = jnp.sum(acc, axis=0, keepdims=True)              # (1, Cout_p)
        d = acc - s * (1.0 / cnt)
        m2 = jnp.sum(d * d, axis=0, keepdims=True)           # (1, Cout_p)
        stats_ref[0, 0] = jnp.concatenate([s, m2], axis=0)

    return kernel


# ---------------------------------------------------------------------------
# Final BN apply + ReLU, written directly in NCHW-friendly (N, C, H*W) layout.
# ---------------------------------------------------------------------------
def _make_bn_relu_nchw_kernel(th, w, c_out, cout_p):
    def kernel(y_ref, scale_ref, shift_ref, o_ref):
        v = y_ref[0].astype(jnp.float32)                      # (TH, W, Cout_p)
        v = jnp.maximum(v * scale_ref[...] + shift_ref[...], 0.0)
        v = v.reshape(th * w, cout_p).T                       # XLU transpose
        o_ref[0] = v[0:c_out, :]                              # (C_out, TH*W)
    return kernel


def _bn_relu_nhwc_kernel(y_ref, scale_ref, shift_ref, o_ref):
    # Fallback path (awkward th*w): NHWC out, XLA epilogue in the wrapper.
    v = y_ref[...].astype(jnp.float32)
    o_ref[...] = jnp.maximum(v * scale_ref[...] + shift_ref[...], 0.0)


# ---------------------------------------------------------------------------
# One conv stage: conv(+bias) kernel with optional fused input BN+ReLU.
# ---------------------------------------------------------------------------
def _conv_stage(x_nhwc, w_oihw, bias, in_scale=None, in_shift=None):
    n, h, w, cin_in = x_nhwc.shape
    cout, cin_w, kh, kw = w_oihw.shape
    assert (kh, kw) == (3, 3)
    cin_p = _round_up(max(cin_in, cin_w), LANE)
    cout_p = _round_up(cout, LANE)
    th = _pick_band(h, w)
    r_bands = h // th
    fuse = in_scale is not None

    # Tiny XLA-side prep of *weights/bias only* (activations are never padded
    # or copied on the host/XLA side).
    wt = jnp.transpose(w_oihw, (2, 3, 1, 0)).reshape(9, cin_w, cout)
    wt = jnp.pad(wt, ((0, 0), (0, cin_p - cin_w), (0, cout_p - cout)))
    wt = wt.astype(jnp.bfloat16)
    bp = jnp.pad(bias, (0, cout_p - cout)).astype(jnp.float32).reshape(1, cout_p)

    kernel = _make_conv_kernel(th, h, w, cin_in, cin_p, cout_p, fuse)

    in_specs = [pl.BlockSpec((1, h, w, cin_in), lambda i, j: (i, 0, 0, 0))]
    args = [x_nhwc]
    if fuse:
        in_specs += [pl.BlockSpec((1, cin_p), lambda i, j: (0, 0)),
                     pl.BlockSpec((1, cin_p), lambda i, j: (0, 0))]
        args += [in_scale, in_shift]
    in_specs += [pl.BlockSpec((9, cin_p, cout_p), lambda i, j: (0, 0, 0)),
                 pl.BlockSpec((1, cout_p), lambda i, j: (0, 0))]
    args += [wt, bp]

    # Explicit VMEM budget (double-buffered blocks + padded-image scratch).
    x_bytes = h * w * cin_in * x_nhwc.dtype.itemsize
    foot = (2 * x_bytes
            + 2 * 9 * cin_p * cout_p * 2
            + 2 * th * w * cout_p * (2 + 4)
            + (h + 2) * (w + 2) * cin_p * 4
            + 2 * 2 * cout_p * 4 + 4 * cin_p * 4)
    vmem_limit = int(min(64 * 2 ** 20, max(32 * 2 ** 20, 2 * foot)))

    flops = 2 * n * h * w * 9 * cin_p * cout_p
    bytes_accessed = (n * x_bytes + 9 * cin_p * cout_p * 2
                      + n * h * w * cout_p * 2
                      + n * r_bands * 2 * cout_p * 4)

    y, stats = pl.pallas_call(
        kernel,
        out_shape=(
            jax.ShapeDtypeStruct((n, h, w, cout_p), jnp.bfloat16),
            jax.ShapeDtypeStruct((n, r_bands, 2, cout_p), jnp.float32),
        ),
        grid_spec=pltpu.PrefetchScalarGridSpec(
            num_scalar_prefetch=0,
            grid=(n, r_bands),
            in_specs=in_specs,
            out_specs=[
                pl.BlockSpec((1, th, w, cout_p), lambda i, j: (i, j, 0, 0)),
                pl.BlockSpec((1, 1, 2, cout_p), lambda i, j: (i, j, 0, 0)),
            ],
            scratch_shapes=[pltpu.VMEM((h + 2, w + 2, cin_p), jnp.float32)],
        ),
        compiler_params=pltpu.CompilerParams(
            dimension_semantics=("parallel", "arbitrary"),
            vmem_limit_bytes=vmem_limit),
        cost_estimate=pl.CostEstimate(
            flops=flops, transcendentals=0, bytes_accessed=bytes_accessed),
    )(*args)
    return y, stats, th


# ---------------------------------------------------------------------------
# Tiny plain-JAX combine of the per-band BN partials (Chan's formula).
# ---------------------------------------------------------------------------
def _bn_scale_shift(stats, gamma, beta, count_band, total, cout, cout_p):
    tsum = stats[:, :, 0, :]                       # (N, R, Cout_p)
    tm2 = stats[:, :, 1, :]
    gmean = jnp.sum(tsum, axis=(0, 1)) / total
    bmean = tsum / count_band
    var = (jnp.sum(tm2, axis=(0, 1))
           + count_band * jnp.sum((bmean - gmean) ** 2, axis=(0, 1))) / total
    var = jnp.maximum(var, 0.0)                    # biased var (PyTorch BN)
    inv = lax.rsqrt(var + BN_EPS)
    # NOTE: gamma/beta are ZERO-padded so padded output channels get
    # scale=shift=0 and stay exactly 0; stage 2's fused input path relies on it.
    g = jnp.pad(gamma, (0, cout_p - cout)).astype(jnp.float32)
    b = jnp.pad(beta, (0, cout_p - cout)).astype(jnp.float32)
    scale = (g * inv).reshape(1, cout_p)
    shift = (b - gmean * g * inv).reshape(1, cout_p)
    return scale, shift


# ---------------------------------------------------------------------------
# Final BN2 apply + ReLU (only elementwise pass that survives fusion).
# ---------------------------------------------------------------------------
def _bn_relu_out(y, scale, shift, c_out, th):
    n, h, w, cout_p = y.shape
    r_bands = h // th
    if (th * w) % 128 == 0 or r_bands == 1:
        out = pl.pallas_call(
            _make_bn_relu_nchw_kernel(th, w, c_out, cout_p),
            out_shape=jax.ShapeDtypeStruct((n, c_out, h * w), jnp.float32),
            grid_spec=pltpu.PrefetchScalarGridSpec(
                num_scalar_prefetch=0,
                grid=(n, r_bands),
                in_specs=[
                    pl.BlockSpec((1, th, w, cout_p), lambda i, j: (i, j, 0, 0)),
                    pl.BlockSpec((1, cout_p), lambda i, j: (0, 0)),
                    pl.BlockSpec((1, cout_p), lambda i, j: (0, 0)),
                ],
                out_specs=pl.BlockSpec((1, c_out, th * w),
                                       lambda i, j: (i, 0, j)),
            ),
            compiler_params=pltpu.CompilerParams(
                dimension_semantics=("parallel", "parallel")),
        )(y, scale, shift)
        return out.reshape(n, c_out, h, w)          # metadata-only reshape
    # Fallback for awkward band widths: NHWC out + XLA epilogue.
    out = pl.pallas_call(
        _bn_relu_nhwc_kernel,
        out_shape=jax.ShapeDtypeStruct((n, h, w, cout_p), jnp.float32),
        grid_spec=pltpu.PrefetchScalarGridSpec(
            num_scalar_prefetch=0,
            grid=(n, r_bands),
            in_specs=[
                pl.BlockSpec((1, th, w, cout_p), lambda i, j: (i, j, 0, 0)),
                pl.BlockSpec((1, cout_p), lambda i, j: (0, 0)),
                pl.BlockSpec((1, cout_p), lambda i, j: (0, 0)),
            ],
            out_specs=pl.BlockSpec((1, th, w, cout_p), lambda i, j: (i, j, 0, 0)),
        ),
        compiler_params=pltpu.CompilerParams(
            dimension_semantics=("parallel", "parallel")),
    )(y, scale, shift)
    return jnp.transpose(out[..., :c_out], (0, 3, 1, 2))


# ---------------------------------------------------------------------------
# DoubleConv forward (NCHW in / NCHW out, like the PyTorch module)
# ---------------------------------------------------------------------------
def double_conv(x_nchw, params):
    (w1, b1, g1, be1), (w2, b2, g2, be2) = params
    n, _, h, w = x_nchw.shape
    x = jnp.transpose(x_nchw, (0, 2, 3, 1)).astype(jnp.float32)   # tiny input

    # Stage 1: conv1 (+bias) and BN1 partials.  BN1 apply + ReLU is fused into
    # stage 2's kernel, so the intermediate never round-trips HBM normalized.
    y1, s1, th1 = _conv_stage(x, w1, b1)
    c1, c1p = w1.shape[0], y1.shape[-1]
    scale1, shift1 = _bn_scale_shift(s1, g1, be1, th1 * w, n * h * w, c1, c1p)

    # Stage 2: fused (BN1+ReLU) -> halo -> conv2 (+bias), BN2 partials.
    y2, s2, th2 = _conv_stage(y1, w2, b2, in_scale=scale1, in_shift=shift1)
    c2, c2p = w2.shape[0], y2.shape[-1]
    scale2, shift2 = _bn_scale_shift(s2, g2, be2, th2 * w, n * h * w, c2, c2p)

    # Final BN2 apply + ReLU, emitted in (N, C, H*W) so only a reshape remains.
    return _bn_relu_out(y2, scale2, shift2, c2, th2)


# ---------------------------------------------------------------------------
# Pure-JAX f32 reference (PyTorch semantics) for the correctness check
# ---------------------------------------------------------------------------
def reference_double_conv(x_nchw, params):
    def stage(x, wgt, b, g, be):
        y = lax.conv_general_dilated(
            x, wgt, window_strides=(1, 1), padding=((1, 1), (1, 1)),
            dimension_numbers=("NCHW", "OIHW", "NCHW"))
        y = y + b[None, :, None, None]
        mean = jnp.mean(y, axis=(0, 2, 3), keepdims=True)
        var = jnp.mean((y - mean) ** 2, axis=(0, 2, 3), keepdims=True)
        y = (y - mean) * lax.rsqrt(var + BN_EPS)
        y = y * g[None, :, None, None] + be[None, :, None, None]
        return jnp.maximum(y, 0.0)

    (w1, b1, g1, be1), (w2, b2, g2, be2) = params
    x = stage(x_nchw.astype(jnp.float32), w1, b1, g1, be1)
    return stage(x, w2, b2, g2, be2)


def make_params(key, in_ch, out_ch):
    k1, k2, k3, k4 = jax.random.split(key, 4)
    w1 = 0.1 * jax.random.normal(k1, (out_ch, in_ch, 3, 3), jnp.float32)
    b1 = 0.1 * jax.random.normal(k2, (out_ch,), jnp.float32)
    w2 = 0.1 * jax.random.normal(k3, (out_ch, out_ch, 3, 3), jnp.float32)
    b2 = 0.1 * jax.random.normal(k4, (out_ch,), jnp.float32)
    # BatchNorm2d default init: weight=1, bias=0
    g1 = jnp.ones((out_ch,), jnp.float32)
    be1 = jnp.zeros((out_ch,), jnp.float32)
    g2 = jnp.ones((out_ch,), jnp.float32)
    be2 = jnp.zeros((out_ch,), jnp.float32)
    return (w1, b1, g1, be1), (w2, b2, g2, be2)


if __name__ == "__main__":
    key = jax.random.PRNGKey(0)
    kx, kp = jax.random.split(key)

    in_ch, out_ch = 4, 8
    x = jax.random.normal(kx, (2, in_ch, 16, 16), jnp.float32)   # NCHW
    params = make_params(kp, in_ch, out_ch)

    fwd = jax.jit(double_conv)
    out = jax.block_until_ready(fwd(x, params))
    ref = jax.block_until_ready(reference_double_conv(x, params))

    assert out.shape == (2, out_ch, 16, 16), out.shape
    max_err = float(jnp.max(jnp.abs(out - ref)))
    # Tolerance loosened vs. the f32 reference: MXU operands and the stored
    # intermediates are bfloat16 (BN stats still accumulated in f32).
    assert jnp.allclose(out, ref, atol=5e-2, rtol=5e-2), max_err
    print("KERNEL_OK")
</pallas_src>

<mosaic_0001>
module attributes {stable_mosaic.version = 11 : i64} {
  func.func @kernel(%arg0: i32, %arg1: i32, %arg2: memref<1x16x16x4xf32, #tpu.memory_space<vmem>>, %arg3: memref<9x128x128xbf16, #tpu.memory_space<vmem>>, %arg4: memref<1x128xf32, #tpu.memory_space<vmem>>, %arg5: memref<1x16x16x128xbf16, #tpu.memory_space<vmem>>, %arg6: memref<1x1x2x128xf32, #tpu.memory_space<vmem>>, %arg7: memref<18x18x128xf32, #tpu.memory_space<vmem>>) attributes {dimension_semantics = [#tpu.dimension_semantics<parallel>, #tpu.dimension_semantics<arbitrary>], iteration_bounds = array<i64: 2, 1>, scalar_prefetch = 0 : i64, scratch_operands = 1 : i64, tpu.core_type = #tpu.core_type<tc>, window_params = [{transform_indices = @transform_0, window_bounds = array<i64: 1, 16, 16, 4>}, {pipeline_mode = #tpu.pipeline_mode<synchronous>, transform_indices = @transform_1, window_bounds = array<i64: 9, 128, 128>}, {pipeline_mode = #tpu.pipeline_mode<synchronous>, transform_indices = @transform_2, window_bounds = array<i64: 1, 128>}, {transform_indices = @transform_3, window_bounds = array<i64: 1, 16, 16, 128>}, {transform_indices = @transform_4, window_bounds = array<i64: 1, 1, 2, 128>}]} {
    %c0_i32 = arith.constant 0 : i32
    %0 = arith.cmpi eq, %arg1, %c0_i32 : i32
    %1 = arith.extui %0 : i1 to i32
    %c0_i32_0 = arith.constant 0 : i32
    %2 = arith.cmpi ne, %1, %c0_i32_0 : i32
    scf.if %2 {
      %cst_66 = arith.constant 0.000000e+00 : f32
      %108 = vector.broadcast %cst_66 : f32 to vector<18x18x128xf32>
      %c0_67 = arith.constant 0 : index
      %c0_68 = arith.constant 0 : index
      %c0_69 = arith.constant 0 : index
      %109 = vector.load %arg7[%c0_67, %c0_68, %c0_69] : memref<18x18x128xf32, #tpu.memory_space<vmem>>, vector<18x18x128xf32>
      tpu.vector_store %arg7[%c0_67, %c0_68, %c0_69], %108 {strides = array<i32>} : memref<18x18x128xf32, #tpu.memory_space<vmem>>, vector<18x18x128xf32>,
      %c0_70 = arith.constant 0 : index
      %c0_71 = arith.constant 0 : index
      %c0_72 = arith.constant 0 : index
      %c0_73 = arith.constant 0 : index
      %110 = vector.load %arg2[%c0_70, %c0_71, %c0_72, %c0_73] : memref<1x16x16x4xf32, #tpu.memory_space<vmem>>, vector<1x16x16x4xf32>
      %111 = vector.shape_cast %110 : vector<1x16x16x4xf32> to vector<16x16x4xf32>
      %c1_74 = arith.constant 1 : index
      %c1_75 = arith.constant 1 : index
      %c0_76 = arith.constant 0 : index
      %112 = vector.load %arg7[%c1_74, %c1_75, %c0_76] : memref<18x18x128xf32, #tpu.memory_space<vmem>>, vector<16x16x4xf32>
      tpu.vector_store %arg7[%c1_74, %c1_75, %c0_76], %111 {strides = array<i32>} : memref<18x18x128xf32, #tpu.memory_space<vmem>>, vector<16x16x4xf32>,
    } else {
    }
    %c16_i32 = arith.constant 16 : i32
    %3 = arith.muli %arg1, %c16_i32 : i32
    %4 = tpu.assume_multiple %3, 16 : i32
    %cst = arith.constant 0.000000e+00 : f32
    %5 = vector.broadcast %cst : f32 to vector<256x128xf32>
    %c0_i32_1 = arith.constant 0 : i32
    %6 = arith.addi %4, %c0_i32_1 : i32
    %7 = arith.index_cast %6 : i32 to index
    %c0 = arith.constant 0 : index
    %c0_2 = arith.constant 0 : index
    %8 = vector.load %arg7[%7, %c0, %c0_2] : memref<18x18x128xf32, #tpu.memory_space<vmem>>, vector<16x16x128xf32>
    %9 = vector.shape_cast %8 : vector<16x16x128xf32> to vector<256x128xf32>
    %10 = arith.truncf %9 : vector<256x128xf32> to vector<256x128xbf16>
    %c0_3 = arith.constant 0 : index
    %c0_4 = arith.constant 0 : index
    %c0_5 = arith.constant 0 : index
    %11 = vector.load %arg3[%c0_3, %c0_4, %c0_5] : memref<9x128x128xbf16, #tpu.memory_space<vmem>>, vector<1x128x128xbf16>
    %12 = vector.shape_cast %11 : vector<1x128x128xbf16> to vector<128x128xbf16>
    %cst_6 = arith.constant dense<0.000000e+00> : vector<256x128xf32>
    %13 = tpu.matmul %10, %12, %cst_6 {dimension_numbers = #tpu.dot_dimension_numbers<[1], [0], [0], [1], [0, 0, 1, 1], [], []>} : vector<256x128xbf16>, vector<128x128xbf16>, vector<256x128xf32> -> vector<256x128xf32>
    %14 = arith.addf %5, %13 : vector<256x128xf32>
    %c0_i32_7 = arith.constant 0 : i32
    %15 = arith.addi %4, %c0_i32_7 : i32
    %16 = arith.index_cast %15 : i32 to index
    %c1 = arith.constant 1 : index
    %c0_8 = arith.constant 0 : index
    %17 = vector.load %arg7[%16, %c1, %c0_8] : memref<18x18x128xf32, #tpu.memory_space<vmem>>, vector<16x16x128xf32>
    %18 = vector.shape_cast %17 : vector<16x16x128xf32> to vector<256x128xf32>
    %19 = arith.truncf %18 : vector<256x128xf32> to vector<256x128xbf16>
    %c1_9 = arith.constant 1 : index
    %c0_10 = arith.constant 0 : index
    %c0_11 = arith.constant 0 : index
    %20 = vector.load %arg3[%c1_9, %c0_10, %c0_11] : memref<9x128x128xbf16, #tpu.memory_space<vmem>>, vector<1x128x128xbf16>
    %21 = vector.shape_cast %20 : vector<1x128x128xbf16> to vector<128x128xbf16>
    %cst_12 = arith.constant dense<0.000000e+00> : vector<256x128xf32>
    %22 = tpu.matmul %19, %21, %cst_12 {dimension_numbers = #tpu.dot_dimension_numbers<[1], [0], [0], [1], [0, 0, 1, 1], [], []>} : vector<256x128xbf16>, vector<128x128xbf16>, vector<256x128xf32> -> vector<256x128xf32>
    %23 = arith.addf %14, %22 : vector<256x128xf32>
    %c0_i32_13 = arith.constant 0 : i32
    %24 = arith.addi %4, %c0_i32_13 : i32
    %25 = arith.index_cast %24 : i32 to index
    %c2 = arith.constant 2 : index
    %c0_14 = arith.constant 0 : index
    %26 = vector.load %arg7[%25, %c2, %c0_14] : memref<18x18x128xf32, #tpu.memory_space<vmem>>, vector<16x16x128xf32>
    %27 = vector.shape_cast %26 : vector<16x16x128xf32> to vector<256x128xf32>
    %28 = arith.truncf %27 : vector<256x128xf32> to vector<256x128xbf16>
    %c2_15 = arith.constant 2 : index
    %c0_16 = arith.constant 0 : index
    %c0_17 = arith.constant 0 : index
    %29 = vector.load %arg3[%c2_15, %c0_16, %c0_17] : memref<9x128x128xbf16, #tpu.memory_space<vmem>>, vector<1x128x128xbf16>
    %30 = vector.shape_cast %29 : vector<1x128x128xbf16> to vector<128x128xbf16>
    %cst_18 = arith.constant dense<0.000000e+00> : vector<256x128xf32>
    %31 = tpu.matmul %28, %30, %cst_18 {dimension_numbers = #tpu.dot_dimension_numbers<[1], [0], [0], [1], [0, 0, 1, 1], [], []>} : vector<256x128xbf16>, vector<128x128xbf16>, vector<256x128xf32> -> vector<256x128xf32>
    %32 = arith.addf %23, %31 : vector<256x128xf32>
    %c1_i32 = arith.constant 1 : i32
    %33 = arith.addi %4, %c1_i32 : i32
    %34 = arith.index_cast %33 : i32 to index
    %c0_19 = arith.constant 0 : index
    %c0_20 = arith.constant 0 : index
    %35 = vector.load %arg7[%34, %c0_19, %c0_20] : memref<18x18x128xf32, #tpu.memory_space<vmem>>, vector<16x16x128xf32>
    %36 = vector.shape_cast %35 : vector<16x16x128xf32> to vector<256x128xf32>
    %37 = arith.truncf %36 : vector<256x128xf32> to vector<256x128xbf16>
    %c3 = arith.constant 3 : index
    %c0_21 = arith.constant 0 : index
    %c0_22 = arith.constant 0 : index
    %38 = vector.load %arg3[%c3, %c0_21, %c0_22] : memref<9x128x128xbf16, #tpu.memory_space<vmem>>, vector<1x128x128xbf16>
    %39 = vector.shape_cast %38 : vector<1x128x128xbf16> to vector<128x128xbf16>
    %cst_23 = arith.constant dense<0.000000e+00> : vector<256x128xf32>
    %40 = tpu.matmul %37, %39, %cst_23 {dimension_numbers = #tpu.dot_dimension_numbers<[1], [0], [0], [1], [0, 0, 1, 1], [], []>} : vector<256x128xbf16>, vector<128x128xbf16>, vector<256x128xf32> -> vector<256x128xf32>
    %41 = arith.addf %32, %40 : vector<256x128xf32>
    %c1_i32_24 = arith.constant 1 : i32
    %42 = arith.addi %4, %c1_i32_24 : i32
    %43 = arith.index_cast %42 : i32 to index
    %c1_25 = arith.constant 1 : index
    %c0_26 = arith.constant 0 : index
    %44 = vector.load %arg7[%43, %c1_25, %c0_26] : memref<18x18x128xf32, #tpu.memory_space<vmem>>, vector<16x16x128xf32>
    %45 = vector.shape_cast %44 : vector<16x16x128xf32> to vector<256x128xf32>
    %46 = arith.truncf %45 : vector<256x128xf32> to vector<256x128xbf16>
    %c4 = arith.constant 4 : index
    %c0_27 = arith.constant 0 : index
    %c0_28 = arith.constant 0 : index
    %47 = vector.load %arg3[%c4, %c0_27, %c0_28] : memref<9x128x128xbf16, #tpu.memory_space<vmem>>, vector<1x128x128xbf16>
    %48 = vector.shape_cast %47 : vector<1x128x128xbf16> to vector<128x128xbf16>
    %cst_29 = arith.constant dense<0.000000e+00> : vector<256x128xf32>
    %49 = tpu.matmul %46, %48, %cst_29 {dimension_numbers = #tpu.dot_dimension_numbers<[1], [0], [0], [1], [0, 0, 1, 1], [], []>} : vector<256x128xbf16>, vector<128x128xbf16>, vector<256x128xf32> -> vector<256x128xf32>
    %50 = arith.addf %41, %49 : vector<256x128xf32>
    %c1_i32_30 = arith.constant 1 : i32
    %51 = arith.addi %4, %c1_i32_30 : i32
    %52 = arith.index_cast %51 : i32 to index
    %c2_31 = arith.constant 2 : index
    %c0_32 = arith.constant 0 : index
    %53 = vector.load %arg7[%52, %c2_31, %c0_32] : memref<18x18x128xf32, #tpu.memory_space<vmem>>, vector<16x16x128xf32>
    %54 = vector.shape_cast %53 : vector<16x16x128xf32> to vector<256x128xf32>
    %55 = arith.truncf %54 : vector<256x128xf32> to vector<256x128xbf16>
    %c5 = arith.constant 5 : index
    %c0_33 = arith.constant 0 : index
    %c0_34 = arith.constant 0 : index
    %56 = vector.load %arg3[%c5, %c0_33, %c0_34] : memref<9x128x128xbf16, #tpu.memory_space<vmem>>, vector<1x128x128xbf16>
    %57 = vector.shape_cast %56 : vector<1x128x128xbf16> to vector<128x128xbf16>
    %cst_35 = arith.constant dense<0.000000e+00> : vector<256x128xf32>
    %58 = tpu.matmul %55, %57, %cst_35 {dimension_numbers = #tpu.dot_dimension_numbers<[1], [0], [0], [1], [0, 0, 1, 1], [], []>} : vector<256x128xbf16>, vector<128x128xbf16>, vector<256x128xf32> -> vector<256x128xf32>
    %59 = arith.addf %50, %58 : vector<256x128xf32>
    %c2_i32 = arith.constant 2 : i32
    %60 = arith.addi %4, %c2_i32 : i32
    %61 = arith.index_cast %60 : i32 to index
    %c0_36 = arith.constant 0 : index
    %c0_37 = arith.constant 0 : index
    %62 = vector.load %arg7[%61, %c0_36, %c0_37] : memref<18x18x128xf32, #tpu.memory_space<vmem>>, vector<16x16x128xf32>
    %63 = vector.shape_cast %62 : vector<16x16x128xf32> to vector<256x128xf32>
    %64 = arith.truncf %63 : vector<256x128xf32> to vector<256x128xbf16>
    %c6 = arith.constant 6 : index
    %c0_38 = arith.constant 0 : index
    %c0_39 = arith.constant 0 : index
    %65 = vector.load %arg3[%c6, %c0_38, %c0_39] : memref<9x128x128xbf16, #tpu.memory_space<vmem>>, vector<1x128x128xbf16>
    %66 = vector.shape_cast %65 : vector<1x128x128xbf16> to vector<128x128xbf16>
    %cst_40 = arith.constant dense<0.000000e+00> : vector<256x128xf32>
    %67 = tpu.matmul %64, %66, %cst_40 {dimension_numbers = #tpu.dot_dimension_numbers<[1], [0], [0], [1], [0, 0, 1, 1], [], []>} : vector<256x128xbf16>, vector<128x128xbf16>, vector<256x128xf32> -> vector<256x128xf32>
    %68 = arith.addf %59, %67 : vector<256x128xf32>
    %c2_i32_41 = arith.constant 2 : i32
    %69 = arith.addi %4, %c2_i32_41 : i32
    %70 = arith.index_cast %69 : i32 to index
    %c1_42 = arith.constant 1 : index
    %c0_43 = arith.constant 0 : index
    %71 = vector.load %arg7[%70, %c1_42, %c0_43] : memref<18x18x128xf32, #tpu.memory_space<vmem>>, vector<16x16x128xf32>
    %72 = vector.shape_cast %71 : vector<16x16x128xf32> to vector<256x128xf32>
    %73 = arith.truncf %72 : vector<256x128xf32> to vector<256x128xbf16>
    %c7 = arith.constant 7 : index
    %c0_44 = arith.constant 0 : index
    %c0_45 = arith.constant 0 : index
    %74 = vector.load %arg3[%c7, %c0_44, %c0_45] : memref<9x128x128xbf16, #tpu.memory_space<vmem>>, vector<1x128x128xbf16>
    %75 = vector.shape_cast %74 : vector<1x128x128xbf16> to vector<128x128xbf16>
    %cst_46 = arith.constant dense<0.000000e+00> : vector<256x128xf32>
    %76 = tpu.matmul %73, %75, %cst_46 {dimension_numbers = #tpu.dot_dimension_numbers<[1], [0], [0], [1], [0, 0, 1, 1], [], []>} : vector<256x128xbf16>, vector<128x128xbf16>, vector<256x128xf32> -> vector<256x128xf32>
    %77 = arith.addf %68, %76 : vector<256x128xf32>
    %c2_i32_47 = arith.constant 2 : i32
    %78 = arith.addi %4, %c2_i32_47 : i32
    %79 = arith.index_cast %78 : i32 to index
    %c2_48 = arith.constant 2 : index
    %c0_49 = arith.constant 0 : index
    %80 = vector.load %arg7[%79, %c2_48, %c0_49] : memref<18x18x128xf32, #tpu.memory_space<vmem>>, vector<16x16x128xf32>
    %81 = vector.shape_cast %80 : vector<16x16x128xf32> to vector<256x128xf32>
    %82 = arith.truncf %81 : vector<256x128xf32> to vector<256x128xbf16>
    %c8 = arith.constant 8 : index
    %c0_50 = arith.constant 0 : index
    %c0_51 = arith.constant 0 : index
    %83 = vector.load %arg3[%c8, %c0_50, %c0_51] : memref<9x128x128xbf16, #tpu.memory_space<vmem>>, vector<1x128x128xbf16>
    %84 = vector.shape_cast %83 : vector<1x128x128xbf16> to vector<128x128xbf16>
    %cst_52 = arith.constant dense<0.000000e+00> : vector<256x128xf32>
    %85 = tpu.matmul %82, %84, %cst_52 {dimension_numbers = #tpu.dot_dimension_numbers<[1], [0], [0], [1], [0, 0, 1, 1], [], []>} : vector<256x128xbf16>, vector<128x128xbf16>, vector<256x128xf32> -> vector<256x128xf32>
    %86 = arith.addf %77, %85 : vector<256x128xf32>
    %c0_53 = arith.constant 0 : index
    %c0_54 = arith.constant 0 : index
    %87 = vector.load %arg4[%c0_53, %c0_54] : memref<1x128xf32, #tpu.memory_space<vmem>>, vector<1x128xf32>
    %88 = vector.broadcast %87 : vector<1x128xf32> to vector<256x128xf32>
    %89 = arith.addf %86, %88 : vector<256x128xf32>
    %90 = vector.shape_cast %89 : vector<256x128xf32> to vector<16x16x128xf32>
    %91 = arith.truncf %90 : vector<16x16x128xf32> to vector<16x16x128xbf16>
    %c0_55 = arith.constant 0 : index
    %c0_56 = arith.constant 0 : index
    %c0_57 = arith.constant 0 : index
    %c0_58 = arith.constant 0 : index
    %92 = vector.load %arg5[%c0_55, %c0_56, %c0_57, %c0_58] : memref<1x16x16x128xbf16, #tpu.memory_space<vmem>>, vector<1x16x16x128xbf16>
    %93 = vector.shape_cast %92 : vector<1x16x16x128xbf16> to vector<16x16x128xbf16>
    %94 = vector.shape_cast %91 : vector<16x16x128xbf16> to vector<1x16x16x128xbf16>
    tpu.vector_store %arg5[%c0_55, %c0_56, %c0_57, %c0_58], %94 {strides = array<i32>} : memref<1x16x16x128xbf16, #tpu.memory_space<vmem>>, vector<1x16x16x128xbf16>,
    %cst_59 = arith.constant dense<0.000000e+00> : vector<128xf32>
    %95 = vector.multi_reduction <add>, %89, %cst_59 [0] : vector<256x128xf32> to vector<128xf32>
    %96 = vector.shape_cast %95 : vector<128xf32> to vector<1x128xf32>
    %cst_60 = arith.constant 3.906250e-03 : f32
    %97 = vector.broadcast %cst_60 : f32 to vector<1x128xf32>
    %98 = arith.mulf %96, %97 : vector<1x128xf32>
    %99 = vector.broadcast %98 : vector<1x128xf32> to vector<256x128xf32>
    %100 = arith.subf %89, %99 : vector<256x128xf32>
    %101 = arith.mulf %100, %100 : vector<256x128xf32>
    %cst_61 = arith.constant dense<0.000000e+00> : vector<128xf32>
    %102 = vector.multi_reduction <add>, %101, %cst_61 [0] : vector<256x128xf32> to vector<128xf32>
    %103 = vector.shape_cast %102 : vector<128xf32> to vector<1x128xf32>
    %104 = tpu.concatenate %96, %103 in 0 : vector<1x128xf32>, vector<1x128xf32> -> vector<2x128xf32>
    %c0_62 = arith.constant 0 : index
    %c0_63 = arith.constant 0 : index
    %c0_64 = arith.constant 0 : index
    %c0_65 = arith.constant 0 : index
    %105 = vector.load %arg6[%c0_62, %c0_63, %c0_64, %c0_65] : memref<1x1x2x128xf32, #tpu.memory_space<vmem>>, vector<1x1x2x128xf32>
    %106 = vector.shape_cast %105 : vector<1x1x2x128xf32> to vector<2x128xf32>
    %107 = vector.shape_cast %104 : vector<2x128xf32> to vector<1x1x2x128xf32>
    tpu.vector_store %arg6[%c0_62, %c0_63, %c0_64, %c0_65], %107 {strides = array<i32>} : memref<1x1x2x128xf32, #tpu.memory_space<vmem>>, vector<1x1x2x128xf32>,
    return
  }
  func.func @transform_0(%arg0: i32, %arg1: i32) -> (i32, i32, i32, i32) {
    %c0_i32 = arith.constant 0 : i32
    %c0_i32_0 = arith.constant 0 : i32
    %c0_i32_1 = arith.constant 0 : i32
    %c0_i32_2 = arith.constant 0 : i32
    return %arg0, %c0_i32, %c0_i32_0, %c0_i32_1 : i32, i32, i32, i32
  }
  func.func @transform_1(%arg0: i32, %arg1: i32) -> (i32, i32, i32) {
    %c0_i32 = arith.constant 0 : i32
    %c0_i32_0 = arith.constant 0 : i32
    %c0_i32_1 = arith.constant 0 : i32
    %c0_i32_2 = arith.constant 0 : i32
    return %c0_i32, %c0_i32_0, %c0_i32_1 : i32, i32, i32
  }
  func.func @transform_2(%arg0: i32, %arg1: i32) -> (i32, i32) {
    %c0_i32 = arith.constant 0 : i32
    %c0_i32_0 = arith.constant 0 : i32
    %c0_i32_1 = arith.constant 0 : i32
    return %c0_i32, %c0_i32_0 : i32, i32
  }
  func.func @transform_3(%arg0: i32, %arg1: i32) -> (i32, i32, i32, i32) {
    %c0_i32 = arith.constant 0 : i32
    %c0_i32_0 = arith.constant 0 : i32
    %c0_i32_1 = arith.constant 0 : i32
    return %arg0, %arg1, %c0_i32, %c0_i32_0 : i32, i32, i32, i32
  }
  func.func @transform_4(%arg0: i32, %arg1: i32) -> (i32, i32, i32, i32) {
    %c0_i32 = arith.constant 0 : i32
    %c0_i32_0 = arith.constant 0 : i32
    %c0_i32_1 = arith.constant 0 : i32
    return %arg0, %arg1, %c0_i32, %c0_i32_0 : i32, i32, i32, i32
  }
}

module attributes {stable_mosaic.version = 11 : i64} {
  func.func @kernel(%arg0: i32, %arg1: i32, %arg2: memref<1x16x16x128xbf16, #tpu.memory_space<vmem>>, %arg3: memref<1x128xf32, #tpu.memory_space<vmem>>, %arg4: memref<1x128xf32, #tpu.memory_space<vmem>>, %arg5: memref<1x8x256xf32, #tpu.memory_space<vmem>>) attributes {dimension_semantics = [#tpu.dimension_semantics<parallel>, #tpu.dimension_semantics<parallel>], iteration_bounds = array<i64: 2, 1>, scalar_prefetch = 0 : i64, scratch_operands = 0 : i64, tpu.core_type = #tpu.core_type<tc>, window_params = [{transform_indices = @transform_0, window_bounds = array<i64: 1, 16, 16, 128>}, {pipeline_mode = #tpu.pipeline_mode<synchronous>, transform_indices = @transform_1, window_bounds = array<i64: 1, 128>}, {pipeline_mode = #tpu.pipeline_mode<synchronous>, transform_indices = @transform_2, window_bounds = array<i64: 1, 128>}, {transform_indices = @transform_3, window_bounds = array<i64: 1, 8, 256>}]} {
    %c0 = arith.constant 0 : index
    %c0_0 = arith.constant 0 : index
    %c0_1 = arith.constant 0 : index
    %c0_2 = arith.constant 0 : index
    %0 = vector.load %arg2[%c0, %c0_0, %c0_1, %c0_2] : memref<1x16x16x128xbf16, #tpu.memory_space<vmem>>, vector<1x16x16x128xbf16>
    %1 = vector.shape_cast %0 : vector<1x16x16x128xbf16> to vector<16x16x128xbf16>
    %2 = arith.extf %1 : vector<16x16x128xbf16> to vector<16x16x128xf32>
    %c0_3 = arith.constant 0 : index
    %c0_4 = arith.constant 0 : index
    %3 = vector.load %arg3[%c0_3, %c0_4] : memref<1x128xf32, #tpu.memory_space<vmem>>, vector<1x128xf32>
    %4 = vector.shape_cast %3 : vector<1x128xf32> to vector<1x1x128xf32>
    %5 = vector.broadcast %4 : vector<1x1x128xf32> to vector<16x16x128xf32>
    %6 = arith.mulf %2, %5 : vector<16x16x128xf32>
    %c0_5 = arith.constant 0 : index
    %c0_6 = arith.constant 0 : index
    %7 = vector.load %arg4[%c0_5, %c0_6] : memref<1x128xf32, #tpu.memory_space<vmem>>, vector<1x128xf32>
    %8 = vector.shape_cast %7 : vector<1x128xf32> to vector<1x1x128xf32>
    %9 = vector.broadcast %8 : vector<1x1x128xf32> to vector<16x16x128xf32>
    %10 = arith.addf %6, %9 : vector<16x16x128xf32>
    %cst = arith.constant 0.000000e+00 : f32
    %11 = vector.broadcast %cst : f32 to vector<16x16x128xf32>
    %12 = arith.maximumf %10, %11 : vector<16x16x128xf32>
    %13 = vector.shape_cast %12 : vector<16x16x128xf32> to vector<256x128xf32>
    %14 = tpu.transpose %13, [1, 0] : vector<256x128xf32> -> vector<128x256xf32>
    %15 = vector.extract_strided_slice %14 {offsets = [0, 0], sizes = [8, 256], strides = [1, 1]} : vector<128x256xf32> to vector<8x256xf32>
    %c0_7 = arith.constant 0 : index
    %c0_8 = arith.constant 0 : index
    %c0_9 = arith.constant 0 : index
    %16 = vector.load %arg5[%c0_7, %c0_8, %c0_9] : memref<1x8x256xf32, #tpu.memory_space<vmem>>, vector<1x8x256xf32>
    %17 = vector.shape_cast %16 : vector<1x8x256xf32> to vector<8x256xf32>
    %18 = vector.shape_cast %15 : vector<8x256xf32> to vector<1x8x256xf32>
    tpu.vector_store %arg5[%c0_7, %c0_8, %c0_9], %18 {strides = array<i32>} : memref<1x8x256xf32, #tpu.memory_space<vmem>>, vector<1x8x256xf32>,
    return
  }
  func.func @transform_0(%arg0: i32, %arg1: i32) -> (i32, i32, i32, i32) {
    %c0_i32 = arith.constant 0 : i32
    %c0_i32_0 = arith.constant 0 : i32
    %c0_i32_1 = arith.constant 0 : i32
    return %arg0, %arg1, %c0_i32, %c0_i32_0 : i32, i32, i32, i32
  }
  func.func @transform_1(%arg0: i32, %arg1: i32) -> (i32, i32) {
    %c0_i32 = arith.constant 0 : i32
    %c0_i32_0 = arith.constant 0 : i32
    %c0_i32_1 = arith.constant 0 : i32
    return %c0_i32, %c0_i32_0 : i32, i32
  }
  func.func @transform_2(%arg0: i32, %arg1: i32) -> (i32, i32) {
    %c0_i32 = arith.constant 0 : i32
    %c0_i32_0 = arith.constant 0 : i32
    %c0_i32_1 = arith.constant 0 : i32
    return %c0_i32, %c0_i32_0 : i32, i32
  }
  func.func @transform_3(%arg0: i32, %arg1: i32) -> (i32, i32, i32) {
    %c0_i32 = arith.constant 0 : i32
    %c0_i32_0 = arith.constant 0 : i32
    return %arg0, %c0_i32, %arg1 : i32, i32, i32
  }
}

module attributes {stable_mosaic.version = 11 : i64} {
  func.func @kernel(%arg0: i32, %arg1: i32, %arg2: memref<1x16x16x128xbf16, #tpu.memory_space<vmem>>, %arg3: memref<1x128xf32, #tpu.memory_space<vmem>>, %arg4: memref<1x128xf32, #tpu.memory_space<vmem>>, %arg5: memref<9x128x128xbf16, #tpu.memory_space<vmem>>, %arg6: memref<1x128xf32, #tpu.memory_space<vmem>>, %arg7: memref<1x16x16x128xbf16, #tpu.memory_space<vmem>>, %arg8: memref<1x1x2x128xf32, #tpu.memory_space<vmem>>, %arg9: memref<18x18x128xf32, #tpu.memory_space<vmem>>) attributes {dimension_semantics = [#tpu.dimension_semantics<parallel>, #tpu.dimension_semantics<arbitrary>], iteration_bounds = array<i64: 2, 1>, scalar_prefetch = 0 : i64, scratch_operands = 1 : i64, tpu.core_type = #tpu.core_type<tc>, window_params = [{transform_indices = @transform_0, window_bounds = array<i64: 1, 16, 16, 128>}, {pipeline_mode = #tpu.pipeline_mode<synchronous>, transform_indices = @transform_1, window_bounds = array<i64: 1, 128>}, {pipeline_mode = #tpu.pipeline_mode<synchronous>, transform_indices = @transform_2, window_bounds = array<i64: 1, 128>}, {pipeline_mode = #tpu.pipeline_mode<synchronous>, transform_indices = @transform_3, window_bounds = array<i64: 9, 128, 128>}, {pipeline_mode = #tpu.pipeline_mode<synchronous>, transform_indices = @transform_4, window_bounds = array<i64: 1, 128>}, {transform_indices = @transform_5, window_bounds = array<i64: 1, 16, 16, 128>}, {transform_indices = @transform_6, window_bounds = array<i64: 1, 1, 2, 128>}]} {
    %c0_i32 = arith.constant 0 : i32
    %0 = arith.cmpi eq, %arg1, %c0_i32 : i32
    %1 = arith.extui %0 : i1 to i32
    %c0_i32_0 = arith.constant 0 : i32
    %2 = arith.cmpi ne, %1, %c0_i32_0 : i32
    scf.if %2 {
      %cst_66 = arith.constant 0.000000e+00 : f32
      %108 = vector.broadcast %cst_66 : f32 to vector<18x18x128xf32>
      %c0_67 = arith.constant 0 : index
      %c0_68 = arith.constant 0 : index
      %c0_69 = arith.constant 0 : index
      %109 = vector.load %arg9[%c0_67, %c0_68, %c0_69] : memref<18x18x128xf32, #tpu.memory_space<vmem>>, vector<18x18x128xf32>
      tpu.vector_store %arg9[%c0_67, %c0_68, %c0_69], %108 {strides = array<i32>} : memref<18x18x128xf32, #tpu.memory_space<vmem>>, vector<18x18x128xf32>,
      %c0_70 = arith.constant 0 : index
      %c0_71 = arith.constant 0 : index
      %c0_72 = arith.constant 0 : index
      %c0_73 = arith.constant 0 : index
      %110 = vector.load %arg2[%c0_70, %c0_71, %c0_72, %c0_73] : memref<1x16x16x128xbf16, #tpu.memory_space<vmem>>, vector<1x16x16x128xbf16>
      %111 = vector.shape_cast %110 : vector<1x16x16x128xbf16> to vector<16x16x128xbf16>
      %112 = arith.extf %111 : vector<16x16x128xbf16> to vector<16x16x128xf32>
      %c0_74 = arith.constant 0 : index
      %c0_75 = arith.constant 0 : index
      %113 = vector.load %arg3[%c0_74, %c0_75] : memref<1x128xf32, #tpu.memory_space<vmem>>, vector<1x128xf32>
      %114 = vector.shape_cast %113 : vector<1x128xf32> to vector<1x1x128xf32>
      %115 = vector.broadcast %114 : vector<1x1x128xf32> to vector<16x16x128xf32>
      %116 = arith.mulf %112, %115 : vector<16x16x128xf32>
      %c0_76 = arith.constant 0 : index
      %c0_77 = arith.constant 0 : index
      %117 = vector.load %arg4[%c0_76, %c0_77] : memref<1x128xf32, #tpu.memory_space<vmem>>, vector<1x128xf32>
      %118 = vector.shape_cast %117 : vector<1x128xf32> to vector<1x1x128xf32>
      %119 = vector.broadcast %118 : vector<1x1x128xf32> to vector<16x16x128xf32>
      %120 = arith.addf %116, %119 : vector<16x16x128xf32>
      %cst_78 = arith.constant 0.000000e+00 : f32
      %121 = vector.broadcast %cst_78 : f32 to vector<16x16x128xf32>
      %122 = arith.maximumf %120, %121 : vector<16x16x128xf32>
      %c1_79 = arith.constant 1 : index
      %c1_80 = arith.constant 1 : index
      %c0_81 = arith.constant 0 : index
      %123 = vector.load %arg9[%c1_79, %c1_80, %c0_81] : memref<18x18x128xf32, #tpu.memory_space<vmem>>, vector<16x16x128xf32>
      tpu.vector_store %arg9[%c1_79, %c1_80, %c0_81], %122 {strides = array<i32>} : memref<18x18x128xf32, #tpu.memory_space<vmem>>, vector<16x16x128xf32>,
    } else {
    }
    %c16_i32 = arith.constant 16 : i32
    %3 = arith.muli %arg1, %c16_i32 : i32
    %4 = tpu.assume_multiple %3, 16 : i32
    %cst = arith.constant 0.000000e+00 : f32
    %5 = vector.broadcast %cst : f32 to vector<256x128xf32>
    %c0_i32_1 = arith.constant 0 : i32
    %6 = arith.addi %4, %c0_i32_1 : i32
    %7 = arith.index_cast %6 : i32 to index
    %c0 = arith.constant 0 : index
    %c0_2 = arith.constant 0 : index
    %8 = vector.load %arg9[%7, %c0, %c0_2] : memref<18x18x128xf32, #tpu.memory_space<vmem>>, vector<16x16x128xf32>
    %9 = vector.shape_cast %8 : vector<16x16x128xf32> to vector<256x128xf32>
    %10 = arith.truncf %9 : vector<256x128xf32> to vector<256x128xbf16>
    %c0_3 = arith.constant 0 : index
    %c0_4 = arith.constant 0 : index
    %c0_5 = arith.constant 0 : index
    %11 = vector.load %arg5[%c0_3, %c0_4, %c0_5] : memref<9x128x128xbf16, #tpu.memory_space<vmem>>, vector<1x128x128xbf16>
    %12 = vector.shape_cast %11 : vector<1x128x128xbf16> to vector<128x128xbf16>
    %cst_6 = arith.constant dense<0.000000e+00> : vector<256x128xf32>
    %13 = tpu.matmul %10, %12, %cst_6 {dimension_numbers = #tpu.dot_dimension_numbers<[1], [0], [0], [1], [0, 0, 1, 1], [], []>} : vector<256x128xbf16>, vector<128x128xbf16>, vector<256x128xf32> -> vector<256x128xf32>
    %14 = arith.addf %5, %13 : vector<256x128xf32>
    %c0_i32_7 = arith.constant 0 : i32
    %15 = arith.addi %4, %c0_i32_7 : i32
    %16 = arith.index_cast %15 : i32 to index
    %c1 = arith.constant 1 : index
    %c0_8 = arith.constant 0 : index
    %17 = vector.load %arg9[%16, %c1, %c0_8] : memref<18x18x128xf32, #tpu.memory_space<vmem>>, vector<16x16x128xf32>
    %18 = vector.shape_cast %17 : vector<16x16x128xf32> to vector<256x128xf32>
    %19 = arith.truncf %18 : vector<256x128xf32> to vector<256x128xbf16>
    %c1_9 = arith.constant 1 : index
    %c0_10 = arith.constant 0 : index
    %c0_11 = arith.constant 0 : index
    %20 = vector.load %arg5[%c1_9, %c0_10, %c0_11] : memref<9x128x128xbf16, #tpu.memory_space<vmem>>, vector<1x128x128xbf16>
    %21 = vector.shape_cast %20 : vector<1x128x128xbf16> to vector<128x128xbf16>
    %cst_12 = arith.constant dense<0.000000e+00> : vector<256x128xf32>
    %22 = tpu.matmul %19, %21, %cst_12 {dimension_numbers = #tpu.dot_dimension_numbers<[1], [0], [0], [1], [0, 0, 1, 1], [], []>} : vector<256x128xbf16>, vector<128x128xbf16>, vector<256x128xf32> -> vector<256x128xf32>
    %23 = arith.addf %14, %22 : vector<256x128xf32>
    %c0_i32_13 = arith.constant 0 : i32
    %24 = arith.addi %4, %c0_i32_13 : i32
    %25 = arith.index_cast %24 : i32 to index
    %c2 = arith.constant 2 : index
    %c0_14 = arith.constant 0 : index
    %26 = vector.load %arg9[%25, %c2, %c0_14] : memref<18x18x128xf32, #tpu.memory_space<vmem>>, vector<16x16x128xf32>
    %27 = vector.shape_cast %26 : vector<16x16x128xf32> to vector<256x128xf32>
    %28 = arith.truncf %27 : vector<256x128xf32> to vector<256x128xbf16>
    %c2_15 = arith.constant 2 : index
    %c0_16 = arith.constant 0 : index
    %c0_17 = arith.constant 0 : index
    %29 = vector.load %arg5[%c2_15, %c0_16, %c0_17] : memref<9x128x128xbf16, #tpu.memory_space<vmem>>, vector<1x128x128xbf16>
    %30 = vector.shape_cast %29 : vector<1x128x128xbf16> to vector<128x128xbf16>
    %cst_18 = arith.constant dense<0.000000e+00> : vector<256x128xf32>
    %31 = tpu.matmul %28, %30, %cst_18 {dimension_numbers = #tpu.dot_dimension_numbers<[1], [0], [0], [1], [0, 0, 1, 1], [], []>} : vector<256x128xbf16>, vector<128x128xbf16>, vector<256x128xf32> -> vector<256x128xf32>
    %32 = arith.addf %23, %31 : vector<256x128xf32>
    %c1_i32 = arith.constant 1 : i32
    %33 = arith.addi %4, %c1_i32 : i32
    %34 = arith.index_cast %33 : i32 to index
    %c0_19 = arith.constant 0 : index
    %c0_20 = arith.constant 0 : index
    %35 = vector.load %arg9[%34, %c0_19, %c0_20] : memref<18x18x128xf32, #tpu.memory_space<vmem>>, vector<16x16x128xf32>
    %36 = vector.shape_cast %35 : vector<16x16x128xf32> to vector<256x128xf32>
    %37 = arith.truncf %36 : vector<256x128xf32> to vector<256x128xbf16>
    %c3 = arith.constant 3 : index
    %c0_21 = arith.constant 0 : index
    %c0_22 = arith.constant 0 : index
    %38 = vector.load %arg5[%c3, %c0_21, %c0_22] : memref<9x128x128xbf16, #tpu.memory_space<vmem>>, vector<1x128x128xbf16>
    %39 = vector.shape_cast %38 : vector<1x128x128xbf16> to vector<128x128xbf16>
    %cst_23 = arith.constant dense<0.000000e+00> : vector<256x128xf32>
    %40 = tpu.matmul %37, %39, %cst_23 {dimension_numbers = #tpu.dot_dimension_numbers<[1], [0], [0], [1], [0, 0, 1, 1], [], []>} : vector<256x128xbf16>, vector<128x128xbf16>, vector<256x128xf32> -> vector<256x128xf32>
    %41 = arith.addf %32, %40 : vector<256x128xf32>
    %c1_i32_24 = arith.constant 1 : i32
    %42 = arith.addi %4, %c1_i32_24 : i32
    %43 = arith.index_cast %42 : i32 to index
    %c1_25 = arith.constant 1 : index
    %c0_26 = arith.constant 0 : index
    %44 = vector.load %arg9[%43, %c1_25, %c0_26] : memref<18x18x128xf32, #tpu.memory_space<vmem>>, vector<16x16x128xf32>
    %45 = vector.shape_cast %44 : vector<16x16x128xf32> to vector<256x128xf32>
    %46 = arith.truncf %45 : vector<256x128xf32> to vector<256x128xbf16>
    %c4 = arith.constant 4 : index
    %c0_27 = arith.constant 0 : index
    %c0_28 = arith.constant 0 : index
    %47 = vector.load %arg5[%c4, %c0_27, %c0_28] : memref<9x128x128xbf16, #tpu.memory_space<vmem>>, vector<1x128x128xbf16>
    %48 = vector.shape_cast %47 : vector<1x128x128xbf16> to vector<128x128xbf16>
    %cst_29 = arith.constant dense<0.000000e+00> : vector<256x128xf32>
    %49 = tpu.matmul %46, %48, %cst_29 {dimension_numbers = #tpu.dot_dimension_numbers<[1], [0], [0], [1], [0, 0, 1, 1], [], []>} : vector<256x128xbf16>, vector<128x128xbf16>, vector<256x128xf32> -> vector<256x128xf32>
    %50 = arith.addf %41, %49 : vector<256x128xf32>
    %c1_i32_30 = arith.constant 1 : i32
    %51 = arith.addi %4, %c1_i32_30 : i32
    %52 = arith.index_cast %51 : i32 to index
    %c2_31 = arith.constant 2 : index
    %c0_32 = arith.constant 0 : index
    %53 = vector.load %arg9[%52, %c2_31, %c0_32] : memref<18x18x128xf32, #tpu.memory_space<vmem>>, vector<16x16x128xf32>
    %54 = vector.shape_cast %53 : vector<16x16x128xf32> to vector<256x128xf32>
    %55 = arith.truncf %54 : vector<256x128xf32> to vector<256x128xbf16>
    %c5 = arith.constant 5 : index
    %c0_33 = arith.constant 0 : index
    %c0_34 = arith.constant 0 : index
    %56 = vector.load %arg5[%c5, %c0_33, %c0_34] : memref<9x128x128xbf16, #tpu.memory_space<vmem>>, vector<1x128x128xbf16>
    %57 = vector.shape_cast %56 : vector<1x128x128xbf16> to vector<128x128xbf16>
    %cst_35 = arith.constant dense<0.000000e+00> : vector<256x128xf32>
    %58 = tpu.matmul %55, %57, %cst_35 {dimension_numbers = #tpu.dot_dimension_numbers<[1], [0], [0], [1], [0, 0, 1, 1], [], []>} : vector<256x128xbf16>, vector<128x128xbf16>, vector<256x128xf32> -> vector<256x128xf32>
    %59 = arith.addf %50, %58 : vector<256x128xf32>
    %c2_i32 = arith.constant 2 : i32
    %60 = arith.addi %4, %c2_i32 : i32
    %61 = arith.index_cast %60 : i32 to index
    %c0_36 = arith.constant 0 : index
    %c0_37 = arith.constant 0 : index
    %62 = vector.load %arg9[%61, %c0_36, %c0_37] : memref<18x18x128xf32, #tpu.memory_space<vmem>>, vector<16x16x128xf32>
    %63 = vector.shape_cast %62 : vector<16x16x128xf32> to vector<256x128xf32>
    %64 = arith.truncf %63 : vector<256x128xf32> to vector<256x128xbf16>
    %c6 = arith.constant 6 : index
    %c0_38 = arith.constant 0 : index
    %c0_39 = arith.constant 0 : index
    %65 = vector.load %arg5[%c6, %c0_38, %c0_39] : memref<9x128x128xbf16, #tpu.memory_space<vmem>>, vector<1x128x128xbf16>
    %66 = vector.shape_cast %65 : vector<1x128x128xbf16> to vector<128x128xbf16>
    %cst_40 = arith.constant dense<0.000000e+00> : vector<256x128xf32>
    %67 = tpu.matmul %64, %66, %cst_40 {dimension_numbers = #tpu.dot_dimension_numbers<[1], [0], [0], [1], [0, 0, 1, 1], [], []>} : vector<256x128xbf16>, vector<128x128xbf16>, vector<256x128xf32> -> vector<256x128xf32>
    %68 = arith.addf %59, %67 : vector<256x128xf32>
    %c2_i32_41 = arith.constant 2 : i32
    %69 = arith.addi %4, %c2_i32_41 : i32
    %70 = arith.index_cast %69 : i32 to index
    %c1_42 = arith.constant 1 : index
    %c0_43 = arith.constant 0 : index
    %71 = vector.load %arg9[%70, %c1_42, %c0_43] : memref<18x18x128xf32, #tpu.memory_space<vmem>>, vector<16x16x128xf32>
    %72 = vector.shape_cast %71 : vector<16x16x128xf32> to vector<256x128xf32>
    %73 = arith.truncf %72 : vector<256x128xf32> to vector<256x128xbf16>
    %c7 = arith.constant 7 : index
    %c0_44 = arith.constant 0 : index
    %c0_45 = arith.constant 0 : index
    %74 = vector.load %arg5[%c7, %c0_44, %c0_45] : memref<9x128x128xbf16, #tpu.memory_space<vmem>>, vector<1x128x128xbf16>
    %75 = vector.shape_cast %74 : vector<1x128x128xbf16> to vector<128x128xbf16>
    %cst_46 = arith.constant dense<0.000000e+00> : vector<256x128xf32>
    %76 = tpu.matmul %73, %75, %cst_46 {dimension_numbers = #tpu.dot_dimension_numbers<[1], [0], [0], [1], [0, 0, 1, 1], [], []>} : vector<256x128xbf16>, vector<128x128xbf16>, vector<256x128xf32> -> vector<256x128xf32>
    %77 = arith.addf %68, %76 : vector<256x128xf32>
    %c2_i32_47 = arith.constant 2 : i32
    %78 = arith.addi %4, %c2_i32_47 : i32
    %79 = arith.index_cast %78 : i32 to index
    %c2_48 = arith.constant 2 : index
    %c0_49 = arith.constant 0 : index
    %80 = vector.load %arg9[%79, %c2_48, %c0_49] : memref<18x18x128xf32, #tpu.memory_space<vmem>>, vector<16x16x128xf32>
    %81 = vector.shape_cast %80 : vector<16x16x128xf32> to vector<256x128xf32>
    %82 = arith.truncf %81 : vector<256x128xf32> to vector<256x128xbf16>
    %c8 = arith.constant 8 : index
    %c0_50 = arith.constant 0 : index
    %c0_51 = arith.constant 0 : index
    %83 = vector.load %arg5[%c8, %c0_50, %c0_51] : memref<9x128x128xbf16, #tpu.memory_space<vmem>>, vector<1x128x128xbf16>
    %84 = vector.shape_cast %83 : vector<1x128x128xbf16> to vector<128x128xbf16>
    %cst_52 = arith.constant dense<0.000000e+00> : vector<256x128xf32>
    %85 = tpu.matmul %82, %84, %cst_52 {dimension_numbers = #tpu.dot_dimension_numbers<[1], [0], [0], [1], [0, 0, 1, 1], [], []>} : vector<256x128xbf16>, vector<128x128xbf16>, vector<256x128xf32> -> vector<256x128xf32>
    %86 = arith.addf %77, %85 : vector<256x128xf32>
    %c0_53 = arith.constant 0 : index
    %c0_54 = arith.constant 0 : index
    %87 = vector.load %arg6[%c0_53, %c0_54] : memref<1x128xf32, #tpu.memory_space<vmem>>, vector<1x128xf32>
    %88 = vector.broadcast %87 : vector<1x128xf32> to vector<256x128xf32>
    %89 = arith.addf %86, %88 : vector<256x128xf32>
    %90 = vector.shape_cast %89 : vector<256x128xf32> to vector<16x16x128xf32>
    %91 = arith.truncf %90 : vector<16x16x128xf32> to vector<16x16x128xbf16>
    %c0_55 = arith.constant 0 : index
    %c0_56 = arith.constant 0 : index
    %c0_57 = arith.constant 0 : index
    %c0_58 = arith.constant 0 : index
    %92 = vector.load %arg7[%c0_55, %c0_56, %c0_57, %c0_58] : memref<1x16x16x128xbf16, #tpu.memory_space<vmem>>, vector<1x16x16x128xbf16>
    %93 = vector.shape_cast %92 : vector<1x16x16x128xbf16> to vector<16x16x128xbf16>
    %94 = vector.shape_cast %91 : vector<16x16x128xbf16> to vector<1x16x16x128xbf16>
    tpu.vector_store %arg7[%c0_55, %c0_56, %c0_57, %c0_58], %94 {strides = array<i32>} : memref<1x16x16x128xbf16, #tpu.memory_space<vmem>>, vector<1x16x16x128xbf16>,
    %cst_59 = arith.constant dense<0.000000e+00> : vector<128xf32>
    %95 = vector.multi_reduction <add>, %89, %cst_59 [0] : vector<256x128xf32> to vector<128xf32>
    %96 = vector.shape_cast %95 : vector<128xf32> to vector<1x128xf32>
    %cst_60 = arith.constant 3.906250e-03 : f32
    %97 = vector.broadcast %cst_60 : f32 to vector<1x128xf32>
    %98 = arith.mulf %96, %97 : vector<1x128xf32>
    %99 = vector.broadcast %98 : vector<1x128xf32> to vector<256x128xf32>
    %100 = arith.subf %89, %99 : vector<256x128xf32>
    %101 = arith.mulf %100, %100 : vector<256x128xf32>
    %cst_61 = arith.constant dense<0.000000e+00> : vector<128xf32>
    %102 = vector.multi_reduction <add>, %101, %cst_61 [0] : vector<256x128xf32> to vector<128xf32>
    %103 = vector.shape_cast %102 : vector<128xf32> to vector<1x128xf32>
    %104 = tpu.concatenate %96, %103 in 0 : vector<1x128xf32>, vector<1x128xf32> -> vector<2x128xf32>
    %c0_62 = arith.constant 0 : index
    %c0_63 = arith.constant 0 : index
    %c0_64 = arith.constant 0 : index
    %c0_65 = arith.constant 0 : index
    %105 = vector.load %arg8[%c0_62, %c0_63, %c0_64, %c0_65] : memref<1x1x2x128xf32, #tpu.memory_space<vmem>>, vector<1x1x2x128xf32>
    %106 = vector.shape_cast %105 : vector<1x1x2x128xf32> to vector<2x128xf32>
    %107 = vector.shape_cast %104 : vector<2x128xf32> to vector<1x1x2x128xf32>
    tpu.vector_store %arg8[%c0_62, %c0_63, %c0_64, %c0_65], %107 {strides = array<i32>} : memref<1x1x2x128xf32, #tpu.memory_space<vmem>>, vector<1x1x2x128xf32>,
    return
  }
  func.func @transform_0(%arg0: i32, %arg1: i32) -> (i32, i32, i32, i32) {
    %c0_i32 = arith.constant 0 : i32
    %c0_i32_0 = arith.constant 0 : i32
    %c0_i32_1 = arith.constant 0 : i32
    %c0_i32_2 = arith.constant 0 : i32
    return %arg0, %c0_i32, %c0_i32_0, %c0_i32_1 : i32, i32, i32, i32
  }
  func.func @transform_1(%arg0: i32, %arg1: i32) -> (i32, i32) {
    %c0_i32 = arith.constant 0 : i32
    %c0_i32_0 = arith.constant 0 : i32
    %c0_i32_1 = arith.constant 0 : i32
    return %c0_i32, %c0_i32_0 : i32, i32
  }
  func.func @transform_2(%arg0: i32, %arg1: i32) -> (i32, i32) {
    %c0_i32 = arith.constant 0 : i32
    %c0_i32_0 = arith.constant 0 : i32
    %c0_i32_1 = arith.constant 0 : i32
    return %c0_i32, %c0_i32_0 : i32, i32
  }
  func.func @transform_3(%arg0: i32, %arg1: i32) -> (i32, i32, i32) {
    %c0_i32 = arith.constant 0 : i32
    %c0_i32_0 = arith.constant 0 : i32
    %c0_i32_1 = arith.constant 0 : i32
    %c0_i32_2 = arith.constant 0 : i32
    return %c0_i32, %c0_i32_0, %c0_i32_1 : i32, i32, i32
  }
  func.func @transform_4(%arg0: i32, %arg1: i32) -> (i32, i32) {
    %c0_i32 = arith.constant 0 : i32
    %c0_i32_0 = arith.constant 0 : i32
    %c0_i32_1 = arith.constant 0 : i32
    return %c0_i32, %c0_i32_0 : i32, i32
  }
  func.func @transform_5(%arg0: i32, %arg1: i32) -> (i32, i32, i32, i32) {
    %c0_i32 = arith.constant 0 : i32
    %c0_i32_0 = arith.constant 0 : i32
    %c0_i32_1 = arith.constant 0 : i32
    return %arg0, %arg1, %c0_i32, %c0_i32_0 : i32, i32, i32, i32
  }
  func.func @transform_6(%arg0: i32, %arg1: i32) -> (i32, i32, i32, i32) {
    %c0_i32 = arith.constant 0 : i32
    %c0_i32_0 = arith.constant 0 : i32
    %c0_i32_1 = arith.constant 0 : i32
    return %arg0, %arg1, %c0_i32, %c0_i32_0 : i32, i32, i32, i32
  }
}

</mosaic_0001>

<bundles_post_ra>
// kernel: double_conv.5
= control target key start
LH: loop header
LB: loop body
LE: loop exit
PB: predicated region body
PF: predicated region fallthrough
CT: control target
= control target key end

     0   :  { %s705_s12 = smov 0   ;;  %s707_s13 = smov 0   ;;  %s834_s0 = inlined_call_operand.vmem [shape: bf16[2,16,16,128], index: 0, kind: input, shape index: {}]   ;;  %s835_s1 = inlined_call_operand.vmem [shape: f32[1,128], index: 1, kind: input, shape index: {}]   ;;  %s836_s2 = inlined_call_operand.vmem [shape: f32[1,128], index: 2, kind: input, shape index: {}]   ;;  %s837_s3 = inlined_call_operand.vmem [shape: f32[2,8,256], index: 3, kind: output, shape index: {}]  }
   0x1   :  { %s709_s14 = smov 0  }
   0x2 LB: > { %s25_s15 = sadd.s32 1, %s679_s13  ;;  %p547_p0 = scmp.ge.s32.totalorder %s683_s14, 1  ;;  %s683_s14 = sphi %s709_s14, %s13_s14   ;;  %s679_s13 = sphi %s707_s13, %s839_s13   ;;  %s675_s12 = sphi %s705_s12, %s838_s12  }
   0x3   : > { %p27_p1 = scmp.ge.s32.totalorder %s25_s15, 2  ;;  %p159_p2 = scmp.lt.s32.totalorder %s683_s14, 3 }
   0x5   : > { %s841_s15 = smov (%p27_p1, %s25_s15), 0  ;;  %p160_p3 = pnand %p547_p0, %p159_p2 }
   0x6   : > { %p193_p4 = scmp.lt.s32.totalorder (!%p160_p3), %s675_s12, 1  ;;  %v734_v0 = vld [vmem:[%s835_s1] ss:$0 sm:$0xff] (!%p160_p3) }
   0x7   : > { %163 = sbr.rel (%p160_p3) target bundleno = 157 (0x9d), region = 32  ;;  %v743_v9 = vld [vmem:[%s836_s2] ss:$0 sm:$0xff] (!%p160_p3) }
   0xe   : > { %s843_s12 = smov (!%p193_p4, %s675_s12), 1 }
   0xf   : > { %s556_s16 = sshll.u32 %s843_s12, 7  ;;  %s557_s24 = sshll.u32 %s843_s12, 4 }
  0x10   : > { %s729_s19 = scalar_lea.vmem %s834_s0, %s556_s16  ;;  %s211_s27 = scalar_lea.vmem %s837_s3, %s557_s24 }
  0x11   : > { %v629_v1 = vld [vmem:[%s729_s19 + $0x40] sm:$0xff]   ;;  %v630_v3 = vld [vmem:[%s729_s19 + $0x48] sm:$0xff]   ;;  %v631_v24 = vld [vmem:[%s729_s19 + $0x50] sm:$0xff]  }
  0x12   : > { %v559_v2 = vld [vmem:[%s729_s19] sm:$0xff]   ;;  %v592_v4 = vunpack.c.l.bf16 %v629_v1  ;;  %v593_v6 = vunpack.c.h.bf16 %v629_v1  ;;  %v622_v8 = vld [vmem:[%s729_s19 + $0x8] sm:$0xff]   ;;  %v596_v10 = vunpack.c.l.bf16 %v630_v3  ;;  %v597_v18 = vunpack.c.h.bf16 %v630_v3  ;;  %v623_v25 = vld [vmem:[%s729_s19 + $0x10] sm:$0xff]  }
  0x13   : > { %v560_v5 = vunpack.c.l.bf16 %v559_v2  ;;  %v561_v7 = vunpack.c.h.bf16 %v559_v2  ;;  %v564_v11 = vunpack.c.l.bf16 %v622_v8  ;;  %v565_v19 = vunpack.c.h.bf16 %v622_v8  ;;  %v632_v44 = vld [vmem:[%s729_s19 + $0x58] sm:$0xff]   ;;  %v633_v62 = vld [vmem:[%s729_s19 + $0x60] sm:$0xff]  }
  0x14   : > { %v300_v12 = vmul.f32 %v592_v4, %v734_v0  ;;  %v301_v14 = vmul.f32 %v593_v6, %v734_v0  ;;  %v302_v16 = vmul.f32 %v596_v10, %v734_v0  ;;  %v303_v30 = vmul.f32 %v597_v18, %v734_v0  ;;  %v624_v45 = vld [vmem:[%s729_s19 + $0x18] sm:$0xff]   ;;  %v625_v63 = vld [vmem:[%s729_s19 + $0x20] sm:$0xff]   ;;  %v634_v18 = vld [vmem:[%s729_s19 + $0x68] sm:$0xff]  }
  0x15   : > { %v284_v13 = vmul.f32 %v560_v5, %v734_v0  ;;  %v285_v15 = vmul.f32 %v561_v7, %v734_v0  ;;  %v286_v17 = vmul.f32 %v564_v11, %v734_v0  ;;  %v287_v31 = vmul.f32 %v565_v19, %v734_v0  ;;  %v626_v19 = vld [vmem:[%s729_s19 + $0x28] sm:$0xff]  }
  0x16   : > { %v339_v20 = vadd.f32 %v743_v9, %v300_v12  ;;  %v340_v22 = vadd.f32 %v743_v9, %v301_v14  ;;  %v341_v28 = vadd.f32 %v743_v9, %v302_v16  ;;  %v600_v34 = vunpack.c.l.bf16 %v631_v24 }
  0x17   : > { %v323_v21 = vadd.f32 %v743_v9, %v284_v13  ;;  %v324_v23 = vadd.f32 %v743_v9, %v285_v15  ;;  %v325_v29 = vadd.f32 %v743_v9, %v286_v17  ;;  %v568_v35 = vunpack.c.l.bf16 %v623_v25 }
  0x18   : > { %v371_v26 = vmax.f32 %v339_v20, 0.0  ;;  %v372_v32 = vmax.f32 %v340_v22, 0.0  ;;  %v373_v36 = vmax.f32 %v341_v28, 0.0  ;;  %v342_v37 = vadd.f32 %v743_v9, %v303_v30 }
  0x19   : > { %v355_v27 = vmax.f32 %v323_v21, 0.0  ;;  %v356_v33 = vmax.f32 %v324_v23, 0.0  ;;  %v326_v38 = vadd.f32 %v743_v9, %v287_v31  ;;  %v601_v39 = vunpack.c.h.bf16 %v631_v24 }
  0x1a   : > { %419 = vxpose.xlu1.b32.start [1/16] (narrow) %v371_v26, 8  ;;  %v357_v40 = vmax.f32 %v325_v29, 0.0  ;;  %v304_v41 = vmul.f32 %v600_v34, %v734_v0  ;;  %v288_v42 = vmul.f32 %v568_v35, %v734_v0  ;;  %v569_v43 = vunpack.c.h.bf16 %v623_v25 }
  0x1b   : > { %387 = vxpose.xlu0.b32.start [1/16] (narrow) %v355_v27, 8  ;;  %v374_v46 = vmax.f32 %v342_v37, 0.0  ;;  %v305_v47 = vmul.f32 %v601_v39, %v734_v0  ;;  %v604_v48 = vunpack.c.l.bf16 %v632_v44  ;;  %v572_v49 = vunpack.c.l.bf16 %v624_v45  ;;  %v627_v37 = vld [vmem:[%s729_s19 + $0x30] sm:$0xff]  }
  0x1c   : > { %v358_v50 = vmax.f32 %v326_v38, 0.0  ;;  %v343_v51 = vadd.f32 %v743_v9, %v304_v41  ;;  %v327_v52 = vadd.f32 %v743_v9, %v288_v42  ;;  %v289_v53 = vmul.f32 %v569_v43, %v734_v0 }
  0x1d   : > { %v306_v54 = vmul.f32 %v604_v48, %v734_v0  ;;  %v290_v55 = vmul.f32 %v572_v49, %v734_v0  ;;  %v605_v56 = vunpack.c.h.bf16 %v632_v44  ;;  %v573_v57 = vunpack.c.h.bf16 %v624_v45 }
  0x1e   : > { %420 = vxpose.xlu1.b32.cont [2/16] (narrow) %v372_v32, 8  ;;  %v375_v58 = vmax.f32 %v343_v51, 0.0  ;;  %v359_v59 = vmax.f32 %v327_v52, 0.0  ;;  %v344_v60 = vadd.f32 %v743_v9, %v305_v47  ;;  %v328_v61 = vadd.f32 %v743_v9, %v289_v53 }
  0x1f   : > { %388 = vxpose.xlu0.b32.cont [2/16] (narrow) %v356_v33, 8  ;;  %v345_v1 = vadd.f32 %v743_v9, %v306_v54  ;;  %v307_v2 = vmul.f32 %v605_v56, %v734_v0  ;;  %v291_v3 = vmul.f32 %v573_v57, %v734_v0  ;;  %v608_v4 = vunpack.c.l.bf16 %v633_v62  ;;  %v636_v54 = vld [vmem:[%s729_s19 + $0x78] sm:$0xff]  }
  0x20   : > { %v376_v5 = vmax.f32 %v344_v60, 0.0  ;;  %v360_v6 = vmax.f32 %v328_v61, 0.0  ;;  %v329_v7 = vadd.f32 %v743_v9, %v290_v55  ;;  %v576_v8 = vunpack.c.l.bf16 %v625_v63  ;;  %v628_v55 = vld [vmem:[%s729_s19 + $0x38] sm:$0xff]  }
  0x21   : > { %v377_v10 = vmax.f32 %v345_v1, 0.0  ;;  %v346_v11 = vadd.f32 %v743_v9, %v307_v2  ;;  %v330_v12 = vadd.f32 %v743_v9, %v291_v3  ;;  %v308_v13 = vmul.f32 %v608_v4, %v734_v0 }
  0x22   : > { %421 = vxpose.xlu1.b32.cont [3/16] (narrow) %v373_v36, 8  ;;  %v361_v14 = vmax.f32 %v329_v7, 0.0  ;;  %v292_v15 = vmul.f32 %v576_v8, %v734_v0  ;;  %v609_v16 = vunpack.c.h.bf16 %v633_v62  ;;  %v577_v17 = vunpack.c.h.bf16 %v625_v63  ;;  %v635_v36 = vld [vmem:[%s729_s19 + $0x70] sm:$0xff]  }
  0x23   : > { %389 = vxpose.xlu0.b32.cont [3/16] (narrow) %v357_v40, 8  ;;  %v378_v20 = vmax.f32 %v346_v11, 0.0  ;;  %v347_v21 = vadd.f32 %v743_v9, %v308_v13  ;;  %v612_v22 = vunpack.c.l.bf16 %v634_v18  ;;  %v580_v23 = vunpack.c.l.bf16 %v626_v19 }
  0x24   : > { %v362_v24 = vmax.f32 %v330_v12, 0.0  ;;  %v331_v25 = vadd.f32 %v743_v9, %v292_v15  ;;  %v309_v26 = vmul.f32 %v609_v16, %v734_v0  ;;  %v293_v27 = vmul.f32 %v577_v17, %v734_v0 }
  0x25   : > { %v310_v28 = vmul.f32 %v612_v22, %v734_v0  ;;  %v294_v29 = vmul.f32 %v580_v23, %v734_v0  ;;  %v613_v30 = vunpack.c.h.bf16 %v634_v18  ;;  %v581_v31 = vunpack.c.h.bf16 %v626_v19 }
  0x26   : > { %422 = vxpose.xlu1.b32.cont [4/16] (narrow) %v374_v46, 8  ;;  %v379_v32 = vmax.f32 %v347_v21, 0.0  ;;  %v363_v33 = vmax.f32 %v331_v25, 0.0  ;;  %v348_v34 = vadd.f32 %v743_v9, %v309_v26  ;;  %v332_v35 = vadd.f32 %v743_v9, %v293_v27 }
  0x27   : > { %390 = vxpose.xlu0.b32.cont [4/16] (narrow) %v358_v50, 8  ;;  %v349_v38 = vadd.f32 %v743_v9, %v310_v28  ;;  %v311_v39 = vmul.f32 %v613_v30, %v734_v0  ;;  %v295_v40 = vmul.f32 %v581_v31, %v734_v0  ;;  %v616_v41 = vunpack.c.l.bf16 %v635_v36 }
  0x28   : > { %v380_v42 = vmax.f32 %v348_v34, 0.0  ;;  %v364_v43 = vmax.f32 %v332_v35, 0.0  ;;  %v333_v44 = vadd.f32 %v743_v9, %v294_v29  ;;  %v584_v45 = vunpack.c.l.bf16 %v627_v37 }
  0x29   : > { %v381_v46 = vmax.f32 %v349_v38, 0.0  ;;  %v350_v47 = vadd.f32 %v743_v9, %v311_v39  ;;  %v334_v48 = vadd.f32 %v743_v9, %v295_v40  ;;  %v312_v49 = vmul.f32 %v616_v41, %v734_v0 }
  0x2a   : > { %423 = vxpose.xlu1.b32.cont [5/16] (narrow) %v375_v58, 8  ;;  %v365_v50 = vmax.f32 %v333_v44, 0.0  ;;  %v296_v51 = vmul.f32 %v584_v45, %v734_v0  ;;  %v617_v52 = vunpack.c.h.bf16 %v635_v36  ;;  %v585_v53 = vunpack.c.h.bf16 %v627_v37 }
  0x2b   : > { %391 = vxpose.xlu0.b32.cont [5/16] (narrow) %v359_v59, 8  ;;  %v382_v56 = vmax.f32 %v350_v47, 0.0  ;;  %v351_v57 = vadd.f32 %v743_v9, %v312_v49  ;;  %v620_v58 = vunpack.c.l.bf16 %v636_v54  ;;  %v588_v59 = vunpack.c.l.bf16 %v628_v55 }
  0x2c   : > { %v366_v60 = vmax.f32 %v334_v48, 0.0  ;;  %v335_v61 = vadd.f32 %v743_v9, %v296_v51  ;;  %v313_v62 = vmul.f32 %v617_v52, %v734_v0  ;;  %v297_v63 = vmul.f32 %v585_v53, %v734_v0 }
  0x2d   : > { %v314_v1 = vmul.f32 %v620_v58, %v734_v0  ;;  %v298_v2 = vmul.f32 %v588_v59, %v734_v0  ;;  %v621_v3 = vunpack.c.h.bf16 %v636_v54  ;;  %v589_v4 = vunpack.c.h.bf16 %v628_v55 }
  0x2e   : > { %424 = vxpose.xlu1.b32.cont [6/16] (narrow) %v376_v5, 8  ;;  %v383_v5 = vmax.f32 %v351_v57, 0.0  ;;  %v352_v7 = vadd.f32 %v743_v9, %v313_v62  ;;  %v336_v8 = vadd.f32 %v743_v9, %v297_v63 }
  0x2f   : > { %392 = vxpose.xlu0.b32.cont [6/16] (narrow) %v360_v6, 8  ;;  %v367_v6 = vmax.f32 %v335_v61, 0.0  ;;  %v299_v11 = vmul.f32 %v589_v4, %v734_v0  ;;  %v337_v15 = vadd.f32 %v743_v9, %v298_v2 }
  0x30   : > { %v384_v12 = vmax.f32 %v352_v7, 0.0  ;;  %v368_v13 = vmax.f32 %v336_v8, 0.0 }
  0x31   : > { %v369_v17 = vmax.f32 %v337_v15, 0.0  ;;  %v338_v19 = vadd.f32 %v743_v9, %v299_v11 }
  0x32   : > { %425 = vxpose.xlu1.b32.cont [7/16] (narrow) %v377_v10, 8  ;;  %v315_v10 = vmul.f32 %v621_v3, %v734_v0 }
  0x33   : > { %393 = vxpose.xlu0.b32.cont [7/16] (narrow) %v361_v14, 8  ;;  %v353_v14 = vadd.f32 %v743_v9, %v314_v1 }
  0x34   : > { %v354_v18 = vadd.f32 %v743_v9, %v315_v10 }
  0x35   : > { %v385_v16 = vmax.f32 %v353_v14, 0.0 }
  0x36   : > { %426 = vxpose.xlu1.b32.cont [8/16] (narrow) %v378_v20, 8  ;;  %v386_v0 = vmax.f32 %v354_v18, 0.0  ;;  %v370_v20 = vmax.f32 %v338_v19, 0.0 }
  0x37   : > { %394 = vxpose.xlu0.b32.cont [8/16] (narrow) %v362_v24, 8 }
  0x3a   : > { %427 = vxpose.xlu1.b32.cont [9/16] (narrow) %v379_v32, 8 }
  0x3b   : > { %395 = vxpose.xlu0.b32.cont [9/16] (narrow) %v363_v33, 8 }
  0x3e   : > { %428 = vxpose.xlu1.b32.cont [10/16] (narrow) %v380_v42, 8 }
  0x3f   : > { %396 = vxpose.xlu0.b32.cont [10/16] (narrow) %v364_v43, 8 }
  0x42   : > { %429 = vxpose.xlu1.b32.cont [11/16] (narrow) %v381_v46, 8 }
  0x43   : > { %397 = vxpose.xlu0.b32.cont [11/16] (narrow) %v365_v50, 8 }
  0x46   : > { %430 = vxpose.xlu1.b32.cont [12/16] (narrow) %v382_v56, 8 }
  0x47   : > { %398 = vxpose.xlu0.b32.cont [12/16] (narrow) %v366_v60, 8 }
  0x4a   : > { %431 = vxpose.xlu1.b32.cont [13/16] (narrow) %v383_v5, 8 }
  0x4b   : > { %399 = vxpose.xlu0.b32.cont [13/16] (narrow) %v367_v6, 8 }
  0x4e   : > { %432 = vxpose.xlu1.b32.cont [14/16] (narrow) %v384_v12, 8 }
  0x4f   : > { %400 = vxpose.xlu0.b32.cont [14/16] (narrow) %v368_v13, 8 }
  0x52   : > { %433 = vxpose.xlu1.b32.cont [15/16] (narrow) %v385_v16, 8 }
  0x53   : > { %401 = vxpose.xlu0.b32.cont [15/16] (narrow) %v369_v17, 8 }
  0x56   : > { %434 = vxpose.xlu1.b32.end [16/16] (narrow) %v386_v0, 8 }
  0x57   : > { %402 = vxpose.xlu0.b32.end [16/16] (narrow) %v370_v20, 8 }
  0x9a   : > { %v435_v21 = vpop.trf.xlu1 }
  0x9b   : > { %v403_v22 = vpop.trf.xlu0  ;;  %452 = vst [vmem:[%s211_s27 + $0x8] sm:$0xff] %v435_v21 }
  0x9c   : > { %451 = vst [vmem:[%s211_s27] sm:$0xff] %v403_v22 }
  0x9d PF: > { %s13_s14 = sadd.s32 1, %s683_s14   ;;  %s838_s12 = smov %s679_s13 }
  0x9e   : > { %p10_p5 = scmp.ge.s32.totalorder %s13_s14, 4   ;;  %s839_s13 = smov %s841_s15 }
  0xa0   :  { %12 = sbr.rel (!%p10_p5) target bundleno = 2 (0x2), region = 62 }

// kernel: double_conv.3
= control target key start
LH: loop header
LB: loop body
LE: loop exit
PB: predicated region body
PF: predicated region fallthrough
CT: control target
= control target key end

     0   :  { %s5186_s15 = smov 0   ;;  %s5188_s16 = smov 0   ;;  %s5986_s0 = inlined_call_operand.vmem [shape: f32[2,16,16,4], index: 0, kind: input, shape index: {}]   ;;  %s5987_s1 = inlined_call_operand.vmem [shape: bf16[9,128,128], index: 1, kind: input, shape index: {}]   ;;  %s5988_s2 = inlined_call_operand.vmem [shape: f32[1,128], index: 2, kind: input, shape index: {}]   ;;  %s5989_s3 = inlined_call_operand.vmem [shape: bf16[2,16,16,128], index: 3, kind: output, shape index: {0}]   ;;  %s5990_s4 = inlined_call_operand.vmem [shape: f32[2,1,2,128], index: 4, kind: output, shape index: {1}]  }
   0x1   :  { %s5190_s17 = smov 0  }
   0x2 LB: > { %s27_s18 = sadd.s32 1, %s5153_s16  ;;  %p3548_p0 = scmp.ge.s32.totalorder %s5157_s17, 1  ;;  %s5157_s17 = sphi %s5190_s17, %s15_s17   ;;  %s5153_s16 = sphi %s5188_s16, %s5992_s16   ;;  %s5149_s15 = sphi %s5186_s15, %s5991_s15  }
   0x3   : > { %p29_p1 = scmp.ge.s32.totalorder %s27_s18, 2  ;;  %p181_p2 = scmp.lt.s32.totalorder %s5157_s17, 3 }
   0x5   : > { %s5994_s18 = smov (%p29_p1, %s27_s18), 0  ;;  %p182_p3 = pnand %p3548_p0, %p181_p2 }
   0x6   : > { %v5055_v0 = vld [vmem:[%s5987_s1 + $0x40] sm:$0xff] (!%p182_p3)   ;;  %v5159_v2 = vmov (!%p182_p3), 0.0   ;;  %v5057_v3 = vld [vmem:[%s5987_s1 + $0x48] sm:$0xff] (!%p182_p3)   ;;  %p219_p4 = scmp.lt.s32.totalorder (!%p182_p3), %s5149_s15, 1  ;;  %v5059_v5 = vld [vmem:[%s5987_s1 + $0x50] sm:$0xff] (!%p182_p3)   ;;  %vm334_vm0 = vcmask (!%p182_p3), 31744  }
   0x7   : > { %185 = sbr.rel (%p182_p3) target bundleno = 644 (0x284), region = 32  ;;  %v5056_v1 = vld [vmem:[%s5987_s1 + $0x100] sm:$0xff] (!%p182_p3)   ;;  %247 = vst [vmem:[#allocation2] sm:$0xff] (!%p182_p3), %v5159_v2  ;;  %248 = vst [vmem:[#allocation2 + $0x8] sm:$0xff] (!%p182_p3), %v5159_v2  ;;  %4326 = vmatprep.subr.bf16.mxu1 (!%p182_p3), %v5055_v0  ;;  %v5058_v4 = vld [vmem:[%s5987_s1 + $0x108] sm:$0xff] (!%p182_p3)   ;;  %vm3403_vm1 = vcmask (!%p182_p3), 1040384  }
   0x8   : > { %249 = vst [vmem:[#allocation2 + $0x10] sm:$0x3] (!%p182_p3), %v5159_v2  ;;  %250 = vst [vmem:[#allocation2 + $0x18] sm:$0xff] (!%p182_p3), %v5159_v2  ;;  %4518 = vmatprep.subr.bf16.mxu0 (!%p182_p3), %v5056_v1  ;;  %4327 = vmatpush3.bf16.msra.mxu1 (!%p182_p3), %v5055_v0  ;;  %v5060_v6 = vld [vmem:[%s5987_s1 + $0x110] sm:$0xff] (!%p182_p3)   ;;  %v5061_v7 = vld [vmem:[%s5987_s1 + $0x58] sm:$0xff] (!%p182_p3)  }
   0x9   : > { %251 = vst [vmem:[#allocation2 + $0x20] sm:$0xff] (!%p182_p3), %v5159_v2  ;;  %252 = vst [vmem:[#allocation2 + $0x28] sm:$0x3] (!%p182_p3), %v5159_v2  ;;  %4519 = vmatpush3.bf16.msra.mxu0 (!%p182_p3), %v5056_v1  ;;  %4328 = vmatprep.subr.bf16.mxu1 (!%p182_p3), %v5057_v3  ;;  %v5062_v8 = vld [vmem:[%s5987_s1 + $0x118] sm:$0xff] (!%p182_p3)   ;;  %v5063_v9 = vld [vmem:[%s5987_s1 + $0x60] sm:$0xff] (!%p182_p3)  }
   0xa   : > { %253 = vst [vmem:[#allocation2 + $0x30] sm:$0xff] (!%p182_p3), %v5159_v2  ;;  %254 = vst [vmem:[#allocation2 + $0x38] sm:$0xff] (!%p182_p3), %v5159_v2  ;;  %4520 = vmatprep.subr.bf16.mxu0 (!%p182_p3), %v5058_v4  ;;  %v5064_v10 = vld [vmem:[%s5987_s1 + $0x120] sm:$0xff] (!%p182_p3)   ;;  %v5065_v11 = vld [vmem:[%s5987_s1 + $0x68] sm:$0xff] (!%p182_p3)  }
   0xb   : > { %255 = vst [vmem:[#allocation2 + $0x40] sm:$0x3] (!%p182_p3), %v5159_v2  ;;  %256 = vst [vmem:[#allocation2 + $0x48] sm:$0xff] (!%p182_p3), %v5159_v2  ;;  %v5066_v12 = vld [vmem:[%s5987_s1 + $0x128] sm:$0xff] (!%p182_p3)   ;;  %v5067_v20 = vld [vmem:[%s5987_s1 + $0x70] sm:$0xff] (!%p182_p3)  }
   0xc   : > { %257 = vst [vmem:[#allocation2 + $0x50] sm:$0xff] (!%p182_p3), %v5159_v2  ;;  %258 = vst [vmem:[#allocation2 + $0x58] sm:$0x3] (!%p182_p3), %v5159_v2  ;;  %4329 = vmatpush3.bf16.msra.mxu1 (!%p182_p3), %v5057_v3  ;;  %v5068_v21 = vld [vmem:[%s5987_s1 + $0x130] sm:$0xff] (!%p182_p3)   ;;  %v5069_v26 = vld [vmem:[%s5987_s1 + $0x78] sm:$0xff] (!%p182_p3)  }
   0xd   : > { %259 = vst [vmem:[#allocation2 + $0x60] sm:$0xff] (!%p182_p3), %v5159_v2  ;;  %260 = vst [vmem:[#allocation2 + $0x68] sm:$0xff] (!%p182_p3), %v5159_v2  ;;  %4521 = vmatpush3.bf16.msra.mxu0 (!%p182_p3), %v5058_v4  ;;  %4330 = vmatprep.subr.bf16.mxu1 (!%p182_p3), %v5059_v5  ;;  %v5070_v28 = vld [vmem:[%s5987_s1 + $0x138] sm:$0xff] (!%p182_p3)   ;;  %v5071_v31 = vld [vmem:[%s5987_s1] sm:$0xff] (!%p182_p3)  }
   0xe   : > { %261 = vst [vmem:[#allocation2 + $0x70] sm:$0x3] %v5159_v2  ;;  %262 = vst [vmem:[#allocation2 + $0x78] sm:$0xff] %v5159_v2  ;;  %s5996_s15 = smov (!%p219_p4, %s5149_s15), 1  ;;  %4522 = vmatprep.subr.bf16.mxu0 %v5060_v6  ;;  %v434_v13 = vld [vmem:[#allocation2 + $0x1] sm:$0xff]  ;;  %v5075_v49 = vld [vmem:[%s5987_s1 + $0x150] sm:$0xff]  }
   0xf   : > { %263 = vst [vmem:[#allocation2 + $0x80] sm:$0xff] %v5159_v2  ;;  %264 = vst [vmem:[#allocation2 + $0x88] sm:$0x3] %v5159_v2  ;;  %s3981_s9 = sshll.u32 %s5996_s15, 8  ;;  %v435_v14 = vld [vmem:[#allocation2 + $0x9] sm:$0xff]  ;;  %v5072_v38 = vld [vmem:[%s5987_s1 + $0x140] sm:$0xff]  }
  0x10   : > { %265 = vst [vmem:[#allocation2 + $0x90] sm:$0xff] %v5159_v2  ;;  %266 = vst [vmem:[#allocation2 + $0x98] sm:$0xff] %v5159_v2  ;;  %4331 = vmatpush3.bf16.msra.mxu1 %v5059_v5  ;;  %s5244_s20 = scalar_lea.vmem %s5986_s0, %s3981_s9  ;;  %v466_v16 = vpack.c.bf16 %v435_v14, %v434_v13  ;;  %v5073_v44 = vld [vmem:[%s5987_s1 + $0x148] sm:$0xff]   ;;  %v5077_v50 = vld [vmem:[%s5987_s1 + $0x10] sm:$0xff]   ;;  %s3982_s7 = sshll.u32 %s5996_s15, 7 }
  0x11   : > { %267 = vst [vmem:[#allocation2 + $0xa0] sm:$0x3] %v5159_v2  ;;  %268 = vst [vmem:[#allocation2 + $0xa8] sm:$0xff] %v5159_v2  ;;  %4523 = vmatpush3.bf16.msra.mxu0 %v5060_v6  ;;  %4332 = vmatprep.subr.bf16.mxu1 %v5061_v7  ;;  %v301_v15 = vld [vmem:[%s5244_s20] sm:$0xff]  ;;  %v302_v17 = vld [vmem:[%s5244_s20 + $0x8] sm:$0xff]  ;;  %s5730_s10 = scalar_lea.vmem %s5989_s3, %s3982_s7 }
  0x12   : > { %269 = vst [vmem:[#allocation2 + $0xb0] sm:$0xff] %v5159_v2  ;;  %270 = vst [vmem:[#allocation2 + $0xb8] sm:$0x3] %v5159_v2  ;;  %4524 = vmatprep.subr.bf16.mxu0 %v5062_v8  ;;  %v303_v18 = vld [vmem:[%s5244_s20 + $0x10] sm:$0xff]  ;;  %v304_v19 = vld [vmem:[%s5244_s20 + $0x18] sm:$0xff]  ;;  %4342 = vmatprep.mubr.bf16.mxu1 %v466_v16 }
  0x13   : > { %271 = vst [vmem:[#allocation2 + $0xc0] sm:$0xff] %v5159_v2  ;;  %272 = vst [vmem:[#allocation2 + $0xc8] sm:$0xff] %v5159_v2  ;;  %v305_v22 = vld [vmem:[%s5244_s20 + $0x20] sm:$0xff]  ;;  %v306_v23 = vld [vmem:[%s5244_s20 + $0x28] sm:$0xff] }
  0x14   : > { %273 = vst [vmem:[#allocation2 + $0xd0] sm:$0x3] %v5159_v2  ;;  %274 = vst [vmem:[#allocation2 + $0xd8] sm:$0xff] %v5159_v2  ;;  %4333 = vmatpush3.bf16.msra.mxu1 %v5061_v7  ;;  %v307_v24 = vld [vmem:[%s5244_s20 + $0x30] sm:$0xff]  ;;  %v308_v25 = vld [vmem:[%s5244_s20 + $0x38] sm:$0xff] }
  0x15   : > { %275 = vst [vmem:[#allocation2 + $0xe0] sm:$0xff] %v5159_v2  ;;  %276 = vst [vmem:[#allocation2 + $0xe8] sm:$0x3] %v5159_v2  ;;  %4525 = vmatpush3.bf16.msra.mxu0 %v5062_v8  ;;  %4334 = vmatprep.subr.bf16.mxu1 %v5063_v9  ;;  %v309_v33 = vld [vmem:[%s5244_s20 + $0x40] sm:$0xff]  ;;  %v310_v34 = vld [vmem:[%s5244_s20 + $0x48] sm:$0xff] }
  0x16   : > { %277 = vst [vmem:[#allocation2 + $0xf0] sm:$0xff] %v5159_v2  ;;  %278 = vst [vmem:[#allocation2 + $0xf8] sm:$0xff] %v5159_v2  ;;  %4526 = vmatprep.subr.bf16.mxu0 %v5064_v10  ;;  %v311_v36 = vld [vmem:[%s5244_s20 + $0x50] sm:$0xff]  ;;  %v312_v37 = vld [vmem:[%s5244_s20 + $0x58] sm:$0xff] }
  0x17   : > { %279 = vst [vmem:[#allocation2 + $0x100] sm:$0x3] %v5159_v2  ;;  %280 = vst [vmem:[#allocation2 + $0x108] sm:$0xff] %v5159_v2  ;;  %v313_v42 = vld [vmem:[%s5244_s20 + $0x60] sm:$0xff]  ;;  %v314_v43 = vld [vmem:[%s5244_s20 + $0x68] sm:$0xff] }
  0x18   : > { %281 = vst [vmem:[#allocation2 + $0x110] sm:$0xff] %v5159_v2  ;;  %282 = vst [vmem:[#allocation2 + $0x118] sm:$0x3] %v5159_v2  ;;  %4335 = vmatpush3.bf16.msra.mxu1 %v5063_v9  ;;  %v5074_v46 = vld [vmem:[%s5987_s1 + $0x8] sm:$0xff]   ;;  %v315_v47 = vld [vmem:[%s5244_s20 + $0x70] sm:$0xff] }
  0x19   : > { %283 = vst [vmem:[#allocation2 + $0x120] sm:$0xff] %v5159_v2  ;;  %284 = vst [vmem:[#allocation2 + $0x128] sm:$0xff] %v5159_v2  ;;  %4527 = vmatpush3.bf16.msra.mxu0 %v5064_v10  ;;  %4336 = vmatprep.subr.bf16.mxu1 %v5065_v11  ;;  %v316_v48 = vld [vmem:[%s5244_s20 + $0x78] sm:$0xff]  ;;  %v317_v55 = vld [vmem:[%s5244_s20 + $0x80] sm:$0xff] }
  0x1a   : > { %285 = vst [vmem:[#allocation2 + $0x130] sm:$0x3] %v5159_v2  ;;  %286 = vst [vmem:[#allocation2 + $0x138] sm:$0xff] %v5159_v2  ;;  %4528 = vmatprep.subr.bf16.mxu0 %v5066_v12  ;;  %v318_v57 = vld [vmem:[%s5244_s20 + $0x88] sm:$0xff]  ;;  %v5076_v59 = vld [vmem:[%s5987_s1 + $0x158] sm:$0xff]  }
  0x1b   : > { %287 = vst [vmem:[#allocation2 + $0x140] sm:$0xff] %v5159_v2  ;;  %288 = vst [vmem:[#allocation2 + $0x148] sm:$0x3] %v5159_v2  ;;  %v5080_v61 = vld [vmem:[%s5987_s1 + $0x18] sm:$0xff]   ;;  %v5078_v63 = vld [vmem:[%s5987_s1 + $0x160] sm:$0xff]  }
  0x1c   : > { %289 = vst [vmem:[#allocation2 + $0x150] sm:$0xff] %v5159_v2  ;;  %290 = vst [vmem:[#allocation2 + $0x158] sm:$0xff] %v5159_v2  ;;  %4337 = vmatpush3.bf16.msra.mxu1 %v5065_v11  ;;  %v319_v0 = vld [vmem:[%s5244_s20 + $0x90] sm:$0xff]  ;;  %v320_v1 = vld [vmem:[%s5244_s20 + $0x98] sm:$0xff] }
  0x1d   : > { %291 = vst [vmem:[#allocation2 + $0x160] sm:$0x3] %v5159_v2  ;;  %292 = vst [vmem:[#allocation2 + $0x168] sm:$0xff] %v5159_v2  ;;  %4529 = vmatpush3.bf16.msra.mxu0 %v5066_v12  ;;  %4338 = vmatprep.subr.bf16.mxu1 %v5067_v20  ;;  %v321_v4 = vld [vmem:[%s5244_s20 + $0xa0] sm:$0xff]  ;;  %v322_v5 = vld [vmem:[%s5244_s20 + $0xa8] sm:$0xff] }
  0x1e   : > { %293 = vst [vmem:[#allocation2 + $0x170] sm:$0xff] %v5159_v2  ;;  %294 = vst [vmem:[#allocation2 + $0x178] sm:$0x3] %v5159_v2  ;;  %4530 = vmatprep.subr.bf16.mxu0 %v5068_v21  ;;  %v5083_v6 = vld [vmem:[%s5987_s1 + $0x20] sm:$0xff]   ;;  %v323_v9 = vld [vmem:[%s5244_s20 + $0xb0] sm:$0xff] }
  0x1f   : > { %295 = vst [vmem:[#allocation2 + $0x180] sm:$0xff] %v5159_v2  ;;  %296 = vst [vmem:[#allocation2 + $0x188] sm:$0xff] %v5159_v2  ;;  %v5079_v10 = vld [vmem:[%s5987_s1 + $0x168] sm:$0xff]   ;;  %v324_v12 = vld [vmem:[%s5244_s20 + $0xb8] sm:$0xff] }
  0x20   : > { %297 = vst [vmem:[#allocation2 + $0x190] sm:$0x3] %v5159_v2  ;;  %298 = vst [vmem:[#allocation2 + $0x198] sm:$0xff] %v5159_v2  ;;  %4339 = vmatpush3.bf16.msra.mxu1 %v5067_v20  ;;  %v5085_v11 = vld [vmem:[%s5987_s1 + $0x28] sm:$0xff]   ;;  %v325_v13 = vld [vmem:[%s5244_s20 + $0xc0] sm:$0xff] }
  0x21   : > { %299 = vst [vmem:[#allocation2 + $0x1a0] sm:$0xff] %v5159_v2  ;;  %300 = vst [vmem:[#allocation2 + $0x1a8] sm:$0x3] %v5159_v2  ;;  %4531 = vmatpush3.bf16.msra.mxu0 %v5068_v21  ;;  %4340 = vmatprep.subr.bf16.mxu1 %v5069_v26  ;;  %v326_v14 = vld [vmem:[%s5244_s20 + $0xc8] sm:$0xff]  ;;  %v5087_v20 = vld [vmem:[%s5987_s1 + $0x30] sm:$0xff]  }
  0x22   : > { %335 = vst.msk [vmem:[#allocation2 + $0x19] sm:$0xff] %vm334_vm0, %v301_v15  ;;  %336 = vst.msk [vmem:[#allocation2 + $0x21] sm:$0xff] %vm334_vm0, %v302_v17  ;;  %4532 = vmatprep.subr.bf16.mxu0 %v5070_v28  ;;  %v5081_v17 = vld [vmem:[%s5987_s1 + $0x170] sm:$0xff]  }
  0x23   : > { %337 = vst.msk [vmem:[#allocation2 + $0x31] sm:$0xff] %vm334_vm0, %v303_v18  ;;  %338 = vst.msk [vmem:[#allocation2 + $0x39] sm:$0xff] %vm334_vm0, %v304_v19  ;;  %v327_v21 = vld [vmem:[%s5244_s20 + $0xd0] sm:$0xff] }
  0x24   : > { %339 = vst.msk [vmem:[#allocation2 + $0x49] sm:$0xff] %vm334_vm0, %v305_v22  ;;  %340 = vst.msk [vmem:[#allocation2 + $0x51] sm:$0xff] %vm334_vm0, %v306_v23  ;;  %4341 = vmatpush3.bf16.msra.mxu1 %v5069_v26  ;;  %v328_v23 = vld [vmem:[%s5244_s20 + $0xd8] sm:$0xff]  ;;  %v330_v26 = vld [vmem:[%s5244_s20 + $0xe8] sm:$0xff] }
  0x25   : > { %341 = vst.msk [vmem:[#allocation2 + $0x61] sm:$0xff] %vm334_vm0, %v307_v24  ;;  %342 = vst.msk [vmem:[#allocation2 + $0x69] sm:$0xff] %vm334_vm0, %v308_v25  ;;  %4533 = vmatpush3.bf16.msra.mxu0 %v5070_v28  ;;  %4374 = vmatprep.subr.bf16.mxu1 %v5071_v31  ;;  %v329_v25 = vld [vmem:[%s5244_s20 + $0xe0] sm:$0xff] }
  0x26   : > { %343 = vst.msk [vmem:[#allocation2 + $0x79] sm:$0xff] %vm334_vm0, %v309_v33  ;;  %344 = vst.msk [vmem:[#allocation2 + $0x81] sm:$0xff] %vm334_vm0, %v310_v34  ;;  %4566 = vmatprep.subr.bf16.mxu0 %v5072_v38 }
  0x27   : > { %345 = vst.msk [vmem:[#allocation2 + $0x91] sm:$0xff] %vm334_vm0, %v311_v36  ;;  %346 = vst.msk [vmem:[#allocation2 + $0x99] sm:$0xff] %vm334_vm0, %v312_v37 }
  0x28   : > { %347 = vst.msk [vmem:[#allocation2 + $0xa9] sm:$0xff] %vm334_vm0, %v313_v42  ;;  %348 = vst.msk [vmem:[#allocation2 + $0xb1] sm:$0xff] %vm334_vm0, %v314_v43  ;;  %v5086_v43 = vld [vmem:[%s5987_s1 + $0x188] sm:$0xff]  }
  0x29   : > { %v3666_v27 = vld [vmem:[#allocation2 + $0x19] sm:$0xff]  ;;  %v3667_v29 = vld [vmem:[#allocation2 + $0x21] sm:$0xff]  ;;  %349 = vst.msk [vmem:[#allocation2 + $0xc1] sm:$0xff] %vm334_vm0, %v315_v47  ;;  %350 = vst.msk [vmem:[#allocation2 + $0xc9] sm:$0xff] %vm334_vm0, %v316_v48 }
  0x2a   : > { %v1564_v30 = vpack.c.bf16 %v3667_v29, %v3666_v27  ;;  %v3668_v32 = vld [vmem:[#allocation2 + $0x31] sm:$0xff]  ;;  %v3669_v35 = vld [vmem:[#allocation2 + $0x39] sm:$0xff]  ;;  %351 = vst.msk [vmem:[#allocation2 + $0xd9] sm:$0xff] %vm334_vm0, %v317_v55  ;;  %352 = vst.msk [vmem:[#allocation2 + $0xe1] sm:$0xff] %vm334_vm0, %v318_v57 }
  0x2b   : > { %v3670_v39 = vld [vmem:[#allocation2 + $0x49] sm:$0xff]  ;;  %v3671_v40 = vld [vmem:[#allocation2 + $0x51] sm:$0xff]  ;;  %v1565_v41 = vpack.c.bf16 %v3669_v35, %v3668_v32  ;;  %353 = vst.msk [vmem:[#allocation2 + $0xf1] sm:$0xff] %vm334_vm0, %v319_v0  ;;  %354 = vst.msk [vmem:[#allocation2 + $0xf9] sm:$0xff] %vm334_vm0, %v320_v1 }
  0x2c   : > { %4534 = vmatprep.mubr.bf16.mxu0 %v1564_v30  ;;  %v1566_v45 = vpack.c.bf16 %v3671_v40, %v3670_v39  ;;  %4343 = vmatmul.mubr.bf16.vlgmr.msra.gmra.mrb[0].mxu1 %v1564_v30  ;;  %v3672_v51 = vld [vmem:[#allocation2 + $0x61] sm:$0xff]  ;;  %v3673_v52 = vld [vmem:[#allocation2 + $0x69] sm:$0xff]  ;;  %355 = vst.msk [vmem:[#allocation2 + $0x109] sm:$0xff] %vm334_vm0, %v321_v4  ;;  %356 = vst.msk [vmem:[#allocation2 + $0x111] sm:$0xff] %vm334_vm0, %v322_v5 }
  0x2d   : > { %4535 = vmatmul.mubr.bf16.vlgmr.msra.gmra.mrb[0].mxu0 %v1565_v41  ;;  %4375 = vmatpush3.bf16.msra.mxu1 %v5071_v31  ;;  %v3674_v53 = vld [vmem:[#allocation2 + $0x79] sm:$0xff]  ;;  %v3675_v54 = vld [vmem:[#allocation2 + $0x81] sm:$0xff]  ;;  %v1567_v56 = vpack.c.bf16 %v3673_v52, %v3672_v51  ;;  %357 = vst.msk [vmem:[#allocation2 + $0x121] sm:$0xff] %vm334_vm0, %v323_v9  ;;  %358 = vst.msk [vmem:[#allocation2 + $0x129] sm:$0xff] %vm334_vm0, %v324_v12 }
  0x2e   : > { %4567 = vmatpush3.bf16.msra.mxu0 %v5072_v38  ;;  %4346 = vmatprep.mubr.bf16.mxu1 %v1565_v41  ;;  %v1568_v58 = vpack.c.bf16 %v3675_v54, %v3674_v53  ;;  %v3676_v60 = vld [vmem:[#allocation2 + $0x91] sm:$0xff]  ;;  %v3677_v62 = vld [vmem:[#allocation2 + $0x99] sm:$0xff]  ;;  %359 = vst.msk [vmem:[#allocation2 + $0x139] sm:$0xff] %vm334_vm0, %v325_v13  ;;  %360 = vst.msk [vmem:[#allocation2 + $0x141] sm:$0xff] %vm334_vm0, %v326_v14 }
  0x2f   : > { %4568 = vmatprep.subr.bf16.mxu0 %v5073_v44  ;;  %4538 = vmatprep.mubr.bf16.mxu0 %v1566_v45  ;;  %v3678_v2 = vld [vmem:[#allocation2 + $0xa9] sm:$0xff]  ;;  %v3679_v3 = vld [vmem:[#allocation2 + $0xb1] sm:$0xff]  ;;  %v1569_v7 = vpack.c.bf16 %v3677_v62, %v3676_v60  ;;  %v3722_v18 = vld [vmem:[#allocation2 + $0x1a] sm:$0xff]  ;;  %361 = vst.msk [vmem:[#allocation2 + $0x151] sm:$0xff] %vm334_vm0, %v327_v21 }
  0x30   : > { %4376 = vmatprep.subr.bf16.mxu1 %v5074_v46  ;;  %v1570_v8 = vpack.c.bf16 %v3679_v3, %v3678_v2  ;;  %v3680_v15 = vld [vmem:[#allocation2 + $0xc1] sm:$0xff]  ;;  %v3681_v16 = vld [vmem:[#allocation2 + $0xc9] sm:$0xff]  ;;  %362 = vst.msk [vmem:[#allocation2 + $0x159] sm:$0xff] %vm334_vm0, %v328_v23  ;;  %v5082_v27 = vld [vmem:[%s5987_s1 + $0x178] sm:$0xff]  }
  0x31   : > { %4377 = vmatpush3.bf16.msra.mxu1 %v5074_v46  ;;  %v3723_v19 = vld [vmem:[#allocation2 + $0x22] sm:$0xff]  ;;  %v1571_v22 = vpack.c.bf16 %v3681_v16, %v3680_v15  ;;  %363 = vst.msk [vmem:[#allocation2 + $0x169] sm:$0xff] %vm334_vm0, %v329_v25  ;;  %364 = vst.msk [vmem:[#allocation2 + $0x171] sm:$0xff] %vm334_vm0, %v330_v26  ;;  %v3724_v28 = vld [vmem:[#allocation2 + $0x32] sm:$0xff]  ;;  %v5160_v26 = vmov 0.0|0.0  }
  0x32   : > { %4569 = vmatpush3.bf16.msra.mxu0 %v5073_v44  ;;  %4378 = vmatprep.subr.bf16.mxu1 %v5077_v50  ;;  %v5361_v24 = vpack.c.bf16 %v3723_v19, %v3722_v18  ;;  %v3725_v29 = vld [vmem:[#allocation2 + $0x3a] sm:$0xff]  ;;  %v454_v33 = vld [vmem:[#allocation2 + $0xf1] sm:$0xff]  ;;  %v3728_v44 = vld [vmem:[#allocation2 + $0x62] sm:$0xff] }
  0x33   : > { %4570 = vmatprep.subr.bf16.mxu0 %v5075_v49  ;;  %v5089_v30 = vld [vmem:[%s5987_s1 + $0x38] sm:$0xff]   ;;  %v453_v32 = vld [vmem:[#allocation2 + $0xe1] sm:$0xff]  ;;  %v3726_v36 = vld [vmem:[#allocation2 + $0x4a] sm:$0xff]  ;;  %v5378_v39 = vpack.c.bf16 %v3725_v29, %v3724_v28 }
  0x34   : > { %4347 = vmatmul.mubr.bf16.gmra.mrb[4].mxu1 %v1566_v45  ;;  %v452_v31 = vld [vmem:[#allocation2 + $0xd9] sm:$0xff]  ;;  %v3729_v45 = vld [vmem:[#allocation2 + $0x6a] sm:$0xff]  ;;  %v458_v48 = vld [vmem:[#allocation2 + $0x121] sm:$0xff] }
  0x35   : > { %4539 = vmatmul.mubr.bf16.gmra.mrb[4].mxu0 %v1567_v56  ;;  %4350 = vmatprep.mubr.bf16.mxu1 %v1567_v56  ;;  %v455_v34 = vld [vmem:[#allocation2 + $0xf9] sm:$0xff]  ;;  %v475_v38 = vpack.c.bf16 %v453_v32, %v452_v31  ;;  %v456_v46 = vld [vmem:[#allocation2 + $0x109] sm:$0xff]  ;;  %v457_v47 = vld [vmem:[#allocation2 + $0x111] sm:$0xff]  ;;  %v5396_v54 = vpack.c.bf16 %v3729_v45, %v3728_v44 }
  0x36   : > { %4571 = vmatpush3.bf16.msra.mxu0 %v5075_v49  ;;  %4542 = vmatprep.mubr.bf16.mxu0 %v1568_v58  ;;  %v5084_v35 = vld [vmem:[%s5987_s1 + $0x180] sm:$0xff]   ;;  %v3727_v37 = vld [vmem:[#allocation2 + $0x52] sm:$0xff]  ;;  %v476_v40 = vpack.c.bf16 %v455_v34, %v454_v33  ;;  %v477_v53 = vpack.c.bf16 %v457_v47, %v456_v46  ;;  %v3734_v62 = vld [vmem:[#allocation2 + $0xaa] sm:$0xff] }
  0x37   : > { %4572 = vmatprep.subr.bf16.mxu0 %v5076_v59  ;;  %4379 = vmatpush3.bf16.msra.mxu1 %v5077_v50  ;;  %v5383_v41 = vld [vmem:[%s5987_s1 + $0x80] sm:$0xff]   ;;  %v5385_v42 = vpack.c.bf16 %v3727_v37, %v3726_v36  ;;  %v459_v50 = vld [vmem:[#allocation2 + $0x129] sm:$0xff]  ;;  %v5090_v57 = vld [vmem:[%s5987_s1 + $0x198] sm:$0xff]  }
  0x38   : > { %4380 = vmatprep.subr.bf16.mxu1 %v5080_v61  ;;  %v3730_v49 = vld [vmem:[#allocation2 + $0x7a] sm:$0xff]  ;;  %v3731_v51 = vld [vmem:[#allocation2 + $0x82] sm:$0xff]  ;;  %v5088_v52 = vld [vmem:[%s5987_s1 + $0x190] sm:$0xff]   ;;  %v5398_v55 = vpack.c.bf16 %v459_v50, %v458_v48 }
  0x39   : > { %v5400_v56 = vpack.c.bf16 %v3731_v51, %v3730_v49  ;;  %v460_v60 = vld [vmem:[#allocation2 + $0x139] sm:$0xff]  ;;  %v331_v4 = vld [vmem:[%s5244_s20 + $0xf0] sm:$0xff]  ;;  %v5094_v9 = vld [vmem:[%s5987_s1 + $0x1a8] sm:$0xff]  }
  0x3a   : > { %4573 = vmatpush3.bf16.msra.mxu0 %v5076_v59  ;;  %v3733_v59 = vld [vmem:[#allocation2 + $0x9a] sm:$0xff]  ;;  %v3735_v1 = vld [vmem:[#allocation2 + $0xb2] sm:$0xff]  ;;  %365 = vst.msk [vmem:[#allocation2 + $0x181] sm:$0xff] %vm334_vm0, %v331_v4  ;;  %v3737_v13 = vld [vmem:[#allocation2 + $0xca] sm:$0xff] }
  0x3b   : > { %4574 = vmatprep.subr.bf16.mxu0 %v5078_v63  ;;  %4381 = vmatpush3.bf16.msra.mxu1 %v5080_v61  ;;  %v461_v61 = vld [vmem:[#allocation2 + $0x141] sm:$0xff]  ;;  %v463_v0 = vld [vmem:[#allocation2 + $0x159] sm:$0xff]  ;;  %v465_v12 = vld [vmem:[#allocation2 + $0x171] sm:$0xff] }
  0x3c   : > { %4351 = vmatmul.mubr.bf16.gmra.mrb[8].mxu1 %v1568_v58  ;;  %4382 = vmatprep.subr.bf16.mxu1 %v5083_v6  ;;  %v3732_v58 = vld [vmem:[#allocation2 + $0x92] sm:$0xff]  ;;  %v5092_v2 = vld [vmem:[%s5987_s1 + $0x1a0] sm:$0xff]   ;;  %v5411_v3 = vpack.c.bf16 %v461_v61, %v460_v60  ;;  %v3742_v29 = vld [vmem:[#allocation2 + $0x10a] sm:$0xff] }
  0x3d   : > { %4543 = vmatmul.mubr.bf16.gmra.mrb[8].mxu0 %v1569_v7  ;;  %4354 = vmatprep.mubr.bf16.mxu1 %v1569_v7  ;;  %v332_v5 = vld [vmem:[%s5244_s20 + $0xf8] sm:$0xff]  ;;  %v3739_v15 = vld [vmem:[#allocation2 + $0xe2] sm:$0xff]  ;;  %v5096_v16 = vld [vmem:[%s5987_s1 + $0x1b0] sm:$0xff]   ;;  %s3553_s20 = sshll.u32 %s5996_s15, 1 }
  0x3e   : > { %4575 = vmatpush3.bf16.msra.mxu0 %v5078_v63  ;;  %4546 = vmatprep.mubr.bf16.mxu0 %v1570_v8  ;;  %v462_v63 = vld [vmem:[#allocation2 + $0x151] sm:$0xff]  ;;  %366 = vst.msk [vmem:[#allocation2 + $0x189] sm:$0xff] %vm334_vm0, %v332_v5  ;;  %v3738_v14 = vld [vmem:[#allocation2 + $0xda] sm:$0xff]  ;;  %v376_v36 = vld [vmem:[#allocation2 + $0x48] sm:$0xff]  ;;  %s241_s13 = scalar_lea.vmem %s5990_s4, %s3553_s20 }
  0x3f   : > { %4576 = vmatprep.subr.bf16.mxu0 %v5079_v10  ;;  %4383 = vmatpush3.bf16.msra.mxu1 %v5083_v6  ;;  %v5415_v6 = vpack.c.bf16 %v3733_v59, %v3732_v58  ;;  %v5417_v7 = vpack.c.bf16 %v463_v0, %v462_v63  ;;  %v5437_v19 = vpack.c.bf16 %v3739_v15, %v3738_v14  ;;  %v373_v21 = vld [vmem:[#allocation2 + $0x20] sm:$0xff]  ;;  %v3740_v23 = vld [vmem:[#allocation2 + $0xf2] sm:$0xff]  ;;  %v379_v45 = vld [vmem:[#allocation2 + $0x68] sm:$0xff] }
  0x40   : > { %4384 = vmatprep.subr.bf16.mxu1 %v5085_v11  ;;  %v3741_v25 = vld [vmem:[#allocation2 + $0xfa] sm:$0xff]  ;;  %v377_v37 = vld [vmem:[#allocation2 + $0x50] sm:$0xff]  ;;  %v3747_v48 = vld [vmem:[#allocation2 + $0x142] sm:$0xff] }
  0x41   : > { %v375_v28 = vld [vmem:[#allocation2 + $0x38] sm:$0xff]  ;;  %v5449_v31 = vld [vmem:[%s5987_s1 + $0x1c0] sm:$0xff]   ;;  %v5453_v33 = vpack.c.bf16 %v3741_v25, %v3740_v23  ;;  %v5095_v47 = vld [vmem:[%s5987_s1 + $0x90] sm:$0xff]   ;;  %v5471_v49 = vpack.c.bf16 %v377_v37, %v376_v36 }
  0x42   : > { %4577 = vmatpush3.bf16.msra.mxu0 %v5079_v10  ;;  %v3736_v10 = vld [vmem:[#allocation2 + $0xc2] sm:$0xff]  ;;  %v3746_v46 = vld [vmem:[#allocation2 + $0x13a] sm:$0xff]  ;;  %v3748_v58 = vld [vmem:[#allocation2 + $0x152] sm:$0xff] }
  0x43   : > { %4578 = vmatprep.subr.bf16.mxu0 %v5081_v17  ;;  %4385 = vmatpush3.bf16.msra.mxu1 %v5085_v11  ;;  %v464_v11 = vld [vmem:[#allocation2 + $0x169] sm:$0xff]  ;;  %v5435_v18 = vpack.c.bf16 %v3737_v13, %v3736_v10  ;;  %v378_v44 = vld [vmem:[#allocation2 + $0x60] sm:$0xff]  ;;  %v383_v61 = vld [vmem:[#allocation2 + $0x98] sm:$0xff] }
  0x44   : > { %4355 = vmatmul.mubr.bf16.gmra.mrb[12].mxu1 %v1570_v8  ;;  %4386 = vmatprep.subr.bf16.mxu1 %v5087_v20  ;;  %v5421_v8 = vpack.c.bf16 %v3735_v1, %v3734_v62  ;;  %v5475_v51 = vpack.c.bf16 %v379_v45, %v378_v44  ;;  %v3749_v59 = vld [vmem:[#allocation2 + $0x15a] sm:$0xff]  ;;  %v382_v60 = vld [vmem:[#allocation2 + $0x90] sm:$0xff]  ;;  %v5101_v10 = vld [vmem:[%s5987_s1 + $0xa8] sm:$0xff]  }
  0x45   : > { %4547 = vmatmul.mubr.bf16.gmra.mrb[12].mxu0 %v1571_v22  ;;  %4358 = vmatprep.mubr.bf16.mxu1 %v1571_v22  ;;  %v5098_v22 = vld [vmem:[%s5987_s1 + $0x1b8] sm:$0xff]   ;;  %v3750_v62 = vld [vmem:[#allocation2 + $0x16a] sm:$0xff]  ;;  %v5099_v0 = vld [vmem:[%s5987_s1 + $0xa0] sm:$0xff]   ;;  %v5493_v4 = vpack.c.bf16 %v383_v61, %v382_v60 }
  0x46   : > { %4579 = vmatpush3.bf16.msra.mxu0 %v5081_v17  ;;  %4582 = vmatprep.mubr.bf16.mxu0 %v5361_v24  ;;  %v5433_v17 = vpack.c.bf16 %v465_v12, %v464_v11  ;;  %v3751_v63 = vld [vmem:[#allocation2 + $0x172] sm:$0xff]  ;;  %v386_v12 = vld [vmem:[#allocation2 + $0xc0] sm:$0xff]  ;;  %v387_v13 = vld [vmem:[#allocation2 + $0xc8] sm:$0xff] }
  0x47   : > { %4580 = vmatprep.subr.bf16.mxu0 %v5082_v27  ;;  %4387 = vmatpush3.bf16.msra.mxu1 %v5087_v20  ;;  %v372_v20 = vld [vmem:[#allocation2 + $0x18] sm:$0xff]  ;;  %v5495_v5 = vpack.c.bf16 %v3751_v63, %v3750_v62  ;;  %v385_v11 = vld [vmem:[#allocation2 + $0xb0] sm:$0xff]  ;;  %v3752_v14 = vld [vmem:[#allocation2 + $0x182] sm:$0xff] }
  0x48   : > { %4388 = vmatprep.subr.bf16.mxu1 %v5089_v30  ;;  %v5451_v32 = vpack.c.bf16 %v373_v21, %v372_v20  ;;  %v3753_v15 = vld [vmem:[#allocation2 + $0x18a] sm:$0xff]  ;;  %v5105_v23 = vld [vmem:[%s5987_s1 + $0xb8] sm:$0xff]   ;;  %v394_v44 = vld [vmem:[#allocation2 + $0x120] sm:$0xff] }
  0x49   : > { %v1885_v21 = vpack.c.bf16 %v3753_v15, %v3752_v14  ;;  %v388_v25 = vld [vmem:[#allocation2 + $0xd8] sm:$0xff]  ;;  %v395_v45 = vld [vmem:[#allocation2 + $0x128] sm:$0xff]  ;;  %v5116_v15 = vld [vmem:[%s5987_s1 + $0x200] sm:$0xff]  }
  0x4a   : > { %4581 = vmatpush3.bf16.msra.mxu0 %v5082_v27  ;;  %v374_v27 = vld [vmem:[#allocation2 + $0x30] sm:$0xff]  ;;  %v5110_v62 = vld [vmem:[%s5987_s1 + $0x1e8] sm:$0xff]   ;;  %v5114_v14 = vld [vmem:[%s5987_s1 + $0x1f8] sm:$0xff]  }
  0x4b   : > { %4614 = vmatprep.subr.bf16.mxu0 %v5084_v35  ;;  %4389 = vmatpush3.bf16.msra.mxu1 %v5089_v30  ;;  %v3743_v30 = vld [vmem:[#allocation2 + $0x112] sm:$0xff]  ;;  %v5455_v34 = vpack.c.bf16 %v375_v28, %v374_v27  ;;  %v389_v27 = vld [vmem:[#allocation2 + $0xe0] sm:$0xff]  ;;  %v400_v63 = vld [vmem:[#allocation2 + $0x168] sm:$0xff] }
  0x4c   : > { %4359 = vmatmul.mubr.bf16.gmra.mrb[16].mxu1 %v475_v38  ;;  %4422 = vmatprep.subr.bf16.mxu1 %v5383_v41  ;;  %v5093_v38 = vld [vmem:[%s5987_s1 + $0x88] sm:$0xff]   ;;  %v390_v28 = vld [vmem:[#allocation2 + $0xf0] sm:$0xff]  ;;  %v5522_v36 = vpack.c.bf16 %v389_v27, %v388_v25  ;;  %v5115_v25 = vld [vmem:[%s5987_s1 + $0xe0] sm:$0xff]  }
  0x4d   : > { %4583 = vmatmul.mubr.bf16.vlgmr.msra.gmra.mrb[0].mxu0 %v5378_v39  ;;  %4362 = vmatprep.mubr.bf16.mxu1 %v476_v40  ;;  %v3744_v40 = vld [vmem:[#allocation2 + $0x122] sm:$0xff] }
  0x4e   : > { %4615 = vmatpush3.bf16.msra.mxu0 %v5084_v35  ;;  %4586 = vmatprep.mubr.bf16.mxu0 %v5385_v42  ;;  %v5457_v35 = vpack.c.bf16 %v3743_v30, %v3742_v29  ;;  %v391_v29 = vld [vmem:[#allocation2 + $0xf8] sm:$0xff]  ;;  %v5520_v30 = vld [vmem:[%s5987_s1 + $0xc0] sm:$0xff]  }
  0x4f   : > { %4616 = vmatprep.subr.bf16.mxu0 %v5086_v43  ;;  %v5524_v37 = vpack.c.bf16 %v391_v29, %v390_v28  ;;  %v3835_v28 = vld [vmem:[#allocation2 + $0x39] sm:$0xff]  ;;  %v5119_v29 = vld [vmem:[%s5987_s1 + $0xf0] sm:$0xff]  }
  0x52   : > { %4617 = vmatpush3.bf16.msra.mxu0 %v5086_v43  ;;  %v3745_v43 = vld [vmem:[#allocation2 + $0x12a] sm:$0xff] }
  0x53   : > { %4618 = vmatprep.subr.bf16.mxu0 %v5088_v52  ;;  %v5473_v50 = vpack.c.bf16 %v3745_v43, %v3744_v40  ;;  %v392_v40 = vld [vmem:[#allocation2 + $0x108] sm:$0xff]  ;;  %v393_v43 = vld [vmem:[#allocation2 + $0x110] sm:$0xff] }
  0x54   : > { %4363 = vmatmul.mubr.bf16.gmra.mrb[20].mxu1 %v477_v53  ;;  %v381_v53 = vld [vmem:[#allocation2 + $0x80] sm:$0xff] }
  0x55   : > { %4587 = vmatmul.mubr.bf16.gmra.mrb[4].mxu0 %v5396_v54  ;;  %4366 = vmatprep.mubr.bf16.mxu1 %v5398_v55 }
  0x56   : > { %4590 = vmatprep.mubr.bf16.mxu0 %v5400_v56  ;;  %4619 = vmatpush3.bf16.msra.mxu0 %v5088_v52  ;;  %v380_v52 = vld [vmem:[#allocation2 + $0x78] sm:$0xff] }
  0x57   : > { %4620 = vmatprep.subr.bf16.mxu0 %v5090_v57  ;;  %v5489_v1 = vpack.c.bf16 %v381_v53, %v380_v52  ;;  %v5106_v52 = vld [vmem:[%s5987_s1 + $0x1d8] sm:$0xff]   ;;  %v397_v53 = vld [vmem:[#allocation2 + $0x140] sm:$0xff] }
  0x5a   : > { %4621 = vmatpush3.bf16.msra.mxu0 %v5090_v57  ;;  %v5097_v57 = vld [vmem:[%s5987_s1 + $0x98] sm:$0xff]  }
  0x5b   : > { %4622 = vmatprep.subr.bf16.mxu0 %v5092_v2 }
  0x5c   : > { %4367 = vmatmul.mubr.bf16.gmra.mrb[24].mxu1 %v5411_v3 }
  0x5d   : > { %4591 = vmatmul.mubr.bf16.gmra.mrb[8].mxu0 %v5415_v6  ;;  %4370 = vmatprep.mubr.bf16.mxu1 %v5417_v7 }
  0x5e   : > { %4594 = vmatprep.mubr.bf16.mxu0 %v5421_v8  ;;  %4623 = vmatpush3.bf16.msra.mxu0 %v5092_v2  ;;  %v5491_v2 = vpack.c.bf16 %v3749_v59, %v3748_v58  ;;  %v399_v58 = vld [vmem:[#allocation2 + $0x158] sm:$0xff]  ;;  %v5108_v59 = vld [vmem:[%s5987_s1 + $0x1e0] sm:$0xff]  }
  0x5f   : > { %4624 = vmatprep.subr.bf16.mxu0 %v5094_v9 }
  0x62   : > { %4625 = vmatpush3.bf16.msra.mxu0 %v5094_v9  ;;  %v384_v9 = vld [vmem:[#allocation2 + $0xa8] sm:$0xff] }
  0x63   : > { %4626 = vmatprep.subr.bf16.mxu0 %v5096_v16  ;;  %v5507_v20 = vpack.c.bf16 %v385_v11, %v384_v9  ;;  %v917_v9 = vld [vmem:[#allocation2 + $0x2] sm:$0xff]  ;;  %v5112_v11 = vld [vmem:[%s5987_s1 + $0x1f0] sm:$0xff]  }
  0x64   : > { %4371 = vmatmul.mubr.bf16.gmra.mrb[28].mxu1 %v5433_v17 }
  0x65   : > { %4595 = vmatmul.mubr.bf16.gmra.mrb[12].mxu0 %v5435_v18  ;;  %4390 = vmatprep.mubr.bf16.mxu1 %v5160_v26 }
  0x66   : > { %4598 = vmatprep.mubr.bf16.mxu0 %v5437_v19  ;;  %4627 = vmatpush3.bf16.msra.mxu0 %v5096_v16  ;;  %v5103_v16 = vld [vmem:[%s5987_s1 + $0xb0] sm:$0xff]  }
  0x67   : > { %4628 = vmatprep.subr.bf16.mxu0 %v5098_v22 }
  0x6a   : > { %4629 = vmatpush3.bf16.msra.mxu0 %v5098_v22  ;;  %v5509_v22 = vpack.c.bf16 %v387_v13, %v386_v12 }
  0x6b   : > { %4662 = vmatprep.subr.bf16.mxu0 %v5449_v31 }
  0x6c   : > { %4391 = vmatmul.mubr.bf16.vlgmr.msra.gmra.mrb[0].mxu1 %v5451_v32 }
  0x6d   : > { %4599 = vmatmul.mubr.bf16.gmra.mrb[16].mxu0 %v5453_v33  ;;  %4423 = vmatpush3.bf16.msra.mxu1 %v5383_v41  ;;  %v5477_v41 = vpack.c.bf16 %v3747_v48, %v3746_v46  ;;  %v5104_v46 = vld [vmem:[%s5987_s1 + $0x1d0] sm:$0xff]   ;;  %v5540_v48 = vpack.c.bf16 %v395_v45, %v394_v44 }
  0x6e   : > { %4394 = vmatprep.mubr.bf16.mxu1 %v5455_v34  ;;  %4602 = vmatprep.mubr.bf16.mxu0 %v5457_v35 }
  0x6f   : > { %4424 = vmatprep.subr.bf16.mxu1 %v5093_v38 }
  0x71   : > { %4425 = vmatpush3.bf16.msra.mxu1 %v5093_v38  ;;  %v5102_v38 = vld [vmem:[%s5987_s1 + $0x1c8] sm:$0xff]  }
  0x72   : > { %4426 = vmatprep.subr.bf16.mxu1 %v5095_v47 }
  0x74   : > { %4395 = vmatmul.mubr.bf16.gmra.mrb[4].mxu1 %v5471_v49 }
  0x75   : > { %4603 = vmatmul.mubr.bf16.gmra.mrb[20].mxu0 %v5473_v50  ;;  %4398 = vmatprep.mubr.bf16.mxu1 %v5475_v51 }
  0x76   : > { %4606 = vmatprep.mubr.bf16.mxu0 %v5477_v41  ;;  %4427 = vmatpush3.bf16.msra.mxu1 %v5095_v47  ;;  %v5538_v47 = vpack.c.bf16 %v393_v43, %v392_v40  ;;  %v3838_v40 = vld [vmem:[#allocation2 + $0x61] sm:$0xff]  ;;  %v3839_v43 = vld [vmem:[#allocation2 + $0x69] sm:$0xff] }
  0x77   : > { %4428 = vmatprep.subr.bf16.mxu1 %v5097_v57  ;;  %v2487_v45 = vpack.c.bf16 %v3839_v43, %v3838_v40  ;;  %v3898_v40 = vld [vmem:[#allocation2 + $0x92] sm:$0xff]  ;;  %v3899_v43 = vld [vmem:[#allocation2 + $0x9a] sm:$0xff] }
  0x7a   : > { %4429 = vmatpush3.bf16.msra.mxu1 %v5097_v57  ;;  %v398_v57 = vld [vmem:[#allocation2 + $0x150] sm:$0xff] }
  0x7b   : > { %4430 = vmatprep.subr.bf16.mxu1 %v5099_v0  ;;  %v5554_v61 = vpack.c.bf16 %v399_v58, %v398_v57 }
  0x7c   : > { %4399 = vmatmul.mubr.bf16.gmra.mrb[8].mxu1 %v5489_v1 }
  0x7d   : > { %4607 = vmatmul.mubr.bf16.gmra.mrb[24].mxu0 %v5491_v2  ;;  %4402 = vmatprep.mubr.bf16.mxu1 %v5493_v4 }
  0x7e   : > { %4610 = vmatprep.mubr.bf16.mxu0 %v5495_v5  ;;  %4431 = vmatpush3.bf16.msra.mxu1 %v5099_v0  ;;  %v401_v0 = vld [vmem:[#allocation2 + $0x170] sm:$0xff] }
  0x7f   : > { %4432 = vmatprep.subr.bf16.mxu1 %v5101_v10  ;;  %v5566_v12 = vpack.c.bf16 %v401_v0, %v400_v63  ;;  %v3847_v63 = vld [vmem:[#allocation2 + $0xc9] sm:$0xff]  ;;  %v5123_v0 = vld [vmem:[%s5987_s1 + $0x220] sm:$0xff]  }
  0x82   : > { %4433 = vmatpush3.bf16.msra.mxu1 %v5101_v10  ;;  %v918_v10 = vld [vmem:[#allocation2 + $0xa] sm:$0xff] }
  0x83   : > { %4434 = vmatprep.subr.bf16.mxu1 %v5103_v16  ;;  %v949_v13 = vpack.c.bf16 %v918_v10, %v917_v9 }
  0x84   : > { %4403 = vmatmul.mubr.bf16.gmra.mrb[12].mxu1 %v5507_v20 }
  0x85   : > { %4611 = vmatmul.mubr.bf16.gmra.mrb[28].mxu0 %v1885_v21  ;;  %4406 = vmatprep.mubr.bf16.mxu1 %v5509_v22  ;;  %v5111_v21 = vld [vmem:[%s5987_s1 + $0xd0] sm:$0xff]  }
  0x86   : > { %4630 = vmatprep.mubr.bf16.mxu0 %v5455_v34  ;;  %4435 = vmatpush3.bf16.msra.mxu1 %v5103_v16  ;;  %v5109_v16 = vld [vmem:[%s5987_s1 + $0xc8] sm:$0xff]  }
  0x87   : > { %4436 = vmatprep.subr.bf16.mxu1 %v5105_v23 }
  0x8a   : > { %4437 = vmatpush3.bf16.msra.mxu1 %v5105_v23  ;;  %v5113_v23 = vld [vmem:[%s5987_s1 + $0xd8] sm:$0xff]  }
  0x8b   : > { %4470 = vmatprep.subr.bf16.mxu1 %v5520_v30 }
  0x8c   : > { %4407 = vmatmul.mubr.bf16.gmra.mrb[16].mxu1 %v5522_v36 }
  0x8d   : > { %4631 = vmatmul.mubr.bf16.vlgmr.msra.gmra.mrb[0].mxu0 %v5471_v49  ;;  %4410 = vmatprep.mubr.bf16.mxu1 %v5524_v37 }
  0x8e   : > { %4663 = vmatpush3.bf16.msra.mxu0 %v5449_v31  ;;  %4634 = vmatprep.mubr.bf16.mxu0 %v5475_v51  ;;  %v396_v31 = vld [vmem:[#allocation2 + $0x138] sm:$0xff] }
  0x8f   : > { %4664 = vmatprep.subr.bf16.mxu0 %v5102_v38  ;;  %v5552_v60 = vpack.c.bf16 %v397_v53, %v396_v31  ;;  %v3843_v31 = vld [vmem:[#allocation2 + $0x99] sm:$0xff]  ;;  %v5120_v53 = vld [vmem:[%s5987_s1 + $0x210] sm:$0xff]  }
  0x92   : > { %4665 = vmatpush3.bf16.msra.mxu0 %v5102_v38  ;;  %v3837_v38 = vld [vmem:[#allocation2 + $0x51] sm:$0xff] }
  0x93   : > { %4666 = vmatprep.subr.bf16.mxu0 %v5104_v46 }
  0x94   : > { %4411 = vmatmul.mubr.bf16.gmra.mrb[20].mxu1 %v5538_v47 }
  0x95   : > { %4635 = vmatmul.mubr.bf16.gmra.mrb[4].mxu0 %v5489_v1  ;;  %4414 = vmatprep.mubr.bf16.mxu1 %v5540_v48 }
  0x96   : > { %4638 = vmatprep.mubr.bf16.mxu0 %v5493_v4  ;;  %4667 = vmatpush3.bf16.msra.mxu0 %v5104_v46  ;;  %v5118_v46 = vld [vmem:[%s5987_s1 + $0x208] sm:$0xff]  }
  0x97   : > { %4668 = vmatprep.subr.bf16.mxu0 %v5106_v52 }
  0x9a   : > { %4669 = vmatpush3.bf16.msra.mxu0 %v5106_v52  ;;  %v3842_v52 = vld [vmem:[#allocation2 + $0x91] sm:$0xff] }
  0x9b   : > { %4670 = vmatprep.subr.bf16.mxu0 %v5108_v59  ;;  %v2489_v58 = vpack.c.bf16 %v3843_v31, %v3842_v52  ;;  %v3905_v31 = vld [vmem:[#allocation2 + $0xe2] sm:$0xff] }
  0x9c   : > { %4415 = vmatmul.mubr.bf16.gmra.mrb[24].mxu1 %v5552_v60 }
  0x9d   : > { %4639 = vmatmul.mubr.bf16.gmra.mrb[8].mxu0 %v5507_v20  ;;  %4418 = vmatprep.mubr.bf16.mxu1 %v5554_v61 }
  0x9e   : > { %4642 = vmatprep.mubr.bf16.mxu0 %v5509_v22  ;;  %4671 = vmatpush3.bf16.msra.mxu0 %v5108_v59  ;;  %v3845_v59 = vld [vmem:[#allocation2 + $0xb1] sm:$0xff] }
  0x9f   : > { %4672 = vmatprep.subr.bf16.mxu0 %v5110_v62 }
  0xa2   : > { %4673 = vmatpush3.bf16.msra.mxu0 %v5110_v62  ;;  %v3846_v62 = vld [vmem:[#allocation2 + $0xc1] sm:$0xff] }
  0xa3   : > { %4674 = vmatprep.subr.bf16.mxu0 %v5112_v11  ;;  %v2491_v10 = vpack.c.bf16 %v3847_v63, %v3846_v62  ;;  %v3689_v63 = vld [vmem:[#allocation2 + $0x129] sm:$0xff] }
  0xa4   : > { %4419 = vmatmul.mubr.bf16.gmra.mrb[28].mxu1 %v5566_v12 }
  0xa5   : > { %4643 = vmatmul.mubr.bf16.gmra.mrb[12].mxu0 %v5522_v36  ;;  %4438 = vmatprep.mubr.bf16.mxu1 %v949_v13  ;;  %v3850_v13 = vld [vmem:[#allocation2 + $0xf1] sm:$0xff] }
  0xa6   : > { %4646 = vmatprep.mubr.bf16.mxu0 %v5524_v37  ;;  %4675 = vmatpush3.bf16.msra.mxu0 %v5112_v11  ;;  %v3849_v11 = vld [vmem:[#allocation2 + $0xe1] sm:$0xff] }
  0xa7   : > { %4676 = vmatprep.subr.bf16.mxu0 %v5114_v14 }
  0xaa   : > { %4677 = vmatpush3.bf16.msra.mxu0 %v5114_v14  ;;  %v3851_v14 = vld [vmem:[#allocation2 + $0xf9] sm:$0xff] }
  0xab   : > { %4710 = vmatprep.subr.bf16.mxu0 %v5116_v15 }
  0xac   : > { %4439 = vmatmul.mubr.bf16.vlgmr.msra.gmra.mrb[0].mxu1 %v5361_v24  ;;  %v3806_v24 = vld [vmem:[#allocation2 + $0x180] sm:$0xff] }
  0xad   : > { %4647 = vmatmul.mubr.bf16.gmra.mrb[16].mxu0 %v5538_v47  ;;  %4471 = vmatpush3.bf16.msra.mxu1 %v5520_v30 }
  0xae   : > { %4442 = vmatprep.mubr.bf16.mxu1 %v5378_v39  ;;  %4650 = vmatprep.mubr.bf16.mxu0 %v5540_v48  ;;  %v3807_v39 = vld [vmem:[#allocation2 + $0x188] sm:$0xff] }
  0xaf   : > { %4472 = vmatprep.subr.bf16.mxu1 %v5109_v16  ;;  %v5598_v27 = vpack.c.bf16 %v3807_v39, %v3806_v24 }
  0xb1   : > { %4473 = vmatpush3.bf16.msra.mxu1 %v5109_v16 }
  0xb2   : > { %4474 = vmatprep.subr.bf16.mxu1 %v5111_v21 }
  0xb4   : > { %4443 = vmatmul.mubr.bf16.gmra.mrb[4].mxu1 %v5385_v42  ;;  %v5117_v42 = vld [vmem:[%s5987_s1 + $0xe8] sm:$0xff]  }
  0xb5   : > { %4651 = vmatmul.mubr.bf16.gmra.mrb[20].mxu0 %v5552_v60  ;;  %4446 = vmatprep.mubr.bf16.mxu1 %v5396_v54  ;;  %v3834_v54 = vld [vmem:[#allocation2 + $0x31] sm:$0xff] }
  0xb6   : > { %4654 = vmatprep.mubr.bf16.mxu0 %v5554_v61  ;;  %4475 = vmatpush3.bf16.msra.mxu1 %v5111_v21  ;;  %v2485_v30 = vpack.c.bf16 %v3835_v28, %v3834_v54  ;;  %v5645_v21 = vpack.c.bf16 %v3851_v14, %v3850_v13 }
  0xb7   : > { %4476 = vmatprep.subr.bf16.mxu1 %v5113_v23 }
  0xba   : > { %4477 = vmatpush3.bf16.msra.mxu1 %v5113_v23  ;;  %v3853_v23 = vld [vmem:[#allocation2 + $0x111] sm:$0xff] }
  0xbb   : > { %4478 = vmatprep.subr.bf16.mxu1 %v5115_v25 }
  0xbc   : > { %4447 = vmatmul.mubr.bf16.gmra.mrb[8].mxu1 %v5400_v56  ;;  %v5121_v56 = vld [vmem:[%s5987_s1 + $0xf8] sm:$0xff]  }
  0xbd   : > { %4655 = vmatmul.mubr.bf16.gmra.mrb[24].mxu0 %v5566_v12  ;;  %4450 = vmatprep.mubr.bf16.mxu1 %v5415_v6  ;;  %v3836_v6 = vld [vmem:[#allocation2 + $0x49] sm:$0xff] }
  0xbe   : > { %4658 = vmatprep.mubr.bf16.mxu0 %v5598_v27  ;;  %4479 = vmatpush3.bf16.msra.mxu1 %v5115_v25  ;;  %v2486_v44 = vpack.c.bf16 %v3837_v38, %v3836_v6  ;;  %v3891_v25 = vld [vmem:[#allocation2 + $0x3a] sm:$0xff] }
  0xbf   : > { %4480 = vmatprep.subr.bf16.mxu1 %v5117_v42 }
  0xc2   : > { %4481 = vmatpush3.bf16.msra.mxu1 %v5117_v42  ;;  %v5132_v42 = vld [vmem:[%s5987_s1 + $0x128] sm:$0xff]  }
  0xc3   : > { %4482 = vmatprep.subr.bf16.mxu1 %v5119_v29 }
  0xc4   : > { %4451 = vmatmul.mubr.bf16.gmra.mrb[12].mxu1 %v5421_v8  ;;  %v5127_v8 = vld [vmem:[%s5987_s1 + $0x100] sm:$0xff]  }
  0xc5   : > { %4659 = vmatmul.mubr.bf16.gmra.mrb[28].mxu0 %v5160_v26  ;;  %4454 = vmatprep.mubr.bf16.mxu1 %v5435_v18  ;;  %v3840_v18 = vld [vmem:[#allocation2 + $0x79] sm:$0xff]  ;;  %v3841_v26 = vld [vmem:[#allocation2 + $0x81] sm:$0xff] }
  0xc6   : > { %4678 = vmatprep.mubr.bf16.mxu0 %v2485_v30  ;;  %4483 = vmatpush3.bf16.msra.mxu1 %v5119_v29  ;;  %v2488_v57 = vpack.c.bf16 %v3841_v26, %v3840_v18  ;;  %v3894_v29 = vld [vmem:[#allocation2 + $0x62] sm:$0xff]  ;;  %v3895_v30 = vld [vmem:[#allocation2 + $0x6a] sm:$0xff] }
  0xc7   : > { %4484 = vmatprep.subr.bf16.mxu1 %v5121_v56  ;;  %v2793_v38 = vpack.c.bf16 %v3895_v30, %v3894_v29  ;;  %v3902_v18 = vld [vmem:[#allocation2 + $0xc2] sm:$0xff] }
  0xca   : > { %4485 = vmatpush3.bf16.msra.mxu1 %v5121_v56  ;;  %v5134_v56 = vld [vmem:[%s5987_s1 + $0x138] sm:$0xff]  }
  0xcb   : > { %4758 = vmatprep.subr.bf16.mxu1 %v5127_v8 }
  0xcc   : > { %4455 = vmatmul.mubr.bf16.gmra.mrb[16].mxu1 %v5437_v19  ;;  %v5122_v19 = vld [vmem:[%s5987_s1 + $0x218] sm:$0xff]  }
  0xcd   : > { %4679 = vmatmul.mubr.bf16.vlgmr.msra.gmra.mrb[0].mxu0 %v2486_v44  ;;  %4458 = vmatprep.mubr.bf16.mxu1 %v5453_v33  ;;  %v3844_v33 = vld [vmem:[#allocation2 + $0xa9] sm:$0xff] }
  0xce   : > { %4711 = vmatpush3.bf16.msra.mxu0 %v5116_v15  ;;  %4682 = vmatprep.mubr.bf16.mxu0 %v2487_v45  ;;  %v2490_v9 = vpack.c.bf16 %v3845_v59, %v3844_v33  ;;  %v5125_v15 = vld [vmem:[%s5987_s1 + $0x230] sm:$0xff]   ;;  %v2795_v45 = vpack.c.bf16 %v3899_v43, %v3898_v40  ;;  %v3910_v33 = vld [vmem:[#allocation2 + $0x122] sm:$0xff] }
  0xcf   : > { %4712 = vmatprep.subr.bf16.mxu0 %v5118_v46 }
  0xd2   : > { %4713 = vmatpush3.bf16.msra.mxu0 %v5118_v46  ;;  %v3900_v46 = vld [vmem:[#allocation2 + $0xaa] sm:$0xff] }
  0xd3   : > { %4714 = vmatprep.subr.bf16.mxu0 %v5120_v53 }
  0xd4   : > { %4459 = vmatmul.mubr.bf16.gmra.mrb[20].mxu1 %v5457_v35  ;;  %v5124_v35 = vld [vmem:[%s5987_s1 + $0x228] sm:$0xff]  }
  0xd5   : > { %4683 = vmatmul.mubr.bf16.gmra.mrb[4].mxu0 %v2488_v57  ;;  %4462 = vmatprep.mubr.bf16.mxu1 %v5473_v50  ;;  %v3848_v50 = vld [vmem:[#allocation2 + $0xd9] sm:$0xff] }
  0xd6   : > { %4686 = vmatprep.mubr.bf16.mxu0 %v2489_v58  ;;  %4715 = vmatpush3.bf16.msra.mxu0 %v5120_v53  ;;  %v5643_v16 = vpack.c.bf16 %v3849_v11, %v3848_v50  ;;  %v3906_v53 = vld [vmem:[#allocation2 + $0xf2] sm:$0xff]  ;;  %v3915_v50 = vld [vmem:[#allocation2 + $0x15a] sm:$0xff] }
  0xd7   : > { %4716 = vmatprep.subr.bf16.mxu0 %v5122_v19 }
  0xda   : > { %4717 = vmatpush3.bf16.msra.mxu0 %v5122_v19  ;;  %v3909_v19 = vld [vmem:[#allocation2 + $0x112] sm:$0xff] }
  0xdb   : > { %4718 = vmatprep.subr.bf16.mxu0 %v5123_v0 }
  0xdc   : > { %4463 = vmatmul.mubr.bf16.gmra.mrb[24].mxu1 %v5477_v41  ;;  %v5126_v41 = vld [vmem:[%s5987_s1 + $0x238] sm:$0xff]  }
  0xdd   : > { %4687 = vmatmul.mubr.bf16.gmra.mrb[8].mxu0 %v2490_v9  ;;  %4466 = vmatprep.mubr.bf16.mxu1 %v5491_v2  ;;  %v3852_v2 = vld [vmem:[#allocation2 + $0x109] sm:$0xff]  ;;  %v3690_v9 = vld [vmem:[#allocation2 + $0x139] sm:$0xff] }
  0xde   : > { %4690 = vmatprep.mubr.bf16.mxu0 %v2491_v10  ;;  %4719 = vmatpush3.bf16.msra.mxu0 %v5123_v0  ;;  %v5654_v24 = vpack.c.bf16 %v3853_v23, %v3852_v2  ;;  %v3912_v0 = vld [vmem:[#allocation2 + $0x13a] sm:$0xff]  ;;  %v3917_v2 = vld [vmem:[#allocation2 + $0x172] sm:$0xff]  ;;  %v3694_v23 = vld [vmem:[#allocation2 + $0x169] sm:$0xff] }
  0xdf   : > { %4720 = vmatprep.subr.bf16.mxu0 %v5124_v35  ;;  %v3691_v10 = vld [vmem:[#allocation2 + $0x141] sm:$0xff] }
  0xe0   : > { %v1576_v14 = vpack.c.bf16 %v3691_v10, %v3690_v9 }
  0xe2   : > { %4721 = vmatpush3.bf16.msra.mxu0 %v5124_v35  ;;  %v3914_v35 = vld [vmem:[#allocation2 + $0x152] sm:$0xff] }
  0xe3   : > { %4722 = vmatprep.subr.bf16.mxu0 %v5125_v15 }
  0xe4   : > { %4467 = vmatmul.mubr.bf16.gmra.mrb[28].mxu1 %v5495_v5  ;;  %v5129_v5 = vld [vmem:[%s5987_s1 + $0x110] sm:$0xff]  }
  0xe5   : > { %4691 = vmatmul.mubr.bf16.gmra.mrb[12].mxu0 %v5643_v16  ;;  %4486 = vmatprep.mubr.bf16.mxu1 %v5451_v32  ;;  %v5128_v32 = vld [vmem:[%s5987_s1 + $0x108] sm:$0xff]  }
  0xe6   : > { %4694 = vmatprep.mubr.bf16.mxu0 %v5645_v21  ;;  %4723 = vmatpush3.bf16.msra.mxu0 %v5125_v15  ;;  %v2803_v15 = vpack.c.bf16 %v3915_v50, %v3914_v35 }
  0xe7   : > { %4724 = vmatprep.subr.bf16.mxu0 %v5126_v41 }
  0xea   : > { %4725 = vmatpush3.bf16.msra.mxu0 %v5126_v41  ;;  %v3916_v41 = vld [vmem:[#allocation2 + $0x16a] sm:$0xff] }
  0xec   : > { %4487 = vmatmul.mubr.bf16.vlgmr.msra.gmra.mrb[0].mxu1 %v5455_v34  ;;  %v3863_v34 = vld [vmem:[#allocation2 + $0x189] sm:$0xff] }
  0xed   : > { %4695 = vmatmul.mubr.bf16.gmra.mrb[16].mxu0 %v5654_v24  ;;  %4766 = vmatpush3.bf16.msra.mxu1 %v5127_v8  ;;  %v3901_v8 = vld [vmem:[#allocation2 + $0xb2] sm:$0xff] }
  0xee   : > { %4490 = vmatprep.mubr.bf16.mxu1 %v5471_v49  ;;  %4698 = vmatprep.mubr.bf16.mxu0 %v5398_v55  ;;  %v3862_v55 = vld [vmem:[#allocation2 + $0x181] sm:$0xff]  ;;  %v5130_v49 = vld [vmem:[%s5987_s1 + $0x118] sm:$0xff]   ;;  %v2796_v26 = vpack.c.bf16 %v3901_v8, %v3900_v46  ;;  %v5715_v46 = vld [vmem:[%s5988_s2] ss:$0 sm:$0xff] }
  0xef   : > { %4759 = vmatprep.subr.bf16.mxu1 %v5128_v32  ;;  %v5673_v39 = vpack.c.bf16 %v3863_v34, %v3862_v55  ;;  %v2804_v34 = vpack.c.bf16 %v3917_v2, %v3916_v41 }
  0xf1   : > { %4767 = vmatpush3.bf16.msra.mxu1 %v5128_v32  ;;  %v3918_v32 = vld [vmem:[#allocation2 + $0x182] sm:$0xff] }
  0xf2   : > { %4760 = vmatprep.subr.bf16.mxu1 %v5129_v5 }
  0xf4   : > { %4491 = vmatmul.mubr.bf16.gmra.mrb[4].mxu1 %v5475_v51  ;;  %v5131_v51 = vld [vmem:[%s5987_s1 + $0x120] sm:$0xff]  }
  0xf5   : > { %4699 = vmatmul.mubr.bf16.gmra.mrb[20].mxu0 %v5411_v3  ;;  %4494 = vmatprep.mubr.bf16.mxu1 %v5489_v1  ;;  %v3864_v3 = vld [vmem:[#allocation2 + $0x199] sm:$0xff] }
  0xf6   : > { %4702 = vmatprep.mubr.bf16.mxu0 %v5417_v7  ;;  %4768 = vmatpush3.bf16.msra.mxu1 %v5129_v5  ;;  %v3865_v7 = vld [vmem:[#allocation2 + $0x1a1] sm:$0xff]  ;;  %v3890_v1 = vld [vmem:[#allocation2 + $0x32] sm:$0xff]  ;;  %v3919_v5 = vld [vmem:[#allocation2 + $0x18a] sm:$0xff] }
  0xf7   : > { %4761 = vmatprep.subr.bf16.mxu1 %v5130_v49  ;;  %v2500_v54 = vpack.c.bf16 %v3865_v7, %v3864_v3  ;;  %v2791_v28 = vpack.c.bf16 %v3891_v25, %v3890_v1  ;;  %v3920_v3 = vld [vmem:[#allocation2 + $0x19a] sm:$0xff]  ;;  %v3921_v7 = vld [vmem:[#allocation2 + $0x1a2] sm:$0xff] }
  0xf8   : > { %v2806_v1 = vpack.c.bf16 %v3921_v7, %v3920_v3 }
  0xfa   : > { %4769 = vmatpush3.bf16.msra.mxu1 %v5130_v49 }
  0xfb   : > { %4762 = vmatprep.subr.bf16.mxu1 %v5131_v51 }
  0xfc   : > { %4495 = vmatmul.mubr.bf16.gmra.mrb[8].mxu1 %v5493_v4  ;;  %v3892_v4 = vld [vmem:[#allocation2 + $0x4a] sm:$0xff] }
  0xfd   : > { %4703 = vmatmul.mubr.bf16.gmra.mrb[24].mxu0 %v5433_v17  ;;  %4498 = vmatprep.mubr.bf16.mxu1 %v5507_v20  ;;  %v5133_v17 = vld [vmem:[%s5987_s1 + $0x130] sm:$0xff]  }
  0xfe   : > { %4706 = vmatprep.mubr.bf16.mxu0 %v5673_v39  ;;  %4770 = vmatpush3.bf16.msra.mxu1 %v5131_v51  ;;  %v3893_v20 = vld [vmem:[#allocation2 + $0x52] sm:$0xff]  ;;  %v2805_v51 = vpack.c.bf16 %v3919_v5, %v3918_v32 }
  0xff   : > { %4763 = vmatprep.subr.bf16.mxu1 %v5132_v42  ;;  %v2792_v6 = vpack.c.bf16 %v3893_v20, %v3892_v4 }
 0x102   : > { %4771 = vmatpush3.bf16.msra.mxu1 %v5132_v42 }
 0x103   : > { %4764 = vmatprep.subr.bf16.mxu1 %v5133_v17 }
 0x104   : > { %4499 = vmatmul.mubr.bf16.gmra.mrb[12].mxu1 %v5509_v22  ;;  %v3896_v22 = vld [vmem:[#allocation2 + $0x7a] sm:$0xff] }
 0x105   : > { %4707 = vmatmul.mubr.bf16.gmra.mrb[28].mxu0 %v2500_v54  ;;  %4502 = vmatprep.mubr.bf16.mxu1 %v5522_v36  ;;  %v3897_v36 = vld [vmem:[#allocation2 + $0x82] sm:$0xff] }
 0x106   : > { %4726 = vmatprep.mubr.bf16.mxu0 %v2791_v28  ;;  %4772 = vmatpush3.bf16.msra.mxu1 %v5133_v17  ;;  %v2794_v44 = vpack.c.bf16 %v3897_v36, %v3896_v22 }
 0x107   : > { %4765 = vmatprep.subr.bf16.mxu1 %v5134_v56 }
 0x10a   : > { %4773 = vmatpush3.bf16.msra.mxu1 %v5134_v56 }
 0x10c   : > { %4503 = vmatmul.mubr.bf16.gmra.mrb[16].mxu1 %v5524_v37  ;;  %v3903_v37 = vld [vmem:[#allocation2 + $0xca] sm:$0xff] }
 0x10d   : > { %4727 = vmatmul.mubr.bf16.vlgmr.msra.gmra.mrb[0].mxu0 %v2792_v6  ;;  %4506 = vmatprep.mubr.bf16.mxu1 %v5538_v47  ;;  %v2797_v52 = vpack.c.bf16 %v3903_v37, %v3902_v18  ;;  %v3904_v47 = vld [vmem:[#allocation2 + $0xda] sm:$0xff] }
 0x10e   : > { %4730 = vmatprep.mubr.bf16.mxu0 %v2793_v38  ;;  %v2798_v57 = vpack.c.bf16 %v3905_v31, %v3904_v47 }
 0x114   : > { %4507 = vmatmul.mubr.bf16.gmra.mrb[20].mxu1 %v5540_v48  ;;  %v3907_v48 = vld [vmem:[#allocation2 + $0xfa] sm:$0xff] }
 0x115   : > { %4731 = vmatmul.mubr.bf16.gmra.mrb[4].mxu0 %v2794_v44  ;;  %4510 = vmatprep.mubr.bf16.mxu1 %v5552_v60  ;;  %v2799_v58 = vpack.c.bf16 %v3907_v48, %v3906_v53  ;;  %v3908_v60 = vld [vmem:[#allocation2 + $0x10a] sm:$0xff] }
 0x116   : > { %4734 = vmatprep.mubr.bf16.mxu0 %v2795_v45  ;;  %v2800_v59 = vpack.c.bf16 %v3909_v19, %v3908_v60 }
 0x11c   : > { %4511 = vmatmul.mubr.bf16.gmra.mrb[24].mxu1 %v5554_v61  ;;  %v3911_v61 = vld [vmem:[#allocation2 + $0x12a] sm:$0xff] }
 0x11d   : > { %4735 = vmatmul.mubr.bf16.gmra.mrb[8].mxu0 %v2796_v26  ;;  %4514 = vmatprep.mubr.bf16.mxu1 %v5566_v12  ;;  %v2801_v62 = vpack.c.bf16 %v3911_v61, %v3910_v33  ;;  %v3688_v12 = vld [vmem:[#allocation2 + $0x121] sm:$0xff] }
 0x11e   : > { %4738 = vmatprep.mubr.bf16.mxu0 %v2797_v52  ;;  %v1575_v11 = vpack.c.bf16 %v3689_v63, %v3688_v12 }
 0x124   : > { %4515 = vmatmul.mubr.bf16.gmra.mrb[28].mxu1 %v5598_v27  ;;  %v3913_v27 = vld [vmem:[#allocation2 + $0x142] sm:$0xff] }
 0x125   : > { %4739 = vmatmul.mubr.bf16.gmra.mrb[12].mxu0 %v2798_v57  ;;  %4550 = vmatprep.mubr.bf16.mxu1 %v5643_v16  ;;  %v2802_v13 = vpack.c.bf16 %v3913_v27, %v3912_v0  ;;  %v3692_v16 = vld [vmem:[#allocation2 + $0x151] sm:$0xff] }
 0x126   : > { %4742 = vmatprep.mubr.bf16.mxu0 %v2799_v58 }
 0x12c   : > { %4551 = vmatmul.mubr.bf16.vlgmr.msra.gmra.mrb[16].mxu1 %v5645_v21  ;;  %v3693_v21 = vld [vmem:[#allocation2 + $0x159] sm:$0xff] }
 0x12d   : > { %4743 = vmatmul.mubr.bf16.gmra.mrb[16].mxu0 %v2800_v59  ;;  %4554 = vmatprep.mubr.bf16.mxu1 %v5654_v24  ;;  %v3695_v24 = vld [vmem:[#allocation2 + $0x171] sm:$0xff]  ;;  %v1577_v55 = vpack.c.bf16 %v3693_v21, %v3692_v16 }
 0x12e   : > { %4746 = vmatprep.mubr.bf16.mxu0 %v2801_v62  ;;  %v1578_v49 = vpack.c.bf16 %v3695_v24, %v3694_v23 }
 0x134   : > { %4555 = vmatmul.mubr.bf16.gmra.mrb[20].mxu1 %v1575_v11 }
 0x135   : > { %4747 = vmatmul.mubr.bf16.gmra.mrb[20].mxu0 %v2802_v13  ;;  %4558 = vmatprep.mubr.bf16.mxu1 %v1576_v14 }
 0x136   : > { %4750 = vmatprep.mubr.bf16.mxu0 %v2803_v15 }
 0x13c   : > { %4559 = vmatmul.mubr.bf16.gmra.mrb[24].mxu1 %v1577_v55 }
 0x13d   : > { %4751 = vmatmul.mubr.bf16.gmra.mrb[24].mxu0 %v2804_v34  ;;  %4562 = vmatprep.mubr.bf16.mxu1 %v1578_v49 }
 0x13e   : > { %4754 = vmatprep.mubr.bf16.mxu0 %v2805_v51 }
 0x144   : > { %4563 = vmatmul.mubr.bf16.gmra.mrb[28].mxu1 %v5673_v39 }
 0x145   : > { %4755 = vmatmul.mubr.bf16.gmra.mrb[28].mxu0 %v2806_v1 }
 0x1bf   : > { %v4488_v25 = vpop.f32.mrb[0].mxu1 }
 0x1c0   : > { %v1373_v42 = vpop.f32.mrb[1].mxu1 }
 0x1c1   : > { %v4489_v54 = vpop.f32.mrb[2].mxu1 }
 0x1c2   : > { %v1376_v28 = vpop.f32.mrb[3].mxu1 }
 0x1c7   : > { %v4492_v17 = vpop.f32.mrb[4].mxu1 }
 0x1c8   : > { %v1389_v4 = vpop.f32.mrb[5].mxu1 }
 0x1c9   : > { %v4493_v20 = vpop.f32.mrb[6].mxu1 }
 0x1ca   : > { %v1392_v29 = vpop.f32.mrb[7].mxu1 }
 0x1cf   : > { %v4496_v30 = vpop.f32.mrb[8].mxu1 }
 0x1d0   : > { %v1405_v56 = vpop.f32.mrb[9].mxu1 }
 0x1d1   : > { %v4497_v6 = vpop.f32.mrb[10].mxu1 }
 0x1d2   : > { %v1408_v38 = vpop.f32.mrb[11].mxu1 }
 0x1d7   : > { %v5704_v22 = vpop.f32.mrb[12].mxu1 }
 0x1d8   : > { %v5706_v36 = vpop.f32.mrb[13].mxu1 }
 0x1d9   : > { %v5708_v40 = vpop.f32.mrb[14].mxu1 }
 0x1da   : > { %v5710_v39 = vpop.f32.mrb[15].mxu1 }
 0x1e0   : > { %v4728_v43 = vpop.f32.mrb[0].mxu0 }
 0x1e1   : > { %v4774_v44 = vadd.f32 %v4728_v43, %v4488_v25  ;;  %v2906_v45 = vpop.f32.mrb[1].mxu0 }
 0x1e2   : > { %v4775_v8 = vadd.f32 %v2906_v45, %v1373_v42  ;;  %v4729_v18 = vpop.f32.mrb[2].mxu0 }
 0x1e3   : > { %v4776_v37 = vadd.f32 %v4729_v18, %v4489_v54  ;;  %v2909_v26 = vpop.f32.mrb[3].mxu0  ;;  %v5719_v47 = vadd.f32 %v4774_v44, %v5715_v46 }
 0x1e4   : > { %v4777_v52 = vadd.f32 %v2909_v26, %v1376_v28  ;;  %v5725_v53 = vadd.f32 %v4775_v8, %v5715_v46 }
 0x1e5   : > { %v5722_v31 = vadd.f32 %v4776_v37, %v5715_v46 }
 0x1e6   : > { %v5733_v48 = vadd.f32 %v4777_v52, %v5715_v46 }
 0x1e7   : > { %v4023_v57 = vpack.c.bf16 %v5722_v31, %v5719_v47 }
 0x1e8   : > { %v4018_v58 = vpack.c.bf16 %v5733_v48, %v5725_v53  ;;  %v3264_v60 = vadd.f32 %v5733_v48, %v5725_v53  ;;  %v4732_v19 = vpop.f32.mrb[4].mxu0 }
 0x1e9   : > { %4095 = vst [vmem:[%s5730_s10 + $0x8] sm:$0xff] %v4023_v57   ;;  %v4778_v33 = vadd.f32 %v4732_v19, %v4492_v17  ;;  %v2922_v61 = vpop.f32.mrb[5].mxu0 }
 0x1ea   : > { %4019 = vst [vmem:[%s5730_s10] sm:$0xff] %v4018_v58   ;;  %v3265_v59 = vadd.f32 %v3264_v60, %v5719_v47  ;;  %v4779_v62 = vadd.f32 %v2922_v61, %v1389_v4  ;;  %v4733_v12 = vpop.f32.mrb[6].mxu0 }
 0x1eb   : > { %v4780_v63 = vadd.f32 %v4733_v12, %v4493_v20  ;;  %v2925_v0 = vpop.f32.mrb[7].mxu0  ;;  %v5749_v35 = vadd.f32 %v4778_v33, %v5715_v46 }
 0x1ec   : > { %v5745_v27 = vadd.f32 %v4779_v62, %v5715_v46  ;;  %v3266_v9 = vadd.f32 %v3265_v59, %v5722_v31  ;;  %v4781_v10 = vadd.f32 %v2925_v0, %v1392_v29 }
 0x1ed   : > { %v5752_v50 = vadd.f32 %v4780_v63, %v5715_v46 }
 0x1ee   : > { %v3267_v11 = vadd.f32 %v3266_v9, %v5745_v27  ;;  %v5756_v13 = vadd.f32 %v4781_v10, %v5715_v46 }
 0x1ef   : > { %v4033_v14 = vpack.c.bf16 %v5752_v50, %v5749_v35 }
 0x1f0   : > { %v4028_v15 = vpack.c.bf16 %v5756_v13, %v5745_v27  ;;  %v3268_v16 = vadd.f32 %v3267_v11, %v5756_v13  ;;  %v4736_v21 = vpop.f32.mrb[8].mxu0 }
 0x1f1   : > { %4097 = vst [vmem:[%s5730_s10 + $0x18] sm:$0xff] %v4033_v14   ;;  %v4782_v41 = vadd.f32 %v4736_v21, %v4496_v30  ;;  %v2938_v2 = vpop.f32.mrb[9].mxu0 }
 0x1f2   : > { %4096 = vst [vmem:[%s5730_s10 + $0x10] sm:$0xff] %v4028_v15   ;;  %v3269_v23 = vadd.f32 %v3268_v16, %v5749_v35  ;;  %v4783_v24 = vadd.f32 %v2938_v2, %v1405_v56  ;;  %v4737_v32 = vpop.f32.mrb[10].mxu0 }
 0x1f3   : > { %v4784_v5 = vadd.f32 %v4737_v32, %v4497_v6  ;;  %v2941_v55 = vpop.f32.mrb[11].mxu0  ;;  %v5771_v3 = vadd.f32 %v4782_v41, %v5715_v46 }
 0x1f4   : > { %v5767_v34 = vadd.f32 %v4783_v24, %v5715_v46  ;;  %v3270_v49 = vadd.f32 %v3269_v23, %v5752_v50  ;;  %v4785_v51 = vadd.f32 %v2941_v55, %v1408_v38 }
 0x1f5   : > { %v5774_v7 = vadd.f32 %v4784_v5, %v5715_v46 }
 0x1f6   : > { %v3271_v1 = vadd.f32 %v3270_v49, %v5767_v34  ;;  %v5778_v25 = vadd.f32 %v4785_v51, %v5715_v46 }
 0x1f7   : > { %v4043_v42 = vpack.c.bf16 %v5774_v7, %v5771_v3 }
 0x1f8   : > { %v4038_v54 = vpack.c.bf16 %v5778_v25, %v5767_v34  ;;  %v3272_v28 = vadd.f32 %v3271_v1, %v5778_v25  ;;  %v4740_v17 = vpop.f32.mrb[12].mxu0 }
 0x1f9   : > { %4099 = vst [vmem:[%s5730_s10 + $0x28] sm:$0xff] %v4043_v42   ;;  %v4786_v4 = vadd.f32 %v4740_v17, %v5704_v22  ;;  %v2954_v20 = vpop.f32.mrb[13].mxu0 }
 0x1fa   : > { %4098 = vst [vmem:[%s5730_s10 + $0x20] sm:$0xff] %v4038_v54   ;;  %v3273_v29 = vadd.f32 %v3272_v28, %v5771_v3  ;;  %v4787_v30 = vadd.f32 %v2954_v20, %v5706_v36  ;;  %v4741_v56 = vpop.f32.mrb[14].mxu0 }
 0x1fb   : > { %v4788_v6 = vadd.f32 %v4741_v56, %v5708_v40  ;;  %v2957_v38 = vpop.f32.mrb[15].mxu0  ;;  %v5797_v22 = vadd.f32 %v4786_v4, %v5715_v46 }
 0x1fc   : > { %v5792_v43 = vadd.f32 %v4787_v30, %v5715_v46  ;;  %v3274_v44 = vadd.f32 %v3273_v29, %v5774_v7  ;;  %v4789_v45 = vadd.f32 %v2957_v38, %v5710_v39 }
 0x1fd   : > { %v5800_v8 = vadd.f32 %v4788_v6, %v5715_v46 }
 0x1fe   : > { %v3275_v36 = vadd.f32 %v3274_v44, %v5792_v43  ;;  %v5804_v18 = vadd.f32 %v4789_v45, %v5715_v46 }
 0x1ff   : > { %v4053_v40 = vpack.c.bf16 %v5800_v8, %v5797_v22  ;;  %v4552_v37 = vpop.f32.mrb[16].mxu1 }
 0x200   : > { %v4048_v26 = vpack.c.bf16 %v5804_v18, %v5792_v43  ;;  %v3276_v39 = vadd.f32 %v3275_v36, %v5804_v18  ;;  %v4744_v52 = vpop.f32.mrb[16].mxu0  ;;  %v1743_v57 = vpop.f32.mrb[17].mxu1 }
 0x201   : > { %4101 = vst [vmem:[%s5730_s10 + $0x38] sm:$0xff] %v4053_v40   ;;  %v4790_v58 = vadd.f32 %v4744_v52, %v4552_v37  ;;  %v2970_v60 = vpop.f32.mrb[17].mxu0  ;;  %v4553_v19 = vpop.f32.mrb[18].mxu1 }
 0x202   : > { %4100 = vst [vmem:[%s5730_s10 + $0x30] sm:$0xff] %v4048_v26   ;;  %v3277_v33 = vadd.f32 %v3276_v39, %v5797_v22  ;;  %v4791_v61 = vadd.f32 %v2970_v60, %v1743_v57  ;;  %v4745_v59 = vpop.f32.mrb[18].mxu0  ;;  %v1746_v62 = vpop.f32.mrb[19].mxu1 }
 0x203   : > { %v4792_v12 = vadd.f32 %v4745_v59, %v4553_v19  ;;  %v2973_v63 = vpop.f32.mrb[19].mxu0  ;;  %v5819_v11 = vadd.f32 %v4790_v58, %v5715_v46 }
 0x204   : > { %v5815_v0 = vadd.f32 %v4791_v61, %v5715_v46  ;;  %v3278_v9 = vadd.f32 %v3277_v33, %v5800_v8  ;;  %v4793_v10 = vadd.f32 %v2973_v63, %v1746_v62 }
 0x205   : > { %v5822_v14 = vadd.f32 %v4792_v12, %v5715_v46 }
 0x206   : > { %v3279_v15 = vadd.f32 %v3278_v9, %v5815_v0  ;;  %v5826_v16 = vadd.f32 %v4793_v10, %v5715_v46 }
 0x207   : > { %v4063_v21 = vpack.c.bf16 %v5822_v14, %v5819_v11  ;;  %v4556_v41 = vpop.f32.mrb[20].mxu1 }
 0x208   : > { %v4058_v2 = vpack.c.bf16 %v5826_v16, %v5815_v0  ;;  %v3280_v23 = vadd.f32 %v3279_v15, %v5826_v16  ;;  %v4748_v24 = vpop.f32.mrb[20].mxu0  ;;  %v1759_v32 = vpop.f32.mrb[21].mxu1 }
 0x209   : > { %4103 = vst [vmem:[%s5730_s10 + $0x48] sm:$0xff] %v4063_v21   ;;  %v4794_v5 = vadd.f32 %v4748_v24, %v4556_v41  ;;  %v2986_v55 = vpop.f32.mrb[21].mxu0  ;;  %v4557_v49 = vpop.f32.mrb[22].mxu1 }
 0x20a   : > { %4102 = vst [vmem:[%s5730_s10 + $0x40] sm:$0xff] %v4058_v2   ;;  %v3281_v51 = vadd.f32 %v3280_v23, %v5819_v11  ;;  %v4795_v1 = vadd.f32 %v2986_v55, %v1759_v32  ;;  %v4749_v42 = vpop.f32.mrb[22].mxu0  ;;  %v1762_v54 = vpop.f32.mrb[23].mxu1 }
 0x20b   : > { %v4796_v28 = vadd.f32 %v4749_v42, %v4557_v49  ;;  %v2989_v17 = vpop.f32.mrb[23].mxu0  ;;  %v5841_v30 = vadd.f32 %v4794_v5, %v5715_v46 }
 0x20c   : > { %v5837_v4 = vadd.f32 %v4795_v1, %v5715_v46  ;;  %v3282_v20 = vadd.f32 %v3281_v51, %v5822_v14  ;;  %v4797_v29 = vadd.f32 %v2989_v17, %v1762_v54 }
 0x20d   : > { %v5844_v56 = vadd.f32 %v4796_v28, %v5715_v46 }
 0x20e   : > { %v3283_v6 = vadd.f32 %v3282_v20, %v5837_v4  ;;  %v5848_v38 = vadd.f32 %v4797_v29, %v5715_v46 }
 0x20f   : > { %v4073_v44 = vpack.c.bf16 %v5844_v56, %v5841_v30  ;;  %v4560_v45 = vpop.f32.mrb[24].mxu1 }
 0x210   : > { %v4068_v36 = vpack.c.bf16 %v5848_v38, %v5837_v4  ;;  %v3284_v40 = vadd.f32 %v3283_v6, %v5848_v38  ;;  %v4752_v37 = vpop.f32.mrb[24].mxu0  ;;  %v1775_v26 = vpop.f32.mrb[25].mxu1 }
 0x211   : > { %4105 = vst [vmem:[%s5730_s10 + $0x58] sm:$0xff] %v4073_v44   ;;  %v4798_v39 = vadd.f32 %v4752_v37, %v4560_v45  ;;  %v3002_v52 = vpop.f32.mrb[25].mxu0  ;;  %v4561_v57 = vpop.f32.mrb[26].mxu1 }
 0x212   : > { %4104 = vst [vmem:[%s5730_s10 + $0x50] sm:$0xff] %v4068_v36   ;;  %v3285_v58 = vadd.f32 %v3284_v40, %v5841_v30  ;;  %v4799_v60 = vadd.f32 %v3002_v52, %v1775_v26  ;;  %v4753_v19 = vpop.f32.mrb[26].mxu0  ;;  %v1778_v33 = vpop.f32.mrb[27].mxu1 }
 0x213   : > { %v4800_v61 = vadd.f32 %v4753_v19, %v4561_v57  ;;  %v3005_v59 = vpop.f32.mrb[27].mxu0  ;;  %v5863_v9 = vadd.f32 %v4798_v39, %v5715_v46 }
 0x214   : > { %v5859_v62 = vadd.f32 %v4799_v60, %v5715_v46  ;;  %v3286_v12 = vadd.f32 %v3285_v58, %v5844_v56  ;;  %v4801_v63 = vadd.f32 %v3005_v59, %v1778_v33 }
 0x215   : > { %v5866_v10 = vadd.f32 %v4800_v61, %v5715_v46 }
 0x216   : > { %v3287_v15 = vadd.f32 %v3286_v12, %v5859_v62  ;;  %v5870_v21 = vadd.f32 %v4801_v63, %v5715_v46 }
 0x217   : > { %v4083_v41 = vpack.c.bf16 %v5866_v10, %v5863_v9  ;;  %v4564_v2 = vpop.f32.mrb[28].mxu1 }
 0x218   : > { %v4078_v23 = vpack.c.bf16 %v5870_v21, %v5859_v62  ;;  %v3288_v24 = vadd.f32 %v3287_v15, %v5870_v21  ;;  %v4756_v32 = vpop.f32.mrb[28].mxu0  ;;  %v1791_v5 = vpop.f32.mrb[29].mxu1 }
 0x219   : > { %4107 = vst [vmem:[%s5730_s10 + $0x68] sm:$0xff] %v4083_v41   ;;  %v4802_v55 = vadd.f32 %v4756_v32, %v4564_v2  ;;  %v3018_v49 = vpop.f32.mrb[29].mxu0  ;;  %v4565_v51 = vpop.f32.mrb[30].mxu1 }
 0x21a   : > { %4106 = vst [vmem:[%s5730_s10 + $0x60] sm:$0xff] %v4078_v23   ;;  %v3289_v1 = vadd.f32 %v3288_v24, %v5863_v9  ;;  %v4803_v42 = vadd.f32 %v3018_v49, %v1791_v5  ;;  %v4757_v54 = vpop.f32.mrb[30].mxu0  ;;  %v1794_v28 = vpop.f32.mrb[31].mxu1 }
 0x21b   : > { %v4804_v17 = vadd.f32 %v4757_v54, %v4565_v51  ;;  %v3021_v20 = vpop.f32.mrb[31].mxu0  ;;  %v5885_v45 = vadd.f32 %v4802_v55, %v5715_v46 }
 0x21c   : > { %v5881_v29 = vadd.f32 %v4803_v42, %v5715_v46  ;;  %v3290_v6 = vadd.f32 %v3289_v1, %v5866_v10  ;;  %v4805_v44 = vadd.f32 %v3021_v20, %v1794_v28 }
 0x21d   : > { %v5888_v36 = vadd.f32 %v4804_v17, %v5715_v46 }
 0x21e   : > { %v3291_v40 = vadd.f32 %v3290_v6, %v5881_v29  ;;  %v5892_v37 = vadd.f32 %v4805_v44, %v5715_v46 }
 0x21f   : > { %v4093_v26 = vpack.c.bf16 %v5888_v36, %v5885_v45 }
 0x220   : > { %v4088_v39 = vpack.c.bf16 %v5892_v37, %v5881_v29  ;;  %v3292_v52 = vadd.f32 %v3291_v40, %v5892_v37 }
 0x221   : > { %4109 = vst [vmem:[%s5730_s10 + $0x78] sm:$0xff] %v4093_v26  }
 0x222   : > { %4108 = vst [vmem:[%s5730_s10 + $0x70] sm:$0xff] %v4088_v39   ;;  %v3293_v57 = vadd.f32 %v3292_v52, %v5885_v45 }
 0x224   : > { %v3294_v58 = vadd.f32 %v3293_v57, %v5888_v36 }
 0x226   : > { %v3295_v60 = vrot.slane %v3294_v58, 4 }
 0x228   : > { %v3296_v19 = vadd.f32 %v3295_v60, %v3294_v58 }
 0x22a   : > { %v3297_v33 = vrot.slane %v3296_v19, 2 }
 0x22c   : > { %v3298_v61 = vadd.f32 %v3297_v33, %v3296_v19 }
 0x22e   : > { %v3299_v46 = vrot.slane %v3298_v61, 1 }
 0x230   : > { %v5903_v59 = vadd.f32 %v3299_v46, %v3298_v61 }
 0x232   : > { %v5906_v12 = vmul.f32 0.00390625, %v5903_v59 }
 0x234   : > { %v3302_v63 = vsub.f32 %v5725_v53, %v5906_v12  ;;  %v3303_v15 = vsub.f32 %v5733_v48, %v5906_v12  ;;  %v3304_v41 = vsub.f32 %v5719_v47, %v5906_v12  ;;  %v3305_v24 = vsub.f32 %v5722_v31, %v5906_v12 }
 0x235   : > { %v3306_v32 = vsub.f32 %v5745_v27, %v5906_v12  ;;  %v3307_v49 = vsub.f32 %v5756_v13, %v5906_v12  ;;  %v3308_v48 = vsub.f32 %v5749_v35, %v5906_v12  ;;  %v3309_v42 = vsub.f32 %v5752_v50, %v5906_v12 }
 0x236   : > { %v3334_v2 = vmul.f32 %v3302_v63, %v3302_v63  ;;  %v3335_v23 = vmul.f32 %v3303_v15, %v3303_v15  ;;  %v3336_v5 = vmul.f32 %v3304_v41, %v3304_v41  ;;  %v3337_v53 = vmul.f32 %v3305_v24, %v3305_v24 }
 0x237   : > { %v3338_v1 = vmul.f32 %v3306_v32, %v3306_v32  ;;  %v3339_v54 = vmul.f32 %v3307_v49, %v3307_v49  ;;  %v3310_v27 = vsub.f32 %v5767_v34, %v5906_v12  ;;  %v3340_v28 = vmul.f32 %v3308_v48, %v3308_v48 }
 0x238   : > { %v3366_v55 = vadd.f32 %v3335_v23, %v3334_v2  ;;  %v3311_v13 = vsub.f32 %v5778_v25, %v5906_v12  ;;  %v3341_v20 = vmul.f32 %v3309_v42, %v3309_v42  ;;  %v3312_v35 = vsub.f32 %v5771_v3, %v5906_v12 }
 0x239   : > { %v3342_v44 = vmul.f32 %v3310_v27, %v3310_v27  ;;  %v3313_v50 = vsub.f32 %v5774_v7, %v5906_v12  ;;  %v3314_v34 = vsub.f32 %v5792_v43, %v5906_v12  ;;  %v3315_v25 = vsub.f32 %v5804_v18, %v5906_v12 }
 0x23a   : > { %v3367_v51 = vadd.f32 %v3366_v55, %v3336_v5  ;;  %v3343_v26 = vmul.f32 %v3311_v13, %v3311_v13  ;;  %v3344_v52 = vmul.f32 %v3312_v35, %v3312_v35  ;;  %v3316_v3 = vsub.f32 %v5797_v22, %v5906_v12 }
 0x23b   : > { %v3345_v58 = vmul.f32 %v3313_v50, %v3313_v50  ;;  %v3346_v19 = vmul.f32 %v3314_v34, %v3314_v34  ;;  %v3317_v7 = vsub.f32 %v5800_v8, %v5906_v12  ;;  %v3347_v61 = vmul.f32 %v3315_v25, %v3315_v25 }
 0x23c   : > { %v3368_v47 = vadd.f32 %v3367_v51, %v3337_v53  ;;  %v3318_v43 = vsub.f32 %v5815_v0, %v5906_v12  ;;  %v3348_v63 = vmul.f32 %v3316_v3, %v3316_v3  ;;  %v3319_v18 = vsub.f32 %v5826_v16, %v5906_v12 }
 0x23d   : > { %v3349_v41 = vmul.f32 %v3317_v7, %v3317_v7  ;;  %v3320_v22 = vsub.f32 %v5819_v11, %v5906_v12  ;;  %v3321_v8 = vsub.f32 %v5822_v14, %v5906_v12  ;;  %v3322_v0 = vsub.f32 %v5837_v4, %v5906_v12 }
 0x23e   : > { %v3369_v31 = vadd.f32 %v3368_v47, %v3338_v1  ;;  %v3350_v23 = vmul.f32 %v3318_v43, %v3318_v43  ;;  %v3351_v32 = vmul.f32 %v3319_v18, %v3319_v18  ;;  %v3323_v16 = vsub.f32 %v5848_v38, %v5906_v12 }
 0x23f   : > { %v3352_v55 = vmul.f32 %v3320_v22, %v3320_v22  ;;  %v3353_v53 = vmul.f32 %v3321_v8, %v3321_v8  ;;  %v3324_v11 = vsub.f32 %v5841_v30, %v5906_v12  ;;  %v3354_v48 = vmul.f32 %v3322_v0, %v3322_v0 }
 0x240   : > { %v3370_v17 = vadd.f32 %v3369_v31, %v3339_v54  ;;  %v3325_v14 = vsub.f32 %v5844_v56, %v5906_v12  ;;  %v3355_v47 = vmul.f32 %v3323_v16, %v3323_v16  ;;  %v3326_v4 = vsub.f32 %v5859_v62, %v5906_v12 }
 0x241   : > { %v3356_v54 = vmul.f32 %v3324_v11, %v3324_v11  ;;  %v3327_v38 = vsub.f32 %v5870_v21, %v5906_v12  ;;  %v3328_v30 = vsub.f32 %v5863_v9, %v5906_v12  ;;  %v3329_v56 = vsub.f32 %v5866_v10, %v5906_v12 }
 0x242   : > { %v3371_v6 = vadd.f32 %v3370_v17, %v3340_v28  ;;  %v3357_v27 = vmul.f32 %v3325_v14, %v3325_v14  ;;  %v3358_v17 = vmul.f32 %v3326_v4, %v3326_v4  ;;  %v3330_v62 = vsub.f32 %v5881_v29, %v5906_v12 }
 0x243   : > { %v3360_v35 = vmul.f32 %v3328_v30, %v3328_v30  ;;  %v3331_v21 = vsub.f32 %v5892_v37, %v5906_v12  ;;  %v3332_v9 = vsub.f32 %v5885_v45, %v5906_v12  ;;  %v3333_v10 = vsub.f32 %v5888_v36, %v5906_v12 }
 0x244   : > { %v3372_v40 = vadd.f32 %v3371_v6, %v3341_v20  ;;  %v3359_v20 = vmul.f32 %v3327_v38, %v3327_v38 }
 0x245   : > { %v3363_v34 = vmul.f32 %v3331_v21, %v3331_v21  ;;  %v3365_v25 = vmul.f32 %v3333_v10, %v3333_v10 }
 0x246   : > { %v3373_v39 = vadd.f32 %v3372_v40, %v3342_v44  ;;  %v3361_v40 = vmul.f32 %v3329_v56, %v3329_v56 }
 0x248   : > { %v3374_v57 = vadd.f32 %v3373_v39, %v3343_v26  ;;  %v3362_v26 = vmul.f32 %v3330_v62, %v3330_v62 }
 0x24a   : > { %v3375_v60 = vadd.f32 %v3374_v57, %v3344_v52  ;;  %v3364_v57 = vmul.f32 %v3332_v9, %v3332_v9 }
 0x24c   : > { %v3376_v33 = vadd.f32 %v3375_v60, %v3345_v58 }
 0x24e   : > { %v3377_v46 = vadd.f32 %v3376_v33, %v3346_v19 }
 0x250   : > { %v3378_v15 = vadd.f32 %v3377_v46, %v3347_v61 }
 0x252   : > { %v3379_v2 = vadd.f32 %v3378_v15, %v3348_v63 }
 0x254   : > { %v3380_v24 = vadd.f32 %v3379_v2, %v3349_v41 }
 0x256   : > { %v3381_v5 = vadd.f32 %v3380_v24, %v3350_v23 }
 0x258   : > { %v3382_v49 = vadd.f32 %v3381_v5, %v3351_v32 }
 0x25a   : > { %v3383_v51 = vadd.f32 %v3382_v49, %v3352_v55 }
 0x25c   : > { %v3384_v1 = vadd.f32 %v3383_v51, %v3353_v53 }
 0x25e   : > { %v3385_v42 = vadd.f32 %v3384_v1, %v3354_v48 }
 0x260   : > { %v3386_v31 = vadd.f32 %v3385_v42, %v3355_v47 }
 0x262   : > { %v3387_v28 = vadd.f32 %v3386_v31, %v3356_v54 }
 0x264   : > { %v3388_v13 = vadd.f32 %v3387_v28, %v3357_v27 }
 0x266   : > { %v3389_v6 = vadd.f32 %v3388_v13, %v3358_v17 }
 0x268   : > { %v3390_v44 = vadd.f32 %v3389_v6, %v3359_v20 }
 0x26a   : > { %v3391_v50 = vadd.f32 %v3390_v44, %v3360_v35 }
 0x26c   : > { %v3392_v39 = vadd.f32 %v3391_v50, %v3361_v40 }
 0x26e   : > { %v3393_v52 = vadd.f32 %v3392_v39, %v3362_v26 }
 0x270   : > { %v3394_v29 = vadd.f32 %v3393_v52, %v3363_v34 }
 0x272   : > { %v3395_v58 = vadd.f32 %v3394_v29, %v3364_v57 }
 0x274   : > { %v3396_v60 = vadd.f32 %v3395_v58, %v3365_v25 }
 0x276   : > { %v3397_v3 = vrot.slane %v3396_v60, 4 }
 0x278   : > { %v3398_v37 = vadd.f32 %v3397_v3, %v3396_v60 }
 0x27a   : > { %v3399_v19 = vrot.slane %v3398_v37, 2 }
 0x27c   : > { %v3400_v33 = vadd.f32 %v3399_v19, %v3398_v37 }
 0x27e   : > { %v3401_v7 = vrot.slane %v3400_v33, 1 }
 0x280   : > { %v3402_v45 = vadd.f32 %v3401_v7, %v3400_v33 }
 0x282   : > { %v3404_v36 = vsel %vm3403_vm1, %v5903_v59, %v3402_v45 }
 0x283   : > { %3405 = vst [vmem:[%s241_s13] sm:$0x3] %v3404_v36 }
 0x284 PF: > { %s15_s17 = sadd.s32 1, %s5157_s17   ;;  %s5991_s15 = smov %s5153_s16 }
 0x285   : > { %p12_p5 = scmp.ge.s32.totalorder %s15_s17, 4   ;;  %s5992_s16 = smov %s5994_s18 }
 0x287   :  { %14 = sbr.rel (!%p12_p5) target bundleno = 2 (0x2), region = 90 }

// kernel: double_conv.4
= control target key start
LH: loop header
LB: loop body
LE: loop exit
PB: predicated region body
PF: predicated region fallthrough
CT: control target
= control target key end

     0   :  { %s5472_s21 = smov 0   ;;  %s5474_s22 = smov 0   ;;  %s6469_s0 = inlined_call_operand.vmem [shape: bf16[2,16,16,128], index: 0, kind: input, shape index: {}]   ;;  %s6470_s1 = inlined_call_operand.vmem [shape: f32[1,128], index: 1, kind: input, shape index: {}]   ;;  %s6471_s2 = inlined_call_operand.vmem [shape: f32[1,128], index: 2, kind: input, shape index: {}]   ;;  %s6472_s3 = inlined_call_operand.vmem [shape: bf16[9,128,128], index: 3, kind: input, shape index: {}]   ;;  %s6473_s4 = inlined_call_operand.vmem [shape: f32[1,128], index: 4, kind: input, shape index: {}]   ;;  %s6474_s5 = inlined_call_operand.vmem [shape: bf16[2,16,16,128], index: 5, kind: output, shape index: {0}]   ;;  %s6475_s6 = inlined_call_operand.vmem [shape: f32[2,1,2,128], index: 6, kind: output, shape index: {1}]  }
   0x1   :  { %s5476_s23 = smov 0  }
   0x2 LB: > { %s29_s24 = sadd.s32 1, %s5430_s22  ;;  %p3743_p0 = scmp.ge.s32.totalorder %s5434_s23, 1  ;;  %s5434_s23 = sphi %s5476_s23, %s17_s23   ;;  %s5430_s22 = sphi %s5474_s22, %s6477_s22   ;;  %s5426_s21 = sphi %s5472_s21, %s6476_s21  }
   0x3   : > { %p31_p1 = scmp.ge.s32.totalorder %s29_s24, 2  ;;  %p231_p2 = scmp.lt.s32.totalorder %s5434_s23, 3 }
   0x5   : > { %s6479_s24 = smov (%p31_p1, %s29_s24), 0  ;;  %p232_p3 = pnand %p3743_p0, %p231_p2 }
   0x6   : > { %v5331_v0 = vld [vmem:[%s6472_s3 + $0x40] sm:$0xff] (!%p232_p3)   ;;  %v5436_v2 = vmov (!%p232_p3), 0.0   ;;  %v5333_v3 = vld [vmem:[%s6472_s3 + $0x48] sm:$0xff] (!%p232_p3)   ;;  %p273_p4 = scmp.lt.s32.totalorder (!%p232_p3), %s5426_s21, 1  ;;  %v5335_v5 = vld [vmem:[%s6472_s3 + $0x50] sm:$0xff] (!%p232_p3)   ;;  %vm3598_vm0 = vcmask (!%p232_p3), 1040384  }
   0x7   : > { %235 = sbr.rel (%p232_p3) target bundleno = 639 (0x27f), region = 40  ;;  %v5332_v1 = vld [vmem:[%s6472_s3 + $0x100] sm:$0xff] (!%p232_p3)   ;;  %301 = vst [vmem:[#allocation2] sm:$0xff] (!%p232_p3), %v5436_v2  ;;  %302 = vst [vmem:[#allocation2 + $0x8] sm:$0xff] (!%p232_p3), %v5436_v2  ;;  %4602 = vmatprep.subr.bf16.mxu1 (!%p232_p3), %v5331_v0  ;;  %v5334_v4 = vld [vmem:[%s6472_s3 + $0x108] sm:$0xff] (!%p232_p3)  }
   0x8   : > { %303 = vst [vmem:[#allocation2 + $0x10] sm:$0x3] (!%p232_p3), %v5436_v2  ;;  %304 = vst [vmem:[#allocation2 + $0x18] sm:$0xff] (!%p232_p3), %v5436_v2  ;;  %4794 = vmatprep.subr.bf16.mxu0 (!%p232_p3), %v5332_v1  ;;  %4603 = vmatpush3.bf16.msra.mxu1 (!%p232_p3), %v5331_v0  ;;  %v5336_v6 = vld [vmem:[%s6472_s3 + $0x110] sm:$0xff] (!%p232_p3)   ;;  %v5337_v7 = vld [vmem:[%s6472_s3 + $0x58] sm:$0xff] (!%p232_p3)  }
   0x9   : > { %305 = vst [vmem:[#allocation2 + $0x20] sm:$0xff] (!%p232_p3), %v5436_v2  ;;  %306 = vst [vmem:[#allocation2 + $0x28] sm:$0x3] (!%p232_p3), %v5436_v2  ;;  %4795 = vmatpush3.bf16.msra.mxu0 (!%p232_p3), %v5332_v1  ;;  %4604 = vmatprep.subr.bf16.mxu1 (!%p232_p3), %v5333_v3  ;;  %v5338_v8 = vld [vmem:[%s6472_s3 + $0x118] sm:$0xff] (!%p232_p3)   ;;  %v5339_v9 = vld [vmem:[%s6472_s3 + $0x60] sm:$0xff] (!%p232_p3)  }
   0xa   : > { %307 = vst [vmem:[#allocation2 + $0x30] sm:$0xff] (!%p232_p3), %v5436_v2  ;;  %308 = vst [vmem:[#allocation2 + $0x38] sm:$0xff] (!%p232_p3), %v5436_v2  ;;  %4796 = vmatprep.subr.bf16.mxu0 (!%p232_p3), %v5334_v4  ;;  %v5340_v10 = vld [vmem:[%s6472_s3 + $0x120] sm:$0xff] (!%p232_p3)   ;;  %v5341_v11 = vld [vmem:[%s6472_s3 + $0x68] sm:$0xff] (!%p232_p3)  }
   0xb   : > { %309 = vst [vmem:[#allocation2 + $0x40] sm:$0x3] (!%p232_p3), %v5436_v2  ;;  %310 = vst [vmem:[#allocation2 + $0x48] sm:$0xff] (!%p232_p3), %v5436_v2  ;;  %v5342_v15 = vld [vmem:[%s6472_s3 + $0x128] sm:$0xff] (!%p232_p3)   ;;  %v5544_v19 = vld [vmem:[%s6470_s1] ss:$0 sm:$0xff] (!%p232_p3) }
   0xc   : > { %311 = vst [vmem:[#allocation2 + $0x50] sm:$0xff] (!%p232_p3), %v5436_v2  ;;  %312 = vst [vmem:[#allocation2 + $0x58] sm:$0x3] (!%p232_p3), %v5436_v2  ;;  %4605 = vmatpush3.bf16.msra.mxu1 (!%p232_p3), %v5333_v3  ;;  %v5549_v20 = vld [vmem:[%s6471_s2] ss:$0 sm:$0xff] (!%p232_p3)  ;;  %v5343_v22 = vld [vmem:[%s6472_s3 + $0x70] sm:$0xff] (!%p232_p3)  }
   0xd   : > { %313 = vst [vmem:[#allocation2 + $0x60] sm:$0xff] (!%p232_p3), %v5436_v2  ;;  %314 = vst [vmem:[#allocation2 + $0x68] sm:$0xff] (!%p232_p3), %v5436_v2  ;;  %4797 = vmatpush3.bf16.msra.mxu0 (!%p232_p3), %v5334_v4  ;;  %4606 = vmatprep.subr.bf16.mxu1 (!%p232_p3), %v5335_v5  ;;  %v5344_v27 = vld [vmem:[%s6472_s3 + $0x130] sm:$0xff] (!%p232_p3)   ;;  %v5345_v36 = vld [vmem:[%s6472_s3 + $0x78] sm:$0xff] (!%p232_p3)  }
   0xe   : > { %315 = vst [vmem:[#allocation2 + $0x70] sm:$0x3] %v5436_v2  ;;  %316 = vst [vmem:[#allocation2 + $0x78] sm:$0xff] %v5436_v2  ;;  %s6481_s21 = smov (!%p273_p4, %s5426_s21), 1  ;;  %4798 = vmatprep.subr.bf16.mxu0 %v5336_v6  ;;  %v629_v12 = vld [vmem:[#allocation2 + $0x1] sm:$0xff]  ;;  %v5346_v37 = vld [vmem:[%s6472_s3 + $0x138] sm:$0xff]  }
   0xf   : > { %317 = vst [vmem:[#allocation2 + $0x80] sm:$0xff] %v5436_v2  ;;  %318 = vst [vmem:[#allocation2 + $0x88] sm:$0x3] %v5436_v2  ;;  %s4178_s17 = sshll.u32 %s6481_s21, 7  ;;  %v630_v13 = vld [vmem:[#allocation2 + $0x9] sm:$0xff]  ;;  %v5347_v59 = vld [vmem:[%s6472_s3] sm:$0xff]  }
  0x10   : > { %319 = vst [vmem:[#allocation2 + $0x90] sm:$0xff] %v5436_v2  ;;  %320 = vst [vmem:[#allocation2 + $0x98] sm:$0xff] %v5436_v2  ;;  %4607 = vmatpush3.bf16.msra.mxu1 %v5335_v5  ;;  %s5532_s28 = scalar_lea.vmem %s6469_s0, %s4178_s17  ;;  %v661_v16 = vpack.c.bf16 %v630_v13, %v629_v12  ;;  %v5348_v1 = vld [vmem:[%s6472_s3 + $0x140] sm:$0xff]   ;;  %s6213_s27 = scalar_lea.vmem %s6474_s5, %s4178_s17 }
  0x11   : > { %321 = vst [vmem:[#allocation2 + $0xa0] sm:$0x3] %v5436_v2  ;;  %322 = vst [vmem:[#allocation2 + $0xa8] sm:$0xff] %v5436_v2  ;;  %4799 = vmatpush3.bf16.msra.mxu0 %v5336_v6  ;;  %4608 = vmatprep.subr.bf16.mxu1 %v5337_v7  ;;  %v4213_v14 = vld [vmem:[%s5532_s28] sm:$0xff]   ;;  %v4356_v21 = vld [vmem:[%s5532_s28 + $0x8] sm:$0xff]   ;;  %s3748_s17 = sshll.u32 %s6481_s21, 1 }
  0x12   : > { %323 = vst [vmem:[#allocation2 + $0xb0] sm:$0xff] %v5436_v2  ;;  %324 = vst [vmem:[#allocation2 + $0xb8] sm:$0x3] %v5436_v2  ;;  %4800 = vmatprep.subr.bf16.mxu0 %v5338_v8  ;;  %v4214_v17 = vunpack.c.l.bf16 %v4213_v14  ;;  %v4215_v18 = vunpack.c.h.bf16 %v4213_v14  ;;  %4618 = vmatprep.mubr.bf16.mxu1 %v661_v16  ;;  %v4218_v25 = vunpack.c.l.bf16 %v4356_v21  ;;  %v4219_v26 = vunpack.c.h.bf16 %v4356_v21  ;;  %v4357_v32 = vld [vmem:[%s5532_s28 + $0x10] sm:$0xff]   ;;  %v4358_v35 = vld [vmem:[%s5532_s28 + $0x18] sm:$0xff]   ;;  %s295_s30 = scalar_lea.vmem %s6475_s6, %s3748_s17 }
  0x13   : > { %325 = vst [vmem:[#allocation2 + $0xc0] sm:$0xff] %v5436_v2  ;;  %326 = vst [vmem:[#allocation2 + $0xc8] sm:$0xff] %v5436_v2  ;;  %v4222_v33 = vunpack.c.l.bf16 %v4357_v32  ;;  %v4223_v34 = vunpack.c.h.bf16 %v4357_v32  ;;  %v4226_v44 = vunpack.c.l.bf16 %v4358_v35  ;;  %v4227_v45 = vunpack.c.h.bf16 %v4358_v35  ;;  %v4359_v46 = vld [vmem:[%s5532_s28 + $0x20] sm:$0xff]   ;;  %v4360_v55 = vld [vmem:[%s5532_s28 + $0x28] sm:$0xff]  }
  0x14   : > { %327 = vst [vmem:[#allocation2 + $0xd0] sm:$0x3] %v5436_v2  ;;  %328 = vst [vmem:[#allocation2 + $0xd8] sm:$0xff] %v5436_v2  ;;  %4609 = vmatpush3.bf16.msra.mxu1 %v5337_v7  ;;  %v426_v23 = vmul.f32 %v4214_v17, %v5544_v19  ;;  %v427_v24 = vmul.f32 %v4215_v18, %v5544_v19  ;;  %v428_v30 = vmul.f32 %v4218_v25, %v5544_v19  ;;  %v4361_v0 = vld [vmem:[%s5532_s28 + $0x30] sm:$0xff]   ;;  %v5349_v21 = vld [vmem:[%s6472_s3 + $0x148] sm:$0xff]  }
  0x15   : > { %329 = vst [vmem:[#allocation2 + $0xe0] sm:$0xff] %v5436_v2  ;;  %330 = vst [vmem:[#allocation2 + $0xe8] sm:$0x3] %v5436_v2  ;;  %4801 = vmatpush3.bf16.msra.mxu0 %v5338_v8  ;;  %4610 = vmatprep.subr.bf16.mxu1 %v5339_v9  ;;  %v429_v31 = vmul.f32 %v4219_v26, %v5544_v19  ;;  %v430_v42 = vmul.f32 %v4222_v33, %v5544_v19  ;;  %v4230_v50 = vunpack.c.l.bf16 %v4359_v46  ;;  %v4363_v26 = vld [vmem:[%s5532_s28 + $0x40] sm:$0xff]  }
  0x16   : > { %331 = vst [vmem:[#allocation2 + $0xf0] sm:$0xff] %v5436_v2  ;;  %332 = vst [vmem:[#allocation2 + $0xf8] sm:$0xff] %v5436_v2  ;;  %4802 = vmatprep.subr.bf16.mxu0 %v5340_v10  ;;  %v465_v28 = vadd.f32 %v5549_v20, %v426_v23  ;;  %v466_v29 = vadd.f32 %v5549_v20, %v427_v24  ;;  %v467_v40 = vadd.f32 %v5549_v20, %v428_v30 }
  0x17   : > { %333 = vst [vmem:[#allocation2 + $0x100] sm:$0x3] %v5436_v2  ;;  %334 = vst [vmem:[#allocation2 + $0x108] sm:$0xff] %v5436_v2  ;;  %v468_v41 = vadd.f32 %v5549_v20, %v429_v31  ;;  %v431_v43 = vmul.f32 %v4223_v34, %v5544_v19  ;;  %v469_v51 = vadd.f32 %v5549_v20, %v430_v42  ;;  %v4231_v56 = vunpack.c.h.bf16 %v4359_v46  ;;  %v5353_v34 = vld [vmem:[%s6472_s3 + $0x10] sm:$0xff]  }
  0x18   : > { %335 = vst [vmem:[#allocation2 + $0x110] sm:$0xff] %v5436_v2  ;;  %336 = vst [vmem:[#allocation2 + $0x118] sm:$0x3] %v5436_v2  ;;  %4611 = vmatpush3.bf16.msra.mxu1 %v5339_v9  ;;  %v497_v38 = vmax.f32 %v465_v28, 0.0  ;;  %v498_v39 = vmax.f32 %v466_v29, 0.0  ;;  %v499_v48 = vmax.f32 %v467_v40, 0.0  ;;  %v432_v53 = vmul.f32 %v4226_v44, %v5544_v19 }
  0x19   : > { %337 = vst [vmem:[#allocation2 + $0x120] sm:$0xff] %v5436_v2  ;;  %338 = vst [vmem:[#allocation2 + $0x128] sm:$0xff] %v5436_v2  ;;  %4803 = vmatpush3.bf16.msra.mxu0 %v5340_v10  ;;  %4612 = vmatprep.subr.bf16.mxu1 %v5341_v11  ;;  %v500_v49 = vmax.f32 %v468_v41, 0.0  ;;  %v470_v52 = vadd.f32 %v5549_v20, %v431_v43  ;;  %v433_v54 = vmul.f32 %v4227_v45, %v5544_v19  ;;  %v4362_v10 = vld [vmem:[%s5532_s28 + $0x38] sm:$0xff]   ;;  %v5351_v40 = vld [vmem:[%s6472_s3 + $0x150] sm:$0xff]  }
  0x1a   : > { %339 = vst [vmem:[#allocation2 + $0x130] sm:$0x3] %v5436_v2  ;;  %340 = vst [vmem:[#allocation2 + $0x138] sm:$0xff] %v5436_v2  ;;  %4804 = vmatprep.subr.bf16.mxu0 %v5342_v15  ;;  %v1759_v47 = vpack.c.bf16 %v498_v39, %v497_v38  ;;  %v434_v57 = vmul.f32 %v4230_v50, %v5544_v19  ;;  %v4234_v58 = vunpack.c.l.bf16 %v4360_v55  ;;  %v501_v60 = vmax.f32 %v469_v51, 0.0  ;;  %v4365_v44 = vld [vmem:[%s5532_s28 + $0x50] sm:$0xff]  }
  0x1b   : > { %341 = vst [vmem:[#allocation2 + $0x140] sm:$0xff] %v5436_v2  ;;  %342 = vst [vmem:[#allocation2 + $0x148] sm:$0x3] %v5436_v2  ;;  %v502_v61 = vmax.f32 %v470_v52, 0.0  ;;  %v5587_v62 = vadd.f32 %v5549_v20, %v432_v53  ;;  %v5590_v63 = vadd.f32 %v5549_v20, %v433_v54  ;;  %v4235_v4 = vunpack.c.h.bf16 %v4360_v55  ;;  %v5352_v53 = vld [vmem:[%s6472_s3 + $0x158] sm:$0xff]  }
  0x1c   : > { %343 = vst [vmem:[#allocation2 + $0x150] sm:$0xff] %v5436_v2  ;;  %344 = vst [vmem:[#allocation2 + $0x158] sm:$0xff] %v5436_v2  ;;  %4613 = vmatpush3.bf16.msra.mxu1 %v5341_v11  ;;  %4810 = vmatprep.mubr.bf16.mxu0 %v1759_v47  ;;  %v5598_v3 = vadd.f32 %v5549_v20, %v434_v57  ;;  %v436_v5 = vmul.f32 %v4234_v58, %v5544_v19  ;;  %v4238_v9 = vunpack.c.l.bf16 %v4361_v0  ;;  %v4366_v57 = vld [vmem:[%s5532_s28 + $0x58] sm:$0xff]  }
  0x1d   : > { %345 = vst [vmem:[#allocation2 + $0x160] sm:$0x3] %v5436_v2  ;;  %346 = vst [vmem:[#allocation2 + $0x168] sm:$0xff] %v5436_v2  ;;  %4805 = vmatpush3.bf16.msra.mxu0 %v5342_v15  ;;  %4614 = vmatprep.subr.bf16.mxu1 %v5343_v22  ;;  %v1760_v6 = vpack.c.bf16 %v500_v49, %v499_v48  ;;  %v503_v7 = vmax.f32 %v5587_v62, 0.0  ;;  %v504_v8 = vmax.f32 %v5590_v63, 0.0  ;;  %v4239_v16 = vunpack.c.h.bf16 %v4361_v0  ;;  %v5356_v62 = vld [vmem:[%s6472_s3 + $0x18] sm:$0xff]  }
  0x1e   : > { %347 = vst [vmem:[#allocation2 + $0x170] sm:$0xff] %v5436_v2  ;;  %348 = vst [vmem:[#allocation2 + $0x178] sm:$0x3] %v5436_v2  ;;  %4806 = vmatprep.subr.bf16.mxu0 %v5344_v27  ;;  %v505_v12 = vmax.f32 %v5598_v3, 0.0  ;;  %v437_v13 = vmul.f32 %v4235_v4, %v5544_v19  ;;  %v5608_v14 = vadd.f32 %v5549_v20, %v436_v5  ;;  %v4242_v18 = vunpack.c.l.bf16 %v4362_v10 }
  0x1f   : > { %349 = vst [vmem:[#allocation2 + $0x180] sm:$0xff] %v5436_v2  ;;  %350 = vst [vmem:[#allocation2 + $0x188] sm:$0xff] %v5436_v2  ;;  %v5610_v15 = vpack.c.bf16 %v502_v61, %v501_v60  ;;  %v438_v17 = vmul.f32 %v4238_v9, %v5544_v19  ;;  %v4243_v25 = vunpack.c.h.bf16 %v4362_v10  ;;  %v439_v28 = vmul.f32 %v4239_v16, %v5544_v19 }
  0x20   : > { %351 = vst [vmem:[#allocation2 + $0x190] sm:$0x3] %v5436_v2  ;;  %352 = vst [vmem:[#allocation2 + $0x198] sm:$0xff] %v5436_v2  ;;  %4615 = vmatpush3.bf16.msra.mxu1 %v5343_v22  ;;  %v5617_v23 = vadd.f32 %v5549_v20, %v437_v13  ;;  %v507_v24 = vmax.f32 %v5608_v14, 0.0  ;;  %v440_v30 = vmul.f32 %v4242_v18, %v5544_v19  ;;  %v4246_v33 = vunpack.c.l.bf16 %v4363_v26  ;;  %v4368_v13 = vld [vmem:[%s5532_s28 + $0x68] sm:$0xff]  }
  0x21   : > { %353 = vst [vmem:[#allocation2 + $0x1a0] sm:$0xff] %v5436_v2  ;;  %354 = vst [vmem:[#allocation2 + $0x1a8] sm:$0x3] %v5436_v2  ;;  %4807 = vmatpush3.bf16.msra.mxu0 %v5344_v27  ;;  %4616 = vmatprep.subr.bf16.mxu1 %v5345_v36  ;;  %v435_v2 = vmul.f32 %v4231_v56, %v5544_v19  ;;  %v5350_v27 = vld [vmem:[%s6472_s3 + $0x8] sm:$0xff]   ;;  %v5626_v29 = vadd.f32 %v5549_v20, %v438_v17  ;;  %v4254_v56 = vunpack.c.l.bf16 %v4365_v44 }
  0x22   : > { %530 = vst [vmem:[#allocation2 + $0x19] sm:$0xff] %v497_v38  ;;  %531 = vst [vmem:[#allocation2 + $0x21] sm:$0xff] %v498_v39  ;;  %4808 = vmatprep.subr.bf16.mxu0 %v5346_v37  ;;  %v508_v31 = vmax.f32 %v5617_v23, 0.0  ;;  %v441_v32 = vmul.f32 %v4243_v25, %v5544_v19  ;;  %v5637_v35 = vadd.f32 %v5549_v20, %v439_v28  ;;  %v4247_v38 = vunpack.c.h.bf16 %v4363_v26  ;;  %v4364_v39 = vld [vmem:[%s5532_s28 + $0x48] sm:$0xff]  }
  0x23   : > { %532 = vst [vmem:[#allocation2 + $0x31] sm:$0xff] %v499_v48  ;;  %533 = vst [vmem:[#allocation2 + $0x39] sm:$0xff] %v500_v49  ;;  %v474_v11 = vadd.f32 %v5549_v20, %v435_v2  ;;  %v442_v42 = vmul.f32 %v4246_v33, %v5544_v19  ;;  %v4250_v43 = vunpack.c.l.bf16 %v4364_v39  ;;  %v1762_v45 = vpack.c.bf16 %v504_v8, %v503_v7 }
  0x24   : > { %534 = vst [vmem:[#allocation2 + $0x49] sm:$0xff] %v501_v60  ;;  %535 = vst [vmem:[#allocation2 + $0x51] sm:$0xff] %v502_v61  ;;  %4617 = vmatpush3.bf16.msra.mxu1 %v5345_v36  ;;  %v509_v36 = vmax.f32 %v5626_v29, 0.0  ;;  %v5651_v41 = vadd.f32 %v5549_v20, %v441_v32  ;;  %v510_v46 = vmax.f32 %v5637_v35, 0.0  ;;  %v443_v48 = vmul.f32 %v4247_v38, %v5544_v19  ;;  %v4367_v61 = vld [vmem:[%s5532_s28 + $0x60] sm:$0xff]   ;;  %v4369_v29 = vld [vmem:[%s5532_s28 + $0x70] sm:$0xff]  }
  0x25   : > { %4809 = vmatpush3.bf16.msra.mxu0 %v5346_v37  ;;  %4650 = vmatprep.subr.bf16.mxu1 %v5347_v59  ;;  %536 = vst [vmem:[#allocation2 + $0x61] sm:$0xff] %v503_v7  ;;  %537 = vst [vmem:[#allocation2 + $0x69] sm:$0xff] %v504_v8  ;;  %v506_v22 = vmax.f32 %v474_v11, 0.0  ;;  %v5641_v37 = vadd.f32 %v5549_v20, %v440_v30  ;;  %v5662_v50 = vadd.f32 %v5549_v20, %v442_v42  ;;  %v5355_v30 = vld [vmem:[%s6472_s3 + $0x168] sm:$0xff]  }
  0x26   : > { %4842 = vmatprep.subr.bf16.mxu0 %v5348_v1  ;;  %538 = vst [vmem:[#allocation2 + $0x79] sm:$0xff] %v505_v12  ;;  %540 = vst [vmem:[#allocation2 + $0x91] sm:$0xff] %v507_v24  ;;  %v512_v49 = vmax.f32 %v5651_v41, 0.0  ;;  %v4251_v51 = vunpack.c.h.bf16 %v4364_v39  ;;  %v444_v52 = vmul.f32 %v4250_v43, %v5544_v19  ;;  %v5671_v55 = vadd.f32 %v5549_v20, %v443_v48  ;;  %v5357_v43 = vld [vmem:[%s6472_s3 + $0x170] sm:$0xff]  }
  0x27   : > { %4619 = vmatmul.mubr.bf16.vlgmr.msra.gmra.mrb[0].mxu1 %v1759_v47  ;;  %539 = vst [vmem:[#allocation2 + $0x81] sm:$0xff] %v506_v22  ;;  %541 = vst [vmem:[#allocation2 + $0x99] sm:$0xff] %v508_v31  ;;  %v511_v47 = vmax.f32 %v5641_v37, 0.0  ;;  %v1763_v54 = vpack.c.bf16 %v506_v22, %v505_v12  ;;  %v513_v58 = vmax.f32 %v5662_v50, 0.0  ;;  %v4255_v0 = vunpack.c.h.bf16 %v4365_v44  ;;  %v5358_v37 = vld [vmem:[%s6472_s3 + $0x178] sm:$0xff]  }
  0x28   : > { %4811 = vmatmul.mubr.bf16.vlgmr.msra.gmra.mrb[0].mxu0 %v1760_v6  ;;  %4651 = vmatpush3.bf16.msra.mxu1 %v5347_v59  ;;  %542 = vst [vmem:[#allocation2 + $0xa9] sm:$0xff] %v509_v36  ;;  %543 = vst [vmem:[#allocation2 + $0xb1] sm:$0xff] %v510_v46  ;;  %v445_v59 = vmul.f32 %v4251_v51, %v5544_v19  ;;  %v5679_v60 = vadd.f32 %v5549_v20, %v444_v52  ;;  %v514_v63 = vmax.f32 %v5671_v55, 0.0 }
  0x29   : > { %4843 = vmatpush3.bf16.msra.mxu0 %v5348_v1  ;;  %4622 = vmatprep.mubr.bf16.mxu1 %v1760_v6  ;;  %544 = vst [vmem:[#allocation2 + $0xc1] sm:$0xff] %v511_v47  ;;  %545 = vst [vmem:[#allocation2 + $0xc9] sm:$0xff] %v512_v49  ;;  %v446_v1 = vmul.f32 %v4254_v56, %v5544_v19  ;;  %v4258_v4 = vunpack.c.l.bf16 %v4366_v57  ;;  %v4259_v5 = vunpack.c.h.bf16 %v4366_v57  ;;  %v5354_v6 = vld [vmem:[%s6472_s3 + $0x160] sm:$0xff]   ;;  %v4262_v9 = vunpack.c.l.bf16 %v4367_v61 }
  0x2a   : > { %4844 = vmatprep.subr.bf16.mxu0 %v5349_v21  ;;  %4814 = vmatprep.mubr.bf16.mxu0 %v5610_v15  ;;  %546 = vst [vmem:[#allocation2 + $0xd9] sm:$0xff] %v513_v58  ;;  %v5691_v2 = vadd.f32 %v5549_v20, %v445_v59  ;;  %v515_v3 = vmax.f32 %v5679_v60, 0.0  ;;  %547 = vst [vmem:[#allocation2 + $0xe1] sm:$0xff] %v514_v63  ;;  %v447_v7 = vmul.f32 %v4255_v0, %v5544_v19  ;;  %v3919_v44 = vld [vmem:[#allocation2 + $0x1a] sm:$0xff]  ;;  %v3920_v48 = vld [vmem:[#allocation2 + $0x22] sm:$0xff] }
  0x2b   : > { %4652 = vmatprep.subr.bf16.mxu1 %v5350_v27  ;;  %v5701_v8 = vadd.f32 %v5549_v20, %v446_v1  ;;  %v448_v11 = vmul.f32 %v4258_v4, %v5544_v19  ;;  %v449_v12 = vmul.f32 %v4259_v5, %v5544_v19  ;;  %v4263_v18 = vunpack.c.h.bf16 %v4367_v61  ;;  %v3921_v1 = vld [vmem:[#allocation2 + $0x32] sm:$0xff]  ;;  %v3922_v4 = vld [vmem:[#allocation2 + $0x3a] sm:$0xff] }
  0x2c   : > { %4653 = vmatpush3.bf16.msra.mxu1 %v5350_v27  ;;  %v516_v10 = vmax.f32 %v5691_v2, 0.0  ;;  %548 = vst [vmem:[#allocation2 + $0xf1] sm:$0xff] %v515_v3  ;;  %v5713_v16 = vadd.f32 %v5549_v20, %v447_v7  ;;  %v1764_v22 = vpack.c.bf16 %v508_v31, %v507_v24  ;;  %v1765_v25 = vpack.c.bf16 %v510_v46, %v509_v36  ;;  %v5360_v5 = vld [vmem:[%s6472_s3 + $0x180] sm:$0xff]   ;;  %v3924_v7 = vld [vmem:[#allocation2 + $0x52] sm:$0xff] }
  0x2d   : > { %4845 = vmatpush3.bf16.msra.mxu0 %v5349_v21  ;;  %4654 = vmatprep.subr.bf16.mxu1 %v5353_v34  ;;  %v517_v17 = vmax.f32 %v5701_v8, 0.0  ;;  %v450_v21 = vmul.f32 %v4262_v9, %v5544_v19  ;;  %v5726_v26 = vadd.f32 %v5549_v20, %v448_v11  ;;  %v5729_v27 = vadd.f32 %v5549_v20, %v449_v12  ;;  %v5819_v11 = vld [vmem:[%s6472_s3 + $0x80] sm:$0xff]   ;;  %v5366_v8 = vld [vmem:[%s6472_s3 + $0x198] sm:$0xff]  }
  0x2e   : > { %4846 = vmatprep.subr.bf16.mxu0 %v5351_v40  ;;  %549 = vst [vmem:[#allocation2 + $0xf9] sm:$0xff] %v516_v10  ;;  %v518_v28 = vmax.f32 %v5713_v16, 0.0  ;;  %v451_v14 = vmul.f32 %v4263_v18, %v5544_v19  ;;  %v4266_v24 = vunpack.c.l.bf16 %v4368_v13  ;;  %v4267_v33 = vunpack.c.h.bf16 %v4368_v13  ;;  %v3925_v2 = vld [vmem:[#allocation2 + $0x62] sm:$0xff]  ;;  %v3929_v16 = vld [vmem:[#allocation2 + $0x92] sm:$0xff] }
  0x2f   : > { %4623 = vmatmul.mubr.bf16.gmra.mrb[4].mxu1 %v5610_v15  ;;  %v5359_v15 = vld [vmem:[%s6472_s3 + $0x20] sm:$0xff]   ;;  %550 = vst [vmem:[#allocation2 + $0x109] sm:$0xff] %v517_v17  ;;  %v5736_v23 = vadd.f32 %v5549_v20, %v450_v21  ;;  %v519_v31 = vmax.f32 %v5726_v26, 0.0  ;;  %v520_v32 = vmax.f32 %v5729_v27, 0.0  ;;  %v4271_v42 = vunpack.c.h.bf16 %v4369_v29  ;;  %v3931_v26 = vld [vmem:[#allocation2 + $0xaa] sm:$0xff]  ;;  %v3932_v27 = vld [vmem:[#allocation2 + $0xb2] sm:$0xff] }
  0x30   : > { %4815 = vmatmul.mubr.bf16.gmra.mrb[4].mxu0 %v1762_v45  ;;  %4626 = vmatprep.mubr.bf16.mxu1 %v1762_v45  ;;  %551 = vst [vmem:[#allocation2 + $0x111] sm:$0xff] %v518_v28  ;;  %v5750_v35 = vadd.f32 %v5549_v20, %v451_v14  ;;  %v452_v38 = vmul.f32 %v4266_v24, %v5544_v19 }
  0x31   : > { %4847 = vmatpush3.bf16.msra.mxu0 %v5351_v40  ;;  %4818 = vmatprep.mubr.bf16.mxu0 %v1763_v54  ;;  %v521_v36 = vmax.f32 %v5736_v23, 0.0  ;;  %552 = vst [vmem:[#allocation2 + $0x121] sm:$0xff] %v519_v31  ;;  %553 = vst [vmem:[#allocation2 + $0x129] sm:$0xff] %v520_v32  ;;  %v453_v39 = vmul.f32 %v4267_v33, %v5544_v19  ;;  %v4270_v40 = vunpack.c.l.bf16 %v4369_v29  ;;  %v3933_v23 = vld [vmem:[#allocation2 + $0xc2] sm:$0xff] }
  0x32   : > { %4848 = vmatprep.subr.bf16.mxu0 %v5352_v53  ;;  %4655 = vmatpush3.bf16.msra.mxu1 %v5353_v34  ;;  %v5361_v34 = vld [vmem:[%s6472_s3 + $0x28] sm:$0xff]   ;;  %v522_v45 = vmax.f32 %v5750_v35, 0.0  ;;  %v5766_v46 = vadd.f32 %v5549_v20, %v452_v38  ;;  %v1766_v57 = vpack.c.bf16 %v512_v49, %v511_v47  ;;  %v5790_v0 = vpack.c.bf16 %v3920_v48, %v3919_v44  ;;  %v5365_v49 = vld [vmem:[%s6472_s3 + $0x38] sm:$0xff]  }
  0x33   : > { %4656 = vmatprep.subr.bf16.mxu1 %v5356_v62  ;;  %554 = vst [vmem:[#allocation2 + $0x139] sm:$0xff] %v521_v36  ;;  %v5769_v51 = vadd.f32 %v5549_v20, %v453_v39  ;;  %v454_v52 = vmul.f32 %v4270_v40, %v5544_v19  ;;  %v670_v9 = vpack.c.bf16 %v514_v63, %v513_v58  ;;  %v5362_v58 = vld [vmem:[%s6472_s3 + $0x188] sm:$0xff]   ;;  %v3935_v35 = vld [vmem:[#allocation2 + $0xda] sm:$0xff] }
  0x34   : > { %555 = vst [vmem:[#allocation2 + $0x141] sm:$0xff] %v522_v45  ;;  %v523_v56 = vmax.f32 %v5766_v46, 0.0  ;;  %v5821_v12 = vpack.c.bf16 %v3922_v4, %v3921_v1  ;;  %v671_v13 = vpack.c.bf16 %v516_v10, %v515_v3  ;;  %v3926_v3 = vld [vmem:[#allocation2 + $0x6a] sm:$0xff]  ;;  %v672_v14 = vpack.c.bf16 %v518_v28, %v517_v17  ;;  %v3930_v17 = vld [vmem:[#allocation2 + $0x9a] sm:$0xff] }
  0x35   : > { %4849 = vmatpush3.bf16.msra.mxu0 %v5352_v53  ;;  %v455_v53 = vmul.f32 %v4271_v42, %v5544_v19  ;;  %v524_v59 = vmax.f32 %v5769_v51, 0.0  ;;  %v5785_v61 = vadd.f32 %v5549_v20, %v454_v52  ;;  %v5368_v28 = vld [vmem:[%s6472_s3 + $0x1a0] sm:$0xff]   ;;  %v5883_v38 = vpack.c.bf16 %v3932_v27, %v3931_v26  ;;  %v5370_v39 = vld [vmem:[%s6472_s3 + $0x1a8] sm:$0xff]   ;;  %v5372_v42 = vld [vmem:[%s6472_s3 + $0x1b0] sm:$0xff]  }
  0x36   : > { %4850 = vmatprep.subr.bf16.mxu0 %v5354_v6  ;;  %4657 = vmatpush3.bf16.msra.mxu1 %v5356_v62  ;;  %556 = vst [vmem:[#allocation2 + $0x151] sm:$0xff] %v523_v56  ;;  %v3934_v40 = vld [vmem:[#allocation2 + $0xca] sm:$0xff]  ;;  %v5374_v51 = vld [vmem:[%s6472_s3 + $0x1b8] sm:$0xff]   ;;  %v5375_v26 = vld [vmem:[%s6472_s3 + $0xa0] sm:$0xff]  }
  0x37   : > { %4627 = vmatmul.mubr.bf16.gmra.mrb[8].mxu1 %v1763_v54  ;;  %4658 = vmatprep.subr.bf16.mxu1 %v5359_v15  ;;  %v5363_v54 = vld [vmem:[%s6472_s3 + $0x30] sm:$0xff]   ;;  %v5788_v62 = vadd.f32 %v5549_v20, %v455_v53  ;;  %557 = vst [vmem:[#allocation2 + $0x159] sm:$0xff] %v524_v59  ;;  %v525_v41 = vmax.f32 %v5785_v61, 0.0  ;;  %v5899_v44 = vpack.c.bf16 %v3934_v40, %v3933_v23  ;;  %v567_v52 = vld [vmem:[#allocation2 + $0x18] sm:$0xff]  ;;  %v568_v53 = vld [vmem:[#allocation2 + $0x20] sm:$0xff] }
  0x38   : > { %4819 = vmatmul.mubr.bf16.gmra.mrb[8].mxu0 %v1764_v22  ;;  %4630 = vmatprep.mubr.bf16.mxu1 %v1764_v22  ;;  %v3927_v22 = vld [vmem:[#allocation2 + $0x7a] sm:$0xff]  ;;  %v3939_v61 = vld [vmem:[#allocation2 + $0x10a] sm:$0xff] }
  0x39   : > { %4851 = vmatpush3.bf16.msra.mxu0 %v5354_v6  ;;  %4822 = vmatprep.mubr.bf16.mxu0 %v1765_v25  ;;  %v526_v47 = vmax.f32 %v5788_v62, 0.0  ;;  %558 = vst [vmem:[#allocation2 + $0x169] sm:$0xff] %v525_v41  ;;  %v3923_v6 = vld [vmem:[#allocation2 + $0x4a] sm:$0xff]  ;;  %v3940_v62 = vld [vmem:[#allocation2 + $0x112] sm:$0xff] }
  0x3a   : > { %4852 = vmatprep.subr.bf16.mxu0 %v5355_v30  ;;  %4659 = vmatpush3.bf16.msra.mxu1 %v5359_v15  ;;  %v4370_v15 = vld [vmem:[%s5532_s28 + $0x78] sm:$0xff]   ;;  %v5828_v18 = vpack.c.bf16 %v3924_v7, %v3923_v6  ;;  %v5923_v1 = vpack.c.bf16 %v3940_v62, %v3939_v61  ;;  %v571_v4 = vld [vmem:[#allocation2 + $0x48] sm:$0xff]  ;;  %v573_v7 = vld [vmem:[#allocation2 + $0x60] sm:$0xff] }
  0x3b   : > { %4660 = vmatprep.subr.bf16.mxu1 %v5361_v34  ;;  %559 = vst [vmem:[#allocation2 + $0x171] sm:$0xff] %v526_v47  ;;  %v4274_v50 = vunpack.c.l.bf16 %v4370_v15  ;;  %v4275_v55 = vunpack.c.h.bf16 %v4370_v15  ;;  %v5369_v6 = vld [vmem:[%s6472_s3 + $0x88] sm:$0xff]   ;;  %v580_v40 = vld [vmem:[#allocation2 + $0xb0] sm:$0xff] }
  0x3c   : > { %v3942_v15 = vld [vmem:[#allocation2 + $0x12a] sm:$0xff] }
  0x3d   : > { %4853 = vmatpush3.bf16.msra.mxu0 %v5355_v30  ;;  %v456_v60 = vmul.f32 %v4274_v50, %v5544_v19  ;;  %v457_v63 = vmul.f32 %v4275_v55, %v5544_v19  ;;  %v5364_v19 = vld [vmem:[%s6472_s3 + $0x190] sm:$0xff]   ;;  %v5853_v30 = vpack.c.bf16 %v3926_v3, %v3925_v2  ;;  %v3943_v50 = vld [vmem:[#allocation2 + $0x13a] sm:$0xff]  ;;  %v579_v23 = vld [vmem:[#allocation2 + $0xa8] sm:$0xff] }
  0x3e   : > { %4854 = vmatprep.subr.bf16.mxu0 %v5357_v43  ;;  %4661 = vmatpush3.bf16.msra.mxu1 %v5361_v34  ;;  %v675_v34 = vpack.c.bf16 %v524_v59, %v523_v56  ;;  %v569_v56 = vld [vmem:[#allocation2 + $0x30] sm:$0xff]  ;;  %v3938_v59 = vld [vmem:[#allocation2 + $0xfa] sm:$0xff] }
  0x3f   : > { %4631 = vmatmul.mubr.bf16.gmra.mrb[12].mxu1 %v1765_v25  ;;  %4662 = vmatprep.subr.bf16.mxu1 %v5363_v54  ;;  %v5839_v10 = vadd.f32 %v5549_v20, %v456_v60  ;;  %v5842_v21 = vadd.f32 %v5549_v20, %v457_v63  ;;  %v3928_v25 = vld [vmem:[#allocation2 + $0x82] sm:$0xff]  ;;  %v673_v20 = vpack.c.bf16 %v520_v32, %v519_v31  ;;  %v5371_v55 = vld [vmem:[%s6472_s3 + $0x90] sm:$0xff]   ;;  %v575_v3 = vld [vmem:[#allocation2 + $0x78] sm:$0xff] }
  0x40   : > { %4823 = vmatmul.mubr.bf16.gmra.mrb[12].mxu0 %v1766_v57  ;;  %4634 = vmatprep.mubr.bf16.mxu1 %v1766_v57  ;;  %v5859_v33 = vpack.c.bf16 %v3928_v25, %v3927_v22  ;;  %v674_v31 = vpack.c.bf16 %v522_v45, %v521_v36  ;;  %v5877_v32 = vpack.c.bf16 %v3930_v17, %v3929_v16  ;;  %v3936_v36 = vld [vmem:[#allocation2 + $0xe2] sm:$0xff]  ;;  %v570_v57 = vld [vmem:[#allocation2 + $0x38] sm:$0xff] }
  0x41   : > { %4855 = vmatpush3.bf16.msra.mxu0 %v5357_v43  ;;  %4858 = vmatprep.mubr.bf16.mxu0 %v5790_v0  ;;  %v527_v24 = vmax.f32 %v5839_v10, 0.0  ;;  %v528_v29 = vmax.f32 %v5842_v21, 0.0  ;;  %v5897_v43 = vpack.c.bf16 %v526_v47, %v525_v41  ;;  %v5403_v45 = vld [vmem:[#allocation2] sm:$0xff]  ;;  %v5903_v48 = vpack.c.bf16 %v3936_v36, %v3935_v35  ;;  %v5373_v25 = vld [vmem:[%s6472_s3 + $0x98] sm:$0xff]  }
  0x42   : > { %4856 = vmatprep.subr.bf16.mxu0 %v5358_v37  ;;  %4663 = vmatpush3.bf16.msra.mxu1 %v5363_v54  ;;  %v5901_v46 = vpack.c.bf16 %v5403_v45, %v5403_v45  ;;  %v3937_v54 = vld [vmem:[#allocation2 + $0xf2] sm:$0xff]  ;;  %v5917_v41 = vpack.c.bf16 %v568_v53, %v567_v52  ;;  %v576_v22 = vld [vmem:[#allocation2 + $0x80] sm:$0xff]  ;;  %v3947_v16 = vld [vmem:[#allocation2 + $0x16a] sm:$0xff]  ;;  %v5979_v53 = vpack.c.bf16 %v580_v40, %v579_v23 }
  0x43   : > { %4664 = vmatprep.subr.bf16.mxu1 %v5365_v49  ;;  %560 = vst [vmem:[#allocation2 + $0x181] sm:$0xff] %v527_v24  ;;  %561 = vst [vmem:[#allocation2 + $0x189] sm:$0xff] %v528_v29  ;;  %v5919_v47 = vpack.c.bf16 %v3938_v59, %v3937_v54  ;;  %v3948_v17 = vld [vmem:[#allocation2 + $0x172] sm:$0xff]  ;;  %v5955_v27 = vpack.c.bf16 %v576_v22, %v575_v3  ;;  %v581_v35 = vld [vmem:[#allocation2 + $0xc0] sm:$0xff]  ;;  %v5973_v36 = vpack.c.bf16 %v528_v29, %v527_v24 }
  0x44   : > { %v5379_v52 = vld [vmem:[%s6472_s3 + $0xb0] sm:$0xff]   ;;  %v5381_v10 = vld [vmem:[%s6472_s3 + $0xb8] sm:$0xff]   ;;  %v584_v24 = vld [vmem:[#allocation2 + $0xe0] sm:$0xff] }
  0x45   : > { %4857 = vmatpush3.bf16.msra.mxu0 %v5358_v37  ;;  %v5915_v37 = vld [vmem:[%s6472_s3 + $0x1c0] sm:$0xff]   ;;  %v583_v21 = vld [vmem:[#allocation2 + $0xd8] sm:$0xff]  ;;  %v585_v29 = vld [vmem:[#allocation2 + $0xf0] sm:$0xff] }
  0x46   : > { %4890 = vmatprep.subr.bf16.mxu0 %v5360_v5  ;;  %4665 = vmatpush3.bf16.msra.mxu1 %v5365_v49  ;;  %v5921_v49 = vpack.c.bf16 %v570_v57, %v569_v56  ;;  %v586_v57 = vld [vmem:[#allocation2 + $0xf8] sm:$0xff]  ;;  %v5992_v59 = vld [vmem:[%s6472_s3 + $0xc0] sm:$0xff]   ;;  %v5994_v61 = vpack.c.bf16 %v584_v24, %v583_v21  ;;  %v593_v3 = vld [vmem:[#allocation2 + $0x150] sm:$0xff] }
  0x47   : > { %4635 = vmatmul.mubr.bf16.gmra.mrb[16].mxu1 %v670_v9  ;;  %4698 = vmatprep.subr.bf16.mxu1 %v5819_v11  ;;  %v574_v9 = vld [vmem:[#allocation2 + $0x68] sm:$0xff]  ;;  %v5996_v62 = vpack.c.bf16 %v586_v57, %v585_v29  ;;  %v594_v22 = vld [vmem:[#allocation2 + $0x158] sm:$0xff]  ;;  %v5395_v24 = vld [vmem:[%s6472_s3 + $0xf0] sm:$0xff]  }
  0x48   : > { %4859 = vmatmul.mubr.bf16.vlgmr.msra.gmra.mrb[0].mxu0 %v5821_v12  ;;  %4638 = vmatprep.mubr.bf16.mxu1 %v671_v13  ;;  %v3941_v13 = vld [vmem:[#allocation2 + $0x122] sm:$0xff]  ;;  %v5941_v2 = vpack.c.bf16 %v574_v9, %v573_v7  ;;  %v4032_v21 = vld [vmem:[#allocation2 + $0x39] sm:$0xff]  ;;  %v4034_v57 = vld [vmem:[#allocation2 + $0x51] sm:$0xff] }
  0x49   : > { %4891 = vmatpush3.bf16.msra.mxu0 %v5360_v5  ;;  %4862 = vmatprep.mubr.bf16.mxu0 %v5828_v18  ;;  %v572_v5 = vld [vmem:[#allocation2 + $0x50] sm:$0xff]  ;;  %v5939_v63 = vpack.c.bf16 %v3942_v15, %v3941_v13  ;;  %v589_v7 = vld [vmem:[#allocation2 + $0x120] sm:$0xff]  ;;  %v590_v9 = vld [vmem:[#allocation2 + $0x128] sm:$0xff] }
  0x4a   : > { %4892 = vmatprep.subr.bf16.mxu0 %v5362_v58  ;;  %v5937_v60 = vpack.c.bf16 %v572_v5, %v571_v4  ;;  %v3950_v45 = vld [vmem:[#allocation2 + $0x18a] sm:$0xff] }
  0x4b   : > { %v5378_v4 = vld [vmem:[%s6472_s3 + $0x1c8] sm:$0xff]   ;;  %v5380_v13 = vld [vmem:[%s6472_s3 + $0x1d0] sm:$0xff]  }
  0x4c   : > { %v587_v5 = vld [vmem:[#allocation2 + $0x108] sm:$0xff] }
  0x4d   : > { %4893 = vmatpush3.bf16.msra.mxu0 %v5362_v58  ;;  %v3944_v58 = vld [vmem:[#allocation2 + $0x142] sm:$0xff] }
  0x4e   : > { %4894 = vmatprep.subr.bf16.mxu0 %v5364_v19 }
  0x4f   : > { %4639 = vmatmul.mubr.bf16.gmra.mrb[20].mxu1 %v672_v14  ;;  %v3945_v14 = vld [vmem:[#allocation2 + $0x152] sm:$0xff] }
  0x50   : > { %4863 = vmatmul.mubr.bf16.gmra.mrb[4].mxu0 %v5853_v30  ;;  %4642 = vmatprep.mubr.bf16.mxu1 %v673_v20  ;;  %v3946_v20 = vld [vmem:[#allocation2 + $0x15a] sm:$0xff] }
  0x51   : > { %4866 = vmatprep.mubr.bf16.mxu0 %v5859_v33  ;;  %4895 = vmatpush3.bf16.msra.mxu0 %v5364_v19  ;;  %v577_v19 = vld [vmem:[#allocation2 + $0x90] sm:$0xff] }
  0x52   : > { %4896 = vmatprep.subr.bf16.mxu0 %v5366_v8 }
  0x55   : > { %4897 = vmatpush3.bf16.msra.mxu0 %v5366_v8  ;;  %v578_v8 = vld [vmem:[#allocation2 + $0x98] sm:$0xff] }
  0x56   : > { %4898 = vmatprep.subr.bf16.mxu0 %v5368_v28 }
  0x57   : > { %4643 = vmatmul.mubr.bf16.gmra.mrb[24].mxu1 %v674_v31  ;;  %v5959_v31 = vpack.c.bf16 %v578_v8, %v577_v19  ;;  %v595_v8 = vld [vmem:[#allocation2 + $0x168] sm:$0xff] }
  0x58   : > { %4867 = vmatmul.mubr.bf16.gmra.mrb[8].mxu0 %v5877_v32  ;;  %4646 = vmatprep.mubr.bf16.mxu1 %v675_v34  ;;  %v5961_v34 = vpack.c.bf16 %v3948_v17, %v3947_v16  ;;  %v596_v16 = vld [vmem:[#allocation2 + $0x170] sm:$0xff]  ;;  %v1112_v17 = vld [vmem:[#allocation2 + $0x2] sm:$0xff] }
  0x59   : > { %4870 = vmatprep.mubr.bf16.mxu0 %v5883_v38  ;;  %4899 = vmatpush3.bf16.msra.mxu0 %v5368_v28  ;;  %v5957_v28 = vpack.c.bf16 %v3946_v20, %v3945_v14  ;;  %v6026_v14 = vpack.c.bf16 %v594_v22, %v593_v3  ;;  %v5386_v20 = vld [vmem:[%s6472_s3 + $0x1e8] sm:$0xff]   ;;  %v6038_v23 = vpack.c.bf16 %v596_v16, %v595_v8  ;;  %v4042_v3 = vld [vmem:[#allocation2 + $0xb1] sm:$0xff] }
  0x5a   : > { %4900 = vmatprep.subr.bf16.mxu0 %v5370_v39  ;;  %v4043_v22 = vld [vmem:[#allocation2 + $0xc1] sm:$0xff] }
  0x5d   : > { %4901 = vmatpush3.bf16.msra.mxu0 %v5370_v39  ;;  %v5377_v39 = vld [vmem:[%s6472_s3 + $0xa8] sm:$0xff]  }
  0x5e   : > { %4902 = vmatprep.subr.bf16.mxu0 %v5372_v42 }
  0x5f   : > { %4647 = vmatmul.mubr.bf16.gmra.mrb[28].mxu1 %v5897_v43 }
  0x60   : > { %4871 = vmatmul.mubr.bf16.gmra.mrb[12].mxu0 %v5899_v44  ;;  %4666 = vmatprep.mubr.bf16.mxu1 %v5901_v46 }
  0x61   : > { %4874 = vmatprep.mubr.bf16.mxu0 %v5903_v48  ;;  %4903 = vmatpush3.bf16.msra.mxu0 %v5372_v42  ;;  %v3949_v42 = vld [vmem:[#allocation2 + $0x182] sm:$0xff] }
  0x62   : > { %4904 = vmatprep.subr.bf16.mxu0 %v5374_v51  ;;  %v2080_v54 = vpack.c.bf16 %v3950_v45, %v3949_v42  ;;  %v5392_v42 = vld [vmem:[%s6472_s3 + $0x200] sm:$0xff]   ;;  %v5385_v45 = vld [vmem:[%s6472_s3 + $0xc8] sm:$0xff]  }
  0x65   : > { %4905 = vmatpush3.bf16.msra.mxu0 %v5374_v51  ;;  %v582_v51 = vld [vmem:[#allocation2 + $0xc8] sm:$0xff] }
  0x66   : > { %4938 = vmatprep.subr.bf16.mxu0 %v5915_v37  ;;  %v5981_v56 = vpack.c.bf16 %v582_v51, %v581_v35  ;;  %v5390_v35 = vld [vmem:[%s6472_s3 + $0x1f8] sm:$0xff]   ;;  %v5387_v51 = vld [vmem:[%s6472_s3 + $0xd0] sm:$0xff]  }
  0x67   : > { %4667 = vmatmul.mubr.bf16.vlgmr.msra.gmra.mrb[0].mxu1 %v5917_v41 }
  0x68   : > { %4875 = vmatmul.mubr.bf16.gmra.mrb[16].mxu0 %v5919_v47  ;;  %4699 = vmatpush3.bf16.msra.mxu1 %v5819_v11  ;;  %v5943_v11 = vpack.c.bf16 %v3944_v58, %v3943_v50  ;;  %v6012_v50 = vpack.c.bf16 %v590_v9, %v589_v7  ;;  %v592_v58 = vld [vmem:[#allocation2 + $0x140] sm:$0xff]  ;;  %v5394_v7 = vld [vmem:[%s6472_s3 + $0x208] sm:$0xff]   ;;  %v4039_v9 = vld [vmem:[#allocation2 + $0x91] sm:$0xff] }
  0x69   : > { %4670 = vmatprep.mubr.bf16.mxu1 %v5921_v49  ;;  %4878 = vmatprep.mubr.bf16.mxu0 %v5923_v1 }
  0x6a   : > { %4700 = vmatprep.subr.bf16.mxu1 %v5369_v6 }
  0x6c   : > { %4701 = vmatpush3.bf16.msra.mxu1 %v5369_v6  ;;  %v588_v6 = vld [vmem:[#allocation2 + $0x110] sm:$0xff] }
  0x6d   : > { %4702 = vmatprep.subr.bf16.mxu1 %v5371_v55  ;;  %v6010_v15 = vpack.c.bf16 %v588_v6, %v587_v5 }
  0x6f   : > { %4671 = vmatmul.mubr.bf16.gmra.mrb[4].mxu1 %v5937_v60 }
  0x70   : > { %4879 = vmatmul.mubr.bf16.gmra.mrb[20].mxu0 %v5939_v63  ;;  %4674 = vmatprep.mubr.bf16.mxu1 %v5941_v2 }
  0x71   : > { %4882 = vmatprep.mubr.bf16.mxu0 %v5943_v11  ;;  %4703 = vmatpush3.bf16.msra.mxu1 %v5371_v55  ;;  %v5382_v55 = vld [vmem:[%s6472_s3 + $0x1d8] sm:$0xff]  }
  0x72   : > { %4704 = vmatprep.subr.bf16.mxu1 %v5373_v25 }
  0x75   : > { %4705 = vmatpush3.bf16.msra.mxu1 %v5373_v25  ;;  %v5384_v25 = vld [vmem:[%s6472_s3 + $0x1e0] sm:$0xff]  }
  0x76   : > { %4706 = vmatprep.subr.bf16.mxu1 %v5375_v26 }
  0x77   : > { %4675 = vmatmul.mubr.bf16.gmra.mrb[8].mxu1 %v5955_v27 }
  0x78   : > { %4883 = vmatmul.mubr.bf16.gmra.mrb[24].mxu0 %v5957_v28  ;;  %4678 = vmatprep.mubr.bf16.mxu1 %v5959_v31 }
  0x79   : > { %4886 = vmatprep.mubr.bf16.mxu0 %v5961_v34  ;;  %4707 = vmatpush3.bf16.msra.mxu1 %v5375_v26  ;;  %v1113_v26 = vld [vmem:[#allocation2 + $0xa] sm:$0xff] }
  0x7a   : > { %4708 = vmatprep.subr.bf16.mxu1 %v5377_v39  ;;  %v1144_v40 = vpack.c.bf16 %v1113_v26, %v1112_v17  ;;  %v4046_v17 = vld [vmem:[#allocation2 + $0xe1] sm:$0xff]  ;;  %v4047_v26 = vld [vmem:[#allocation2 + $0xf1] sm:$0xff] }
  0x7d   : > { %4709 = vmatpush3.bf16.msra.mxu1 %v5377_v39  ;;  %v5388_v39 = vld [vmem:[%s6472_s3 + $0x1f0] sm:$0xff]  }
  0x7e   : > { %4710 = vmatprep.subr.bf16.mxu1 %v5379_v52 }
  0x7f   : > { %4679 = vmatmul.mubr.bf16.gmra.mrb[12].mxu1 %v5979_v53 }
  0x80   : > { %4887 = vmatmul.mubr.bf16.gmra.mrb[28].mxu0 %v2080_v54  ;;  %4682 = vmatprep.mubr.bf16.mxu1 %v5981_v56  ;;  %v5391_v54 = vld [vmem:[%s6472_s3 + $0xe0] sm:$0xff]  }
  0x81   : > { %4906 = vmatprep.mubr.bf16.mxu0 %v5921_v49  ;;  %4711 = vmatpush3.bf16.msra.mxu1 %v5379_v52  ;;  %v5389_v52 = vld [vmem:[%s6472_s3 + $0xd8] sm:$0xff]  }
  0x82   : > { %4712 = vmatprep.subr.bf16.mxu1 %v5381_v10 }
  0x85   : > { %4713 = vmatpush3.bf16.msra.mxu1 %v5381_v10 }
  0x86   : > { %4746 = vmatprep.subr.bf16.mxu1 %v5992_v59 }
  0x87   : > { %4683 = vmatmul.mubr.bf16.gmra.mrb[16].mxu1 %v5994_v61 }
  0x88   : > { %4907 = vmatmul.mubr.bf16.vlgmr.msra.gmra.mrb[0].mxu0 %v5937_v60  ;;  %4686 = vmatprep.mubr.bf16.mxu1 %v5996_v62 }
  0x89   : > { %4939 = vmatpush3.bf16.msra.mxu0 %v5915_v37  ;;  %4910 = vmatprep.mubr.bf16.mxu0 %v5941_v2  ;;  %v591_v37 = vld [vmem:[#allocation2 + $0x138] sm:$0xff] }
  0x8a   : > { %4940 = vmatprep.subr.bf16.mxu0 %v5378_v4  ;;  %v6024_v19 = vpack.c.bf16 %v592_v58, %v591_v37 }
  0x8d   : > { %4941 = vmatpush3.bf16.msra.mxu0 %v5378_v4  ;;  %v4036_v4 = vld [vmem:[#allocation2 + $0x69] sm:$0xff] }
  0x8e   : > { %4942 = vmatprep.subr.bf16.mxu0 %v5380_v13 }
  0x8f   : > { %4687 = vmatmul.mubr.bf16.gmra.mrb[20].mxu1 %v6010_v15 }
  0x90   : > { %4911 = vmatmul.mubr.bf16.gmra.mrb[4].mxu0 %v5955_v27  ;;  %4690 = vmatprep.mubr.bf16.mxu1 %v6012_v50 }
  0x91   : > { %4914 = vmatprep.mubr.bf16.mxu0 %v5959_v31  ;;  %4943 = vmatpush3.bf16.msra.mxu0 %v5380_v13  ;;  %v4040_v13 = vld [vmem:[#allocation2 + $0x99] sm:$0xff] }
  0x92   : > { %4944 = vmatprep.subr.bf16.mxu0 %v5382_v55  ;;  %v2684_v58 = vpack.c.bf16 %v4040_v13, %v4039_v9 }
  0x95   : > { %4945 = vmatpush3.bf16.msra.mxu0 %v5382_v55  ;;  %v5396_v55 = vld [vmem:[%s6472_s3 + $0x210] sm:$0xff]  }
  0x96   : > { %4946 = vmatprep.subr.bf16.mxu0 %v5384_v25 }
  0x97   : > { %4691 = vmatmul.mubr.bf16.gmra.mrb[24].mxu1 %v6024_v19 }
  0x98   : > { %4915 = vmatmul.mubr.bf16.gmra.mrb[8].mxu0 %v5979_v53  ;;  %4694 = vmatprep.mubr.bf16.mxu1 %v6026_v14 }
  0x99   : > { %4918 = vmatprep.mubr.bf16.mxu0 %v5981_v56  ;;  %4947 = vmatpush3.bf16.msra.mxu0 %v5384_v25  ;;  %v4044_v25 = vld [vmem:[#allocation2 + $0xc9] sm:$0xff] }
  0x9a   : > { %4948 = vmatprep.subr.bf16.mxu0 %v5386_v20  ;;  %v2686_v16 = vpack.c.bf16 %v4044_v25, %v4043_v22  ;;  %v4103_v22 = vld [vmem:[#allocation2 + $0xf2] sm:$0xff] }
  0x9d   : > { %4949 = vmatpush3.bf16.msra.mxu0 %v5386_v20  ;;  %v5399_v20 = vld [vmem:[%s6472_s3 + $0x220] sm:$0xff]  }
  0x9e   : > { %4950 = vmatprep.subr.bf16.mxu0 %v5388_v39 }
  0x9f   : > { %4695 = vmatmul.mubr.bf16.gmra.mrb[28].mxu1 %v6038_v23 }
  0xa0   : > { %4919 = vmatmul.mubr.bf16.gmra.mrb[12].mxu0 %v5994_v61  ;;  %4714 = vmatprep.mubr.bf16.mxu1 %v1144_v40  ;;  %v5401_v40 = vld [vmem:[%s6472_s3 + $0x230] sm:$0xff]  }
  0xa1   : > { %4922 = vmatprep.mubr.bf16.mxu0 %v5996_v62  ;;  %4951 = vmatpush3.bf16.msra.mxu0 %v5388_v39  ;;  %v4048_v39 = vld [vmem:[#allocation2 + $0xf9] sm:$0xff] }
  0xa2   : > { %4952 = vmatprep.subr.bf16.mxu0 %v5390_v35 }
  0xa5   : > { %4953 = vmatpush3.bf16.msra.mxu0 %v5390_v35 }
  0xa6   : > { %4986 = vmatprep.subr.bf16.mxu0 %v5392_v42 }
  0xa7   : > { %4715 = vmatmul.mubr.bf16.vlgmr.msra.gmra.mrb[0].mxu1 %v5790_v0  ;;  %v4003_v0 = vld [vmem:[#allocation2 + $0x180] sm:$0xff] }
  0xa8   : > { %4923 = vmatmul.mubr.bf16.gmra.mrb[16].mxu0 %v6010_v15  ;;  %4747 = vmatpush3.bf16.msra.mxu1 %v5992_v59  ;;  %v4035_v59 = vld [vmem:[#allocation2 + $0x61] sm:$0xff] }
  0xa9   : > { %4718 = vmatprep.mubr.bf16.mxu1 %v5821_v12  ;;  %4926 = vmatprep.mubr.bf16.mxu0 %v6012_v50  ;;  %v4004_v12 = vld [vmem:[#allocation2 + $0x188] sm:$0xff]  ;;  %v2682_v6 = vpack.c.bf16 %v4036_v4, %v4035_v59 }
  0xaa   : > { %4748 = vmatprep.subr.bf16.mxu1 %v5385_v45  ;;  %v6070_v10 = vpack.c.bf16 %v4004_v12, %v4003_v0 }
  0xac   : > { %4749 = vmatpush3.bf16.msra.mxu1 %v5385_v45  ;;  %v4050_v45 = vld [vmem:[#allocation2 + $0x111] sm:$0xff] }
  0xad   : > { %4750 = vmatprep.subr.bf16.mxu1 %v5387_v51 }
  0xaf   : > { %4719 = vmatmul.mubr.bf16.gmra.mrb[4].mxu1 %v5828_v18  ;;  %v5393_v18 = vld [vmem:[%s6472_s3 + $0xe8] sm:$0xff]  }
  0xb0   : > { %4927 = vmatmul.mubr.bf16.gmra.mrb[20].mxu0 %v6024_v19  ;;  %4722 = vmatprep.mubr.bf16.mxu1 %v5853_v30  ;;  %v4031_v30 = vld [vmem:[#allocation2 + $0x31] sm:$0xff] }
  0xb1   : > { %4930 = vmatprep.mubr.bf16.mxu0 %v6026_v14  ;;  %4751 = vmatpush3.bf16.msra.mxu1 %v5387_v51  ;;  %v2680_v29 = vpack.c.bf16 %v4032_v21, %v4031_v30  ;;  %v4051_v51 = vld [vmem:[#allocation2 + $0x121] sm:$0xff]  ;;  %v4056_v30 = vld [vmem:[#allocation2 + $0x159] sm:$0xff] }
  0xb2   : > { %4752 = vmatprep.subr.bf16.mxu1 %v5389_v52 }
  0xb5   : > { %4753 = vmatpush3.bf16.msra.mxu1 %v5389_v52  ;;  %v4052_v52 = vld [vmem:[#allocation2 + $0x129] sm:$0xff] }
  0xb6   : > { %4754 = vmatprep.subr.bf16.mxu1 %v5391_v54  ;;  %v6131_v12 = vpack.c.bf16 %v4052_v52, %v4051_v51  ;;  %v4116_v51 = vld [vmem:[#allocation2 + $0x18a] sm:$0xff] }
  0xb7   : > { %4723 = vmatmul.mubr.bf16.gmra.mrb[8].mxu1 %v5859_v33  ;;  %v5397_v33 = vld [vmem:[%s6472_s3 + $0xf8] sm:$0xff]  }
  0xb8   : > { %4931 = vmatmul.mubr.bf16.gmra.mrb[24].mxu0 %v6038_v23  ;;  %4726 = vmatprep.mubr.bf16.mxu1 %v5877_v32  ;;  %v4033_v32 = vld [vmem:[#allocation2 + $0x49] sm:$0xff] }
  0xb9   : > { %4934 = vmatprep.mubr.bf16.mxu0 %v6070_v10  ;;  %4755 = vmatpush3.bf16.msra.mxu1 %v5391_v54  ;;  %v2681_v5 = vpack.c.bf16 %v4034_v57, %v4033_v32  ;;  %v5405_v54 = vld [vmem:[%s6472_s3 + $0x108] sm:$0xff]   ;;  %v4088_v32 = vld [vmem:[#allocation2 + $0x3a] sm:$0xff] }
  0xba   : > { %4756 = vmatprep.subr.bf16.mxu1 %v5393_v18  ;;  %v5409_v57 = vld [vmem:[%s6472_s3 + $0x128] sm:$0xff]  }
  0xbd   : > { %4757 = vmatpush3.bf16.msra.mxu1 %v5393_v18  ;;  %v4055_v18 = vld [vmem:[#allocation2 + $0x151] sm:$0xff] }
  0xbe   : > { %4758 = vmatprep.subr.bf16.mxu1 %v5395_v24 }
  0xbf   : > { %4727 = vmatmul.mubr.bf16.gmra.mrb[12].mxu1 %v5883_v38  ;;  %v6094_v38 = vld [vmem:[%s6472_s3 + $0x100] sm:$0xff]  }
  0xc0   : > { %4935 = vmatmul.mubr.bf16.gmra.mrb[28].mxu0 %v5901_v46  ;;  %4730 = vmatprep.mubr.bf16.mxu1 %v5899_v44  ;;  %v4037_v44 = vld [vmem:[#allocation2 + $0x79] sm:$0xff]  ;;  %v4038_v46 = vld [vmem:[#allocation2 + $0x81] sm:$0xff] }
  0xc1   : > { %4954 = vmatprep.mubr.bf16.mxu0 %v2680_v29  ;;  %4759 = vmatpush3.bf16.msra.mxu1 %v5395_v24  ;;  %v2683_v37 = vpack.c.bf16 %v4038_v46, %v4037_v44  ;;  %v5407_v24 = vld [vmem:[%s6472_s3 + $0x118] sm:$0xff]   ;;  %v5408_v29 = vld [vmem:[%s6472_s3 + $0x120] sm:$0xff]  }
  0xc2   : > { %4760 = vmatprep.subr.bf16.mxu1 %v5397_v33  ;;  %v4095_v44 = vld [vmem:[#allocation2 + $0x92] sm:$0xff]  ;;  %v4096_v46 = vld [vmem:[#allocation2 + $0x9a] sm:$0xff] }
  0xc3   : > { %v2990_v13 = vpack.c.bf16 %v4096_v46, %v4095_v44 }
  0xc5   : > { %4761 = vmatpush3.bf16.msra.mxu1 %v5397_v33  ;;  %v4087_v33 = vld [vmem:[#allocation2 + $0x32] sm:$0xff] }
  0xc6   : > { %5034 = vmatprep.subr.bf16.mxu1 %v6094_v38  ;;  %v2986_v4 = vpack.c.bf16 %v4088_v32, %v4087_v33 }
  0xc7   : > { %4731 = vmatmul.mubr.bf16.gmra.mrb[16].mxu1 %v5903_v48  ;;  %v5398_v48 = vld [vmem:[%s6472_s3 + $0x218] sm:$0xff]  }
  0xc8   : > { %4955 = vmatmul.mubr.bf16.vlgmr.msra.gmra.mrb[0].mxu0 %v2681_v5  ;;  %4734 = vmatprep.mubr.bf16.mxu1 %v5919_v47  ;;  %v4041_v47 = vld [vmem:[#allocation2 + $0xa9] sm:$0xff] }
  0xc9   : > { %4987 = vmatpush3.bf16.msra.mxu0 %v5392_v42  ;;  %4958 = vmatprep.mubr.bf16.mxu0 %v2682_v6  ;;  %v2685_v8 = vpack.c.bf16 %v4042_v3, %v4041_v47  ;;  %v6120_v42 = vpack.c.bf16 %v4048_v39, %v4047_v26  ;;  %v4092_v5 = vld [vmem:[#allocation2 + $0x6a] sm:$0xff]  ;;  %v5411_v6 = vld [vmem:[%s6472_s3 + $0x138] sm:$0xff]   ;;  %v4102_v3 = vld [vmem:[#allocation2 + $0xe2] sm:$0xff] }
  0xca   : > { %4988 = vmatprep.subr.bf16.mxu0 %v5394_v7  ;;  %v4111_v26 = vld [vmem:[#allocation2 + $0x152] sm:$0xff] }
  0xcd   : > { %4989 = vmatpush3.bf16.msra.mxu0 %v5394_v7 }
  0xce   : > { %4990 = vmatprep.subr.bf16.mxu0 %v5396_v55 }
  0xcf   : > { %4735 = vmatmul.mubr.bf16.gmra.mrb[20].mxu1 %v5923_v1  ;;  %v5400_v1 = vld [vmem:[%s6472_s3 + $0x228] sm:$0xff]  }
  0xd0   : > { %4959 = vmatmul.mubr.bf16.gmra.mrb[4].mxu0 %v2683_v37  ;;  %4738 = vmatprep.mubr.bf16.mxu1 %v5939_v63  ;;  %v4045_v63 = vld [vmem:[#allocation2 + $0xd9] sm:$0xff] }
  0xd1   : > { %4962 = vmatprep.mubr.bf16.mxu0 %v2684_v58  ;;  %4991 = vmatpush3.bf16.msra.mxu0 %v5396_v55  ;;  %v6118_v35 = vpack.c.bf16 %v4046_v17, %v4045_v63  ;;  %v4097_v55 = vld [vmem:[#allocation2 + $0xaa] sm:$0xff]  ;;  %v4098_v37 = vld [vmem:[#allocation2 + $0xb2] sm:$0xff]  ;;  %v4099_v58 = vld [vmem:[#allocation2 + $0xc2] sm:$0xff] }
  0xd2   : > { %4992 = vmatprep.subr.bf16.mxu0 %v5398_v48  ;;  %v4110_v17 = vld [vmem:[#allocation2 + $0x142] sm:$0xff] }
  0xd5   : > { %4993 = vmatpush3.bf16.msra.mxu0 %v5398_v48  ;;  %v2991_v48 = vpack.c.bf16 %v4098_v37, %v4097_v55 }
  0xd6   : > { %4994 = vmatprep.subr.bf16.mxu0 %v5399_v20 }
  0xd7   : > { %4739 = vmatmul.mubr.bf16.gmra.mrb[24].mxu1 %v5943_v11  ;;  %v5402_v11 = vld [vmem:[%s6472_s3 + $0x238] sm:$0xff]  }
  0xd8   : > { %4963 = vmatmul.mubr.bf16.gmra.mrb[8].mxu0 %v2685_v8  ;;  %4742 = vmatprep.mubr.bf16.mxu1 %v5957_v28  ;;  %v4049_v28 = vld [vmem:[#allocation2 + $0x109] sm:$0xff]  ;;  %v4106_v8 = vld [vmem:[#allocation2 + $0x112] sm:$0xff] }
  0xd9   : > { %4966 = vmatprep.mubr.bf16.mxu0 %v2686_v16  ;;  %4995 = vmatpush3.bf16.msra.mxu0 %v5399_v20  ;;  %v6129_v0 = vpack.c.bf16 %v4050_v45, %v4049_v28  ;;  %v4107_v16 = vld [vmem:[#allocation2 + $0x122] sm:$0xff] }
  0xda   : > { %4996 = vmatprep.subr.bf16.mxu0 %v5400_v1  ;;  %v3891_v28 = vld [vmem:[#allocation2 + $0x169] sm:$0xff] }
  0xdb   : > { %v4115_v45 = vld [vmem:[#allocation2 + $0x182] sm:$0xff] }
  0xdd   : > { %4997 = vmatpush3.bf16.msra.mxu0 %v5400_v1 }
  0xde   : > { %4998 = vmatprep.subr.bf16.mxu0 %v5401_v40 }
  0xdf   : > { %4743 = vmatmul.mubr.bf16.gmra.mrb[28].mxu1 %v5961_v34  ;;  %v4054_v34 = vld [vmem:[#allocation2 + $0x141] sm:$0xff] }
  0xe0   : > { %4967 = vmatmul.mubr.bf16.gmra.mrb[12].mxu0 %v6118_v35  ;;  %4762 = vmatprep.mubr.bf16.mxu1 %v5917_v41  ;;  %v4053_v41 = vld [vmem:[#allocation2 + $0x139] sm:$0xff] }
  0xe1   : > { %4970 = vmatprep.mubr.bf16.mxu0 %v6120_v42  ;;  %4999 = vmatpush3.bf16.msra.mxu0 %v5401_v40  ;;  %v6141_v21 = vpack.c.bf16 %v4054_v34, %v4053_v41  ;;  %v3000_v41 = vpack.c.bf16 %v4116_v51, %v4115_v45  ;;  %v3893_v34 = vld [vmem:[#allocation2 + $0x181] sm:$0xff] }
  0xe2   : > { %5000 = vmatprep.subr.bf16.mxu0 %v5402_v11 }
  0xe5   : > { %5001 = vmatpush3.bf16.msra.mxu0 %v5402_v11  ;;  %v4114_v11 = vld [vmem:[#allocation2 + $0x172] sm:$0xff] }
  0xe7   : > { %4763 = vmatmul.mubr.bf16.vlgmr.msra.gmra.mrb[0].mxu1 %v5921_v49  ;;  %v6143_v49 = vpack.c.bf16 %v4056_v30, %v4055_v18  ;;  %v4118_v18 = vld [vmem:[#allocation2 + $0x1a2] sm:$0xff] }
  0xe8   : > { %4971 = vmatmul.mubr.bf16.gmra.mrb[16].mxu0 %v6129_v0  ;;  %5042 = vmatpush3.bf16.msra.mxu1 %v6094_v38 }
  0xe9   : > { %4766 = vmatprep.mubr.bf16.mxu1 %v5937_v60  ;;  %4974 = vmatprep.mubr.bf16.mxu0 %v6131_v12  ;;  %v5406_v60 = vld [vmem:[%s6472_s3 + $0x110] sm:$0xff]  }
  0xea   : > { %5035 = vmatprep.subr.bf16.mxu1 %v5405_v54 }
  0xec   : > { %5043 = vmatpush3.bf16.msra.mxu1 %v5405_v54  ;;  %v3894_v54 = vld [vmem:[#allocation2 + $0x189] sm:$0xff] }
  0xed   : > { %5036 = vmatprep.subr.bf16.mxu1 %v5406_v60  ;;  %v1774_v30 = vpack.c.bf16 %v3894_v54, %v3893_v34 }
  0xef   : > { %4767 = vmatmul.mubr.bf16.gmra.mrb[4].mxu1 %v5941_v2  ;;  %v4061_v2 = vld [vmem:[#allocation2 + $0x199] sm:$0xff] }
  0xf0   : > { %4975 = vmatmul.mubr.bf16.gmra.mrb[20].mxu0 %v6141_v21  ;;  %4770 = vmatprep.mubr.bf16.mxu1 %v5955_v27  ;;  %v4062_v27 = vld [vmem:[#allocation2 + $0x1a1] sm:$0xff] }
  0xf1   : > { %4978 = vmatprep.mubr.bf16.mxu0 %v6143_v49  ;;  %5044 = vmatpush3.bf16.msra.mxu1 %v5406_v60  ;;  %v2695_v59 = vpack.c.bf16 %v4062_v27, %v4061_v2 }
  0xf2   : > { %5037 = vmatprep.subr.bf16.mxu1 %v5407_v24 }
  0xf5   : > { %5045 = vmatpush3.bf16.msra.mxu1 %v5407_v24 }
  0xf6   : > { %5038 = vmatprep.subr.bf16.mxu1 %v5408_v29 }
  0xf7   : > { %4771 = vmatmul.mubr.bf16.gmra.mrb[8].mxu1 %v5959_v31  ;;  %v4089_v31 = vld [vmem:[#allocation2 + $0x4a] sm:$0xff] }
  0xf8   : > { %4979 = vmatmul.mubr.bf16.gmra.mrb[24].mxu0 %v5897_v43  ;;  %4774 = vmatprep.mubr.bf16.mxu1 %v5979_v53  ;;  %v5410_v43 = vld [vmem:[%s6472_s3 + $0x130] sm:$0xff]   ;;  %v4091_v53 = vld [vmem:[#allocation2 + $0x62] sm:$0xff] }
  0xf9   : > { %4982 = vmatprep.mubr.bf16.mxu0 %v5973_v36  ;;  %5046 = vmatpush3.bf16.msra.mxu1 %v5408_v29  ;;  %v4090_v36 = vld [vmem:[#allocation2 + $0x52] sm:$0xff]  ;;  %v2988_v38 = vpack.c.bf16 %v4092_v5, %v4091_v53 }
  0xfa   : > { %5039 = vmatprep.subr.bf16.mxu1 %v5409_v57  ;;  %v2987_v7 = vpack.c.bf16 %v4090_v36, %v4089_v31 }
  0xfd   : > { %5047 = vmatpush3.bf16.msra.mxu1 %v5409_v57 }
  0xfe   : > { %5040 = vmatprep.subr.bf16.mxu1 %v5410_v43 }
  0xff   : > { %4775 = vmatmul.mubr.bf16.gmra.mrb[12].mxu1 %v5981_v56  ;;  %v4093_v56 = vld [vmem:[#allocation2 + $0x7a] sm:$0xff] }
 0x100   : > { %4983 = vmatmul.mubr.bf16.gmra.mrb[28].mxu0 %v2695_v59  ;;  %4778 = vmatprep.mubr.bf16.mxu1 %v5994_v61  ;;  %v4094_v61 = vld [vmem:[#allocation2 + $0x82] sm:$0xff] }
 0x101   : > { %5002 = vmatprep.mubr.bf16.mxu0 %v2986_v4  ;;  %5048 = vmatpush3.bf16.msra.mxu1 %v5410_v43  ;;  %v2989_v9 = vpack.c.bf16 %v4094_v61, %v4093_v56  ;;  %v6197_v56 = vld [vmem:[%s6473_s4] ss:$0 sm:$0xff] }
 0x102   : > { %5041 = vmatprep.subr.bf16.mxu1 %v5411_v6 }
 0x105   : > { %5049 = vmatpush3.bf16.msra.mxu1 %v5411_v6 }
 0x107   : > { %4779 = vmatmul.mubr.bf16.gmra.mrb[16].mxu1 %v5996_v62  ;;  %v4100_v62 = vld [vmem:[#allocation2 + $0xca] sm:$0xff] }
 0x108   : > { %5003 = vmatmul.mubr.bf16.vlgmr.msra.gmra.mrb[0].mxu0 %v2987_v7  ;;  %4782 = vmatprep.mubr.bf16.mxu1 %v6010_v15  ;;  %v2992_v47 = vpack.c.bf16 %v4100_v62, %v4099_v58  ;;  %v4101_v15 = vld [vmem:[#allocation2 + $0xda] sm:$0xff] }
 0x109   : > { %5006 = vmatprep.mubr.bf16.mxu0 %v2988_v38  ;;  %v2993_v25 = vpack.c.bf16 %v4102_v3, %v4101_v15 }
 0x10f   : > { %4783 = vmatmul.mubr.bf16.gmra.mrb[20].mxu1 %v6012_v50  ;;  %v4104_v50 = vld [vmem:[#allocation2 + $0xfa] sm:$0xff] }
 0x110   : > { %5007 = vmatmul.mubr.bf16.gmra.mrb[4].mxu0 %v2989_v9  ;;  %4786 = vmatprep.mubr.bf16.mxu1 %v6024_v19  ;;  %v2994_v20 = vpack.c.bf16 %v4104_v50, %v4103_v22  ;;  %v4105_v19 = vld [vmem:[#allocation2 + $0x10a] sm:$0xff] }
 0x111   : > { %5010 = vmatprep.mubr.bf16.mxu0 %v2990_v13  ;;  %v2995_v1 = vpack.c.bf16 %v4106_v8, %v4105_v19 }
 0x117   : > { %4787 = vmatmul.mubr.bf16.gmra.mrb[24].mxu1 %v6026_v14  ;;  %v4108_v14 = vld [vmem:[#allocation2 + $0x12a] sm:$0xff] }
 0x118   : > { %5011 = vmatmul.mubr.bf16.gmra.mrb[8].mxu0 %v2991_v48  ;;  %4790 = vmatprep.mubr.bf16.mxu1 %v6038_v23  ;;  %v2996_v63 = vpack.c.bf16 %v4108_v14, %v4107_v16  ;;  %v4109_v23 = vld [vmem:[#allocation2 + $0x13a] sm:$0xff] }
 0x119   : > { %5014 = vmatprep.mubr.bf16.mxu0 %v2992_v47  ;;  %v2997_v39 = vpack.c.bf16 %v4110_v17, %v4109_v23 }
 0x11f   : > { %4791 = vmatmul.mubr.bf16.gmra.mrb[28].mxu1 %v6070_v10  ;;  %v4112_v10 = vld [vmem:[#allocation2 + $0x15a] sm:$0xff] }
 0x120   : > { %5015 = vmatmul.mubr.bf16.gmra.mrb[12].mxu0 %v2993_v25  ;;  %4826 = vmatprep.mubr.bf16.mxu1 %v6118_v35  ;;  %v2998_v40 = vpack.c.bf16 %v4112_v10, %v4111_v26  ;;  %v4113_v35 = vld [vmem:[#allocation2 + $0x16a] sm:$0xff] }
 0x121   : > { %5018 = vmatprep.mubr.bf16.mxu0 %v2994_v20  ;;  %v2999_v52 = vpack.c.bf16 %v4114_v11, %v4113_v35 }
 0x127   : > { %4827 = vmatmul.mubr.bf16.vlgmr.msra.gmra.mrb[16].mxu1 %v6120_v42  ;;  %v3892_v42 = vld [vmem:[#allocation2 + $0x171] sm:$0xff] }
 0x128   : > { %5019 = vmatmul.mubr.bf16.gmra.mrb[16].mxu0 %v2995_v1  ;;  %4830 = vmatprep.mubr.bf16.mxu1 %v6129_v0  ;;  %v1773_v0 = vpack.c.bf16 %v3892_v42, %v3891_v28 }
 0x129   : > { %5022 = vmatprep.mubr.bf16.mxu0 %v2996_v63 }
 0x12f   : > { %4831 = vmatmul.mubr.bf16.gmra.mrb[20].mxu1 %v6131_v12  ;;  %v4117_v12 = vld [vmem:[#allocation2 + $0x19a] sm:$0xff] }
 0x130   : > { %5023 = vmatmul.mubr.bf16.gmra.mrb[20].mxu0 %v2997_v39  ;;  %4834 = vmatprep.mubr.bf16.mxu1 %v6141_v21  ;;  %v3001_v21 = vpack.c.bf16 %v4118_v18, %v4117_v12 }
 0x131   : > { %5026 = vmatprep.mubr.bf16.mxu0 %v2998_v40 }
 0x137   : > { %4835 = vmatmul.mubr.bf16.gmra.mrb[24].mxu1 %v6143_v49 }
 0x138   : > { %5027 = vmatmul.mubr.bf16.gmra.mrb[24].mxu0 %v2999_v52  ;;  %4838 = vmatprep.mubr.bf16.mxu1 %v1773_v0 }
 0x139   : > { %5030 = vmatprep.mubr.bf16.mxu0 %v3000_v41 }
 0x13f   : > { %4839 = vmatmul.mubr.bf16.gmra.mrb[28].mxu1 %v1774_v30 }
 0x140   : > { %5031 = vmatmul.mubr.bf16.gmra.mrb[28].mxu0 %v3001_v21 }
 0x1ba   : > { %v4764_v60 = vpop.f32.mrb[0].mxu1 }
 0x1bb   : > { %v1568_v24 = vpop.f32.mrb[1].mxu1 }
 0x1bc   : > { %v4765_v29 = vpop.f32.mrb[2].mxu1 }
 0x1bd   : > { %v1571_v2 = vpop.f32.mrb[3].mxu1 }
 0x1c2   : > { %v4768_v27 = vpop.f32.mrb[4].mxu1 }
 0x1c3   : > { %v1584_v33 = vpop.f32.mrb[5].mxu1 }
 0x1c4   : > { %v4769_v32 = vpop.f32.mrb[6].mxu1 }
 0x1c5   : > { %v1587_v57 = vpop.f32.mrb[7].mxu1 }
 0x1ca   : > { %v4772_v49 = vpop.f32.mrb[8].mxu1 }
 0x1cb   : > { %v1600_v59 = vpop.f32.mrb[9].mxu1 }
 0x1cc   : > { %v4773_v4 = vpop.f32.mrb[10].mxu1 }
 0x1cd   : > { %v1603_v43 = vpop.f32.mrb[11].mxu1 }
 0x1d2   : > { %v6186_v31 = vpop.f32.mrb[12].mxu1 }
 0x1d3   : > { %v6188_v36 = vpop.f32.mrb[13].mxu1 }
 0x1d4   : > { %v6190_v53 = vpop.f32.mrb[14].mxu1 }
 0x1d5   : > { %v6192_v5 = vpop.f32.mrb[15].mxu1 }
 0x1db   : > { %v5004_v6 = vpop.f32.mrb[0].mxu0 }
 0x1dc   : > { %v5050_v7 = vadd.f32 %v5004_v6, %v4764_v60  ;;  %v3101_v38 = vpop.f32.mrb[1].mxu0 }
 0x1dd   : > { %v5051_v61 = vadd.f32 %v3101_v38, %v1568_v24  ;;  %v5005_v44 = vpop.f32.mrb[2].mxu0 }
 0x1de   : > { %v5052_v46 = vadd.f32 %v5005_v44, %v4765_v29  ;;  %v3104_v9 = vpop.f32.mrb[3].mxu0  ;;  %v6200_v55 = vadd.f32 %v5050_v7, %v6197_v56 }
 0x1df   : > { %v5053_v13 = vadd.f32 %v3104_v9, %v1571_v2  ;;  %v6206_v58 = vadd.f32 %v5051_v61, %v6197_v56 }
 0x1e0   : > { %v6203_v37 = vadd.f32 %v5052_v46, %v6197_v56 }
 0x1e1   : > { %v6216_v62 = vadd.f32 %v5053_v13, %v6197_v56 }
 0x1e2   : > { %v4284_v48 = vpack.c.bf16 %v6203_v37, %v6200_v55 }
 0x1e3   : > { %v4279_v47 = vpack.c.bf16 %v6216_v62, %v6206_v58  ;;  %v3459_v15 = vadd.f32 %v6216_v62, %v6206_v58  ;;  %v5008_v3 = vpop.f32.mrb[4].mxu0 }
 0x1e4   : > { %4371 = vst [vmem:[%s6213_s27 + $0x8] sm:$0xff] %v4284_v48   ;;  %v5054_v22 = vadd.f32 %v5008_v3, %v4768_v27  ;;  %v3117_v50 = vpop.f32.mrb[5].mxu0 }
 0x1e5   : > { %4280 = vst [vmem:[%s6213_s27] sm:$0xff] %v4279_v47   ;;  %v3460_v25 = vadd.f32 %v3459_v15, %v6200_v55  ;;  %v5055_v20 = vadd.f32 %v3117_v50, %v1584_v33  ;;  %v5009_v19 = vpop.f32.mrb[6].mxu0 }
 0x1e6   : > { %v5056_v8 = vadd.f32 %v5009_v19, %v4769_v32  ;;  %v3120_v16 = vpop.f32.mrb[7].mxu0  ;;  %v6232_v23 = vadd.f32 %v5054_v22, %v6197_v56 }
 0x1e7   : > { %v6228_v14 = vadd.f32 %v5055_v20, %v6197_v56  ;;  %v3461_v1 = vadd.f32 %v3460_v25, %v6203_v37  ;;  %v5057_v63 = vadd.f32 %v3120_v16, %v1587_v57 }
 0x1e8   : > { %v6235_v17 = vadd.f32 %v5056_v8, %v6197_v56 }
 0x1e9   : > { %v3462_v26 = vadd.f32 %v3461_v1, %v6228_v14  ;;  %v6239_v10 = vadd.f32 %v5057_v63, %v6197_v56 }
 0x1ea   : > { %v4294_v39 = vpack.c.bf16 %v6235_v17, %v6232_v23 }
 0x1eb   : > { %v4289_v40 = vpack.c.bf16 %v6239_v10, %v6228_v14  ;;  %v3463_v35 = vadd.f32 %v3462_v26, %v6239_v10  ;;  %v5012_v11 = vpop.f32.mrb[8].mxu0 }
 0x1ec   : > { %4373 = vst [vmem:[%s6213_s27 + $0x18] sm:$0xff] %v4294_v39   ;;  %v5058_v28 = vadd.f32 %v5012_v11, %v4772_v49  ;;  %v3133_v42 = vpop.f32.mrb[9].mxu0 }
 0x1ed   : > { %4372 = vst [vmem:[%s6213_s27 + $0x10] sm:$0xff] %v4289_v40   ;;  %v3464_v45 = vadd.f32 %v3463_v35, %v6232_v23  ;;  %v5059_v51 = vadd.f32 %v3133_v42, %v1600_v59  ;;  %v5013_v52 = vpop.f32.mrb[10].mxu0 }
 0x1ee   : > { %v5060_v0 = vadd.f32 %v5013_v52, %v4773_v4  ;;  %v3136_v41 = vpop.f32.mrb[11].mxu0  ;;  %v6254_v18 = vadd.f32 %v5058_v28, %v6197_v56 }
 0x1ef   : > { %v6250_v34 = vadd.f32 %v5059_v51, %v6197_v56  ;;  %v3465_v54 = vadd.f32 %v3464_v45, %v6235_v17  ;;  %v5061_v12 = vadd.f32 %v3136_v41, %v1603_v43 }
 0x1f0   : > { %v6257_v30 = vadd.f32 %v5060_v0, %v6197_v56 }
 0x1f1   : > { %v3466_v21 = vadd.f32 %v3465_v54, %v6250_v34  ;;  %v6261_v60 = vadd.f32 %v5061_v12, %v6197_v56 }
 0x1f2   : > { %v4304_v24 = vpack.c.bf16 %v6257_v30, %v6254_v18 }
 0x1f3   : > { %v4299_v29 = vpack.c.bf16 %v6261_v60, %v6250_v34  ;;  %v3467_v2 = vadd.f32 %v3466_v21, %v6261_v60  ;;  %v5016_v27 = vpop.f32.mrb[12].mxu0 }
 0x1f4   : > { %4375 = vst [vmem:[%s6213_s27 + $0x28] sm:$0xff] %v4304_v24   ;;  %v5062_v33 = vadd.f32 %v5016_v27, %v6186_v31  ;;  %v3149_v32 = vpop.f32.mrb[13].mxu0 }
 0x1f5   : > { %4374 = vst [vmem:[%s6213_s27 + $0x20] sm:$0xff] %v4299_v29   ;;  %v3468_v57 = vadd.f32 %v3467_v2, %v6254_v18  ;;  %v5063_v49 = vadd.f32 %v3149_v32, %v6188_v36  ;;  %v5017_v59 = vpop.f32.mrb[14].mxu0 }
 0x1f6   : > { %v5064_v4 = vadd.f32 %v5017_v59, %v6190_v53  ;;  %v3152_v43 = vpop.f32.mrb[15].mxu0  ;;  %v6280_v31 = vadd.f32 %v5062_v33, %v6197_v56 }
 0x1f7   : > { %v6275_v6 = vadd.f32 %v5063_v49, %v6197_v56  ;;  %v3469_v7 = vadd.f32 %v3468_v57, %v6257_v30  ;;  %v5065_v38 = vadd.f32 %v3152_v43, %v6192_v5 }
 0x1f8   : > { %v6283_v61 = vadd.f32 %v5064_v4, %v6197_v56 }
 0x1f9   : > { %v3470_v36 = vadd.f32 %v3469_v7, %v6275_v6  ;;  %v6287_v44 = vadd.f32 %v5065_v38, %v6197_v56 }
 0x1fa   : > { %v4314_v53 = vpack.c.bf16 %v6283_v61, %v6280_v31  ;;  %v4828_v46 = vpop.f32.mrb[16].mxu1 }
 0x1fb   : > { %v4309_v9 = vpack.c.bf16 %v6287_v44, %v6275_v6  ;;  %v3471_v5 = vadd.f32 %v3470_v36, %v6287_v44  ;;  %v5020_v13 = vpop.f32.mrb[16].mxu0  ;;  %v1938_v48 = vpop.f32.mrb[17].mxu1 }
 0x1fc   : > { %4377 = vst [vmem:[%s6213_s27 + $0x38] sm:$0xff] %v4314_v53   ;;  %v5066_v47 = vadd.f32 %v5020_v13, %v4828_v46  ;;  %v3165_v15 = vpop.f32.mrb[17].mxu0  ;;  %v4829_v3 = vpop.f32.mrb[18].mxu1 }
 0x1fd   : > { %4376 = vst [vmem:[%s6213_s27 + $0x30] sm:$0xff] %v4309_v9   ;;  %v3472_v22 = vadd.f32 %v3471_v5, %v6280_v31  ;;  %v5067_v50 = vadd.f32 %v3165_v15, %v1938_v48  ;;  %v5021_v25 = vpop.f32.mrb[18].mxu0  ;;  %v1941_v20 = vpop.f32.mrb[19].mxu1 }
 0x1fe   : > { %v5068_v19 = vadd.f32 %v5021_v25, %v4829_v3  ;;  %v3168_v8 = vpop.f32.mrb[19].mxu0  ;;  %v6302_v26 = vadd.f32 %v5066_v47, %v6197_v56 }
 0x1ff   : > { %v6298_v16 = vadd.f32 %v5067_v50, %v6197_v56  ;;  %v3473_v1 = vadd.f32 %v3472_v22, %v6283_v61  ;;  %v5069_v63 = vadd.f32 %v3168_v8, %v1941_v20 }
 0x200   : > { %v6305_v39 = vadd.f32 %v5068_v19, %v6197_v56 }
 0x201   : > { %v3474_v40 = vadd.f32 %v3473_v1, %v6298_v16  ;;  %v6309_v35 = vadd.f32 %v5069_v63, %v6197_v56 }
 0x202   : > { %v4324_v11 = vpack.c.bf16 %v6305_v39, %v6302_v26  ;;  %v4832_v28 = vpop.f32.mrb[20].mxu1 }
 0x203   : > { %v4319_v42 = vpack.c.bf16 %v6309_v35, %v6298_v16  ;;  %v3475_v45 = vadd.f32 %v3474_v40, %v6309_v35  ;;  %v5024_v51 = vpop.f32.mrb[20].mxu0  ;;  %v1954_v52 = vpop.f32.mrb[21].mxu1 }
 0x204   : > { %4379 = vst [vmem:[%s6213_s27 + $0x48] sm:$0xff] %v4324_v11   ;;  %v5070_v0 = vadd.f32 %v5024_v51, %v4832_v28  ;;  %v3181_v41 = vpop.f32.mrb[21].mxu0  ;;  %v4833_v54 = vpop.f32.mrb[22].mxu1 }
 0x205   : > { %4378 = vst [vmem:[%s6213_s27 + $0x40] sm:$0xff] %v4319_v42   ;;  %v3476_v12 = vadd.f32 %v3475_v45, %v6302_v26  ;;  %v5071_v21 = vadd.f32 %v3181_v41, %v1954_v52  ;;  %v5025_v24 = vpop.f32.mrb[22].mxu0  ;;  %v1957_v29 = vpop.f32.mrb[23].mxu1 }
 0x206   : > { %v5072_v2 = vadd.f32 %v5025_v24, %v4833_v54  ;;  %v3184_v27 = vpop.f32.mrb[23].mxu0  ;;  %v6324_v49 = vadd.f32 %v5070_v0, %v6197_v56 }
 0x207   : > { %v6320_v33 = vadd.f32 %v5071_v21, %v6197_v56  ;;  %v3477_v32 = vadd.f32 %v3476_v12, %v6305_v39  ;;  %v5073_v57 = vadd.f32 %v3184_v27, %v1957_v29 }
 0x208   : > { %v6327_v59 = vadd.f32 %v5072_v2, %v6197_v56 }
 0x209   : > { %v3478_v4 = vadd.f32 %v3477_v32, %v6320_v33  ;;  %v6331_v43 = vadd.f32 %v5073_v57, %v6197_v56 }
 0x20a   : > { %v4334_v7 = vpack.c.bf16 %v6327_v59, %v6324_v49  ;;  %v4836_v38 = vpop.f32.mrb[24].mxu1 }
 0x20b   : > { %v4329_v36 = vpack.c.bf16 %v6331_v43, %v6320_v33  ;;  %v3479_v53 = vadd.f32 %v3478_v4, %v6331_v43  ;;  %v5028_v46 = vpop.f32.mrb[24].mxu0  ;;  %v1970_v9 = vpop.f32.mrb[25].mxu1 }
 0x20c   : > { %4381 = vst [vmem:[%s6213_s27 + $0x58] sm:$0xff] %v4334_v7   ;;  %v5074_v5 = vadd.f32 %v5028_v46, %v4836_v38  ;;  %v3197_v13 = vpop.f32.mrb[25].mxu0  ;;  %v4837_v48 = vpop.f32.mrb[26].mxu1 }
 0x20d   : > { %4380 = vst [vmem:[%s6213_s27 + $0x50] sm:$0xff] %v4329_v36   ;;  %v3480_v47 = vadd.f32 %v3479_v53, %v6324_v49  ;;  %v5075_v15 = vadd.f32 %v3197_v13, %v1970_v9  ;;  %v5029_v3 = vpop.f32.mrb[26].mxu0  ;;  %v1973_v22 = vpop.f32.mrb[27].mxu1 }
 0x20e   : > { %v5076_v50 = vadd.f32 %v5029_v3, %v4837_v48  ;;  %v3200_v25 = vpop.f32.mrb[27].mxu0  ;;  %v6346_v1 = vadd.f32 %v5074_v5, %v6197_v56 }
 0x20f   : > { %v6342_v20 = vadd.f32 %v5075_v15, %v6197_v56  ;;  %v3481_v19 = vadd.f32 %v3480_v47, %v6327_v59  ;;  %v5077_v8 = vadd.f32 %v3200_v25, %v1973_v22 }
 0x210   : > { %v6349_v63 = vadd.f32 %v5076_v50, %v6197_v56 }
 0x211   : > { %v3482_v40 = vadd.f32 %v3481_v19, %v6342_v20  ;;  %v6353_v11 = vadd.f32 %v5077_v8, %v6197_v56 }
 0x212   : > { %v4344_v28 = vpack.c.bf16 %v6349_v63, %v6346_v1  ;;  %v4840_v42 = vpop.f32.mrb[28].mxu1 }
 0x213   : > { %v4339_v45 = vpack.c.bf16 %v6353_v11, %v6342_v20  ;;  %v3483_v51 = vadd.f32 %v3482_v40, %v6353_v11  ;;  %v5032_v52 = vpop.f32.mrb[28].mxu0  ;;  %v1986_v0 = vpop.f32.mrb[29].mxu1 }
 0x214   : > { %4383 = vst [vmem:[%s6213_s27 + $0x68] sm:$0xff] %v4344_v28   ;;  %v5078_v41 = vadd.f32 %v5032_v52, %v4840_v42  ;;  %v3213_v54 = vpop.f32.mrb[29].mxu0  ;;  %v4841_v12 = vpop.f32.mrb[30].mxu1 }
 0x215   : > { %4382 = vst [vmem:[%s6213_s27 + $0x60] sm:$0xff] %v4339_v45   ;;  %v3484_v21 = vadd.f32 %v3483_v51, %v6346_v1  ;;  %v5079_v24 = vadd.f32 %v3213_v54, %v1986_v0  ;;  %v5033_v29 = vpop.f32.mrb[30].mxu0  ;;  %v1989_v2 = vpop.f32.mrb[31].mxu1 }
 0x216   : > { %v5080_v27 = vadd.f32 %v5033_v29, %v4841_v12  ;;  %v3216_v32 = vpop.f32.mrb[31].mxu0  ;;  %v6368_v38 = vadd.f32 %v5078_v41, %v6197_v56 }
 0x217   : > { %v6364_v57 = vadd.f32 %v5079_v24, %v6197_v56  ;;  %v3485_v4 = vadd.f32 %v3484_v21, %v6349_v63  ;;  %v5081_v7 = vadd.f32 %v3216_v32, %v1989_v2 }
 0x218   : > { %v6371_v36 = vadd.f32 %v5080_v27, %v6197_v56 }
 0x219   : > { %v3486_v53 = vadd.f32 %v3485_v4, %v6364_v57  ;;  %v6375_v46 = vadd.f32 %v5081_v7, %v6197_v56 }
 0x21a   : > { %v4354_v9 = vpack.c.bf16 %v6371_v36, %v6368_v38 }
 0x21b   : > { %v4349_v5 = vpack.c.bf16 %v6375_v46, %v6364_v57  ;;  %v3487_v13 = vadd.f32 %v3486_v53, %v6375_v46 }
 0x21c   : > { %4385 = vst [vmem:[%s6213_s27 + $0x78] sm:$0xff] %v4354_v9  }
 0x21d   : > { %4384 = vst [vmem:[%s6213_s27 + $0x70] sm:$0xff] %v4349_v5   ;;  %v3488_v48 = vadd.f32 %v3487_v13, %v6368_v38 }
 0x21f   : > { %v3489_v47 = vadd.f32 %v3488_v48, %v6371_v36 }
 0x221   : > { %v3490_v15 = vrot.slane %v3489_v47, 4 }
 0x223   : > { %v3491_v3 = vadd.f32 %v3490_v15, %v3489_v47 }
 0x225   : > { %v3492_v22 = vrot.slane %v3491_v3, 2 }
 0x227   : > { %v3493_v50 = vadd.f32 %v3492_v22, %v3491_v3 }
 0x229   : > { %v3494_v56 = vrot.slane %v3493_v50, 1 }
 0x22b   : > { %v6386_v25 = vadd.f32 %v3494_v56, %v3493_v50 }
 0x22d   : > { %v6389_v19 = vmul.f32 0.00390625, %v6386_v25 }
 0x22f   : > { %v3497_v8 = vsub.f32 %v6206_v58, %v6389_v19  ;;  %v3498_v40 = vsub.f32 %v6216_v62, %v6389_v19  ;;  %v3499_v28 = vsub.f32 %v6200_v55, %v6389_v19  ;;  %v3500_v51 = vsub.f32 %v6203_v37, %v6389_v19 }
 0x230   : > { %v3501_v52 = vsub.f32 %v6228_v14, %v6389_v19  ;;  %v3502_v54 = vsub.f32 %v6239_v10, %v6389_v19  ;;  %v3503_v62 = vsub.f32 %v6232_v23, %v6389_v19  ;;  %v3504_v24 = vsub.f32 %v6235_v17, %v6389_v19 }
 0x231   : > { %v3529_v42 = vmul.f32 %v3497_v8, %v3497_v8  ;;  %v3530_v45 = vmul.f32 %v3498_v40, %v3498_v40  ;;  %v3531_v0 = vmul.f32 %v3499_v28, %v3499_v28  ;;  %v3532_v58 = vmul.f32 %v3500_v51, %v3500_v51 }
 0x232   : > { %v3533_v21 = vmul.f32 %v3501_v52, %v3501_v52  ;;  %v3534_v29 = vmul.f32 %v3502_v54, %v3502_v54  ;;  %v3505_v14 = vsub.f32 %v6250_v34, %v6389_v19  ;;  %v3535_v2 = vmul.f32 %v3503_v62, %v3503_v62 }
 0x233   : > { %v3561_v41 = vadd.f32 %v3530_v45, %v3529_v42  ;;  %v3506_v10 = vsub.f32 %v6261_v60, %v6389_v19  ;;  %v3536_v32 = vmul.f32 %v3504_v24, %v3504_v24  ;;  %v3507_v23 = vsub.f32 %v6254_v18, %v6389_v19 }
 0x234   : > { %v3537_v7 = vmul.f32 %v3505_v14, %v3505_v14  ;;  %v3508_v17 = vsub.f32 %v6257_v30, %v6389_v19  ;;  %v3509_v34 = vsub.f32 %v6275_v6, %v6389_v19  ;;  %v3510_v60 = vsub.f32 %v6287_v44, %v6389_v19 }
 0x235   : > { %v3562_v12 = vadd.f32 %v3561_v41, %v3531_v0  ;;  %v3538_v9 = vmul.f32 %v3506_v10, %v3506_v10  ;;  %v3539_v13 = vmul.f32 %v3507_v23, %v3507_v23  ;;  %v3511_v18 = vsub.f32 %v6280_v31, %v6389_v19 }
 0x236   : > { %v3540_v47 = vmul.f32 %v3508_v17, %v3508_v17  ;;  %v3541_v3 = vmul.f32 %v3509_v34, %v3509_v34  ;;  %v3512_v30 = vsub.f32 %v6283_v61, %v6389_v19  ;;  %v3542_v50 = vmul.f32 %v3510_v60, %v3510_v60 }
 0x237   : > { %v3563_v55 = vadd.f32 %v3562_v12, %v3532_v58  ;;  %v3513_v6 = vsub.f32 %v6298_v16, %v6389_v19  ;;  %v3543_v8 = vmul.f32 %v3511_v18, %v3511_v18  ;;  %v3514_v44 = vsub.f32 %v6309_v35, %v6389_v19 }
 0x238   : > { %v3544_v28 = vmul.f32 %v3512_v30, %v3512_v30  ;;  %v3515_v31 = vsub.f32 %v6302_v26, %v6389_v19  ;;  %v3516_v61 = vsub.f32 %v6305_v39, %v6389_v19  ;;  %v3517_v16 = vsub.f32 %v6320_v33, %v6389_v19 }
 0x239   : > { %v3564_v37 = vadd.f32 %v3563_v55, %v3533_v21  ;;  %v3545_v45 = vmul.f32 %v3513_v6, %v3513_v6  ;;  %v3546_v52 = vmul.f32 %v3514_v44, %v3514_v44  ;;  %v3518_v35 = vsub.f32 %v6331_v43, %v6389_v19 }
 0x23a   : > { %v3547_v41 = vmul.f32 %v3515_v31, %v3515_v31  ;;  %v3548_v58 = vmul.f32 %v3516_v61, %v3516_v61  ;;  %v3519_v26 = vsub.f32 %v6324_v49, %v6389_v19  ;;  %v3549_v62 = vmul.f32 %v3517_v16, %v3517_v16 }
 0x23b   : > { %v3565_v27 = vadd.f32 %v3564_v37, %v3534_v29  ;;  %v3520_v39 = vsub.f32 %v6327_v59, %v6389_v19  ;;  %v3550_v55 = vmul.f32 %v3518_v35, %v3518_v35  ;;  %v3521_v33 = vsub.f32 %v6342_v20, %v6389_v19 }
 0x23c   : > { %v3551_v29 = vmul.f32 %v3519_v26, %v3519_v26  ;;  %v3522_v43 = vsub.f32 %v6353_v11, %v6389_v19  ;;  %v3523_v49 = vsub.f32 %v6346_v1, %v6389_v19  ;;  %v3524_v59 = vsub.f32 %v6349_v63, %v6389_v19 }
 0x23d   : > { %v3566_v4 = vadd.f32 %v3565_v27, %v3535_v2  ;;  %v3552_v14 = vmul.f32 %v3520_v39, %v3520_v39  ;;  %v3553_v27 = vmul.f32 %v3521_v33, %v3521_v33  ;;  %v3525_v20 = vsub.f32 %v6364_v57, %v6389_v19 }
 0x23e   : > { %v3555_v23 = vmul.f32 %v3523_v49, %v3523_v49  ;;  %v3526_v11 = vsub.f32 %v6375_v46, %v6389_v19  ;;  %v3527_v1 = vsub.f32 %v6368_v38, %v6389_v19  ;;  %v3528_v63 = vsub.f32 %v6371_v36, %v6389_v19 }
 0x23f   : > { %v3567_v53 = vadd.f32 %v3566_v4, %v3536_v32  ;;  %v3554_v32 = vmul.f32 %v3522_v43, %v3522_v43 }
 0x240   : > { %v3558_v34 = vmul.f32 %v3526_v11, %v3526_v11  ;;  %v3560_v60 = vmul.f32 %v3528_v63, %v3528_v63 }
 0x241   : > { %v3568_v5 = vadd.f32 %v3567_v53, %v3537_v7  ;;  %v3556_v53 = vmul.f32 %v3524_v59, %v3524_v59 }
 0x243   : > { %v3569_v48 = vadd.f32 %v3568_v5, %v3538_v9  ;;  %v3557_v9 = vmul.f32 %v3525_v20, %v3525_v20 }
 0x245   : > { %v3570_v15 = vadd.f32 %v3569_v48, %v3539_v13  ;;  %v3559_v48 = vmul.f32 %v3527_v1, %v3527_v1 }
 0x247   : > { %v3571_v22 = vadd.f32 %v3570_v15, %v3540_v47 }
 0x249   : > { %v3572_v56 = vadd.f32 %v3571_v22, %v3541_v3 }
 0x24b   : > { %v3573_v40 = vadd.f32 %v3572_v56, %v3542_v50 }
 0x24d   : > { %v3574_v42 = vadd.f32 %v3573_v40, %v3543_v8 }
 0x24f   : > { %v3575_v51 = vadd.f32 %v3574_v42, %v3544_v28 }
 0x251   : > { %v3576_v0 = vadd.f32 %v3575_v51, %v3545_v45 }
 0x253   : > { %v3577_v54 = vadd.f32 %v3576_v0, %v3546_v52 }
 0x255   : > { %v3578_v12 = vadd.f32 %v3577_v54, %v3547_v41 }
 0x257   : > { %v3579_v21 = vadd.f32 %v3578_v12, %v3548_v58 }
 0x259   : > { %v3580_v24 = vadd.f32 %v3579_v21, %v3549_v62 }
 0x25b   : > { %v3581_v37 = vadd.f32 %v3580_v24, %v3550_v55 }
 0x25d   : > { %v3582_v2 = vadd.f32 %v3581_v37, %v3551_v29 }
 0x25f   : > { %v3583_v10 = vadd.f32 %v3582_v2, %v3552_v14 }
 0x261   : > { %v3584_v4 = vadd.f32 %v3583_v10, %v3553_v27 }
 0x263   : > { %v3585_v7 = vadd.f32 %v3584_v4, %v3554_v32 }
 0x265   : > { %v3586_v17 = vadd.f32 %v3585_v7, %v3555_v23 }
 0x267   : > { %v3587_v5 = vadd.f32 %v3586_v17, %v3556_v53 }
 0x269   : > { %v3588_v13 = vadd.f32 %v3587_v5, %v3557_v9 }
 0x26b   : > { %v3589_v57 = vadd.f32 %v3588_v13, %v3558_v34 }
 0x26d   : > { %v3590_v47 = vadd.f32 %v3589_v57, %v3559_v48 }
 0x26f   : > { %v3591_v15 = vadd.f32 %v3590_v47, %v3560_v60 }
 0x271   : > { %v3592_v18 = vrot.slane %v3591_v15, 4 }
 0x273   : > { %v3593_v46 = vadd.f32 %v3592_v18, %v3591_v15 }
 0x275   : > { %v3594_v3 = vrot.slane %v3593_v46, 2 }
 0x277   : > { %v3595_v22 = vadd.f32 %v3594_v3, %v3593_v46 }
 0x279   : > { %v3596_v30 = vrot.slane %v3595_v22, 1 }
 0x27b   : > { %v3597_v38 = vadd.f32 %v3596_v30, %v3595_v22 }
 0x27d   : > { %v3599_v36 = vsel %vm3598_vm0, %v6386_v25, %v3597_v38 }
 0x27e   : > { %3600 = vst [vmem:[%s295_s30] sm:$0x3] %v3599_v36 }
 0x27f PF: > { %s17_s23 = sadd.s32 1, %s5434_s23   ;;  %s6476_s21 = smov %s5430_s22 }
 0x280   : > { %p14_p5 = scmp.ge.s32.totalorder %s17_s23, 4   ;;  %s6477_s22 = smov %s6479_s24 }
 0x282   :  { %16 = sbr.rel (!%p14_p5) target bundleno = 2 (0x2), region = 98 }

</bundles_post_ra>
